<compile_context>
chip_gen: v7x
topology: tpu7x:2x2x1
jax: 0.10.0
libtpu: 0.0.40
codegen_flags: <defaults>
</compile_context>

<pallas_src>
import functools
import math
import random

import jax
import jax.numpy as jnp
from jax.experimental import pallas as pl
from jax.experimental.pallas import tpu as pltpu

HIDDEN = 512            # LSTMCell hidden size (fixed by the module)
FEAT = 32 * 6 * 6       # 1152, LSTM input features (fixed by the module)
GATE_TILE = HIDDEN      # one LSTM gate chunk (i / f / g / o) per grid step


# ----------------------------------------------------------------------------
# Conv-as-matmul Pallas kernel (bias + ReLU fused)
# ----------------------------------------------------------------------------
def _mm_bias_relu_kernel(x_ref, w_ref, b_ref, o_ref):
    y = jnp.dot(x_ref[...], w_ref[...], preferred_element_type=jnp.float32)
    o_ref[...] = jnp.maximum(y + b_ref[...], 0.0).astype(o_ref.dtype)


def _mm_bias_relu(x, w, b_row, out_dtype=jnp.float32):
    """(M,K) @ (K,N) + b, fused ReLU, single-block kernel (conv-as-matmul)."""
    M = x.shape[0]
    N = w.shape[1]
    vmem = pl.BlockSpec(memory_space=pltpu.MemorySpace.VMEM)
    return pl.pallas_call(
        _mm_bias_relu_kernel,
        out_shape=jax.ShapeDtypeStruct((M, N), out_dtype),
        in_specs=[vmem, vmem, vmem],
        out_specs=vmem,
    )(x, w, b_row)


# ----------------------------------------------------------------------------
# Fused per-step kernel: LSTM cell + actor/critic head (+ gate linear)
# Grid = (4,) over the 512-wide gate chunks of the stacked LSTM weight.
# ----------------------------------------------------------------------------
def _fused_step_kernel(*refs, has_gate):
    if has_gate:
        (xh_ref, c_ref, wbig_ref, bbig_ref, whead_ref, bhead_ref,
         wg_ref, bg_ref,
         heads_ref, ho_ref, co_ref, g_ref, acc_ref) = refs
    else:
        (xh_ref, c_ref, wbig_ref, bbig_ref, whead_ref, bhead_ref,
         heads_ref, ho_ref, co_ref, acc_ref) = refs

    n = pl.program_id(0)
    last = pl.num_programs(0) - 1

    # Per-tile gate-chunk matmul: (B, 1664) @ (1664, 512) -> f32.
    # The weight tile DMA for step n+1 overlaps this (BlockSpec pipelining).
    chunk = (jnp.dot(xh_ref[...], wbig_ref[...],
                     preferred_element_type=jnp.float32) + bbig_ref[...])

    # Stash the i / f / g chunks; the o chunk (last tile) is used in place.
    for k in range(3):
        @pl.when(n == k)
        def _(k=k):
            acc_ref[k] = chunk

    @pl.when(n == last)
    def _():
        # PyTorch LSTMCell gate order: input, forget, cell(g), output.
        i_g = jax.nn.sigmoid(acc_ref[0])
        f_g = jax.nn.sigmoid(acc_ref[1])
        g_g = jnp.tanh(acc_ref[2])
        o_g = jax.nn.sigmoid(chunk)
        c_new = f_g * c_ref[...] + i_g * g_g
        h_new = o_g * jnp.tanh(c_new)
        ho_ref[...] = h_new
        co_ref[...] = c_new

        # actor + critic in one matmul; critic weight is the last column.
        heads_ref[...] = (
            jnp.dot(h_new.astype(jnp.bfloat16), whead_ref[...],
                    preferred_element_type=jnp.float32) + bhead_ref[...])

        if has_gate:
            x_part = xh_ref[:, :FEAT]          # static lane slice of [x, h]
            g_ref[...] = jax.nn.sigmoid(
                jnp.dot(x_part, wg_ref[...],
                        preferred_element_type=jnp.float32) + bg_ref[...])


@functools.lru_cache(maxsize=None)
def _build_fused_step(batch, num_actions, num_sequence):
    has_gate = num_sequence != 0
    n_heads = num_actions + 1
    kernel = functools.partial(_fused_step_kernel, has_gate=has_gate)

    const2d = lambda n: (0, 0)
    in_specs = [
        pl.BlockSpec((batch, FEAT + HIDDEN), const2d),                # [x, h] bf16
        pl.BlockSpec((batch, HIDDEN), const2d),                       # cx f32
        pl.BlockSpec((FEAT + HIDDEN, GATE_TILE), lambda n: (0, n)),   # stacked W, tiled on N
        pl.BlockSpec((1, GATE_TILE), lambda n: (0, n)),               # stacked bias, tiled
        pl.BlockSpec((HIDDEN, n_heads), const2d),                     # actor|critic W
        pl.BlockSpec((1, n_heads), const2d),                          # actor|critic b
    ]
    out_shape = [
        jax.ShapeDtypeStruct((batch, n_heads), jnp.float32),          # actor|critic
        jax.ShapeDtypeStruct((batch, HIDDEN), jnp.float32),           # hx
        jax.ShapeDtypeStruct((batch, HIDDEN), jnp.float32),           # cx
    ]
    out_specs = [
        pl.BlockSpec((batch, n_heads), const2d),
        pl.BlockSpec((batch, HIDDEN), const2d),
        pl.BlockSpec((batch, HIDDEN), const2d),
    ]
    if has_gate:
        in_specs += [
            pl.BlockSpec((FEAT, num_sequence), const2d),              # gate W
            pl.BlockSpec((1, num_sequence), const2d),                 # gate b
        ]
        out_shape.append(jax.ShapeDtypeStruct((batch, num_sequence), jnp.float32))
        out_specs.append(pl.BlockSpec((batch, num_sequence), const2d))

    call = pl.pallas_call(
        kernel,
        out_shape=tuple(out_shape),
        grid_spec=pltpu.PrefetchScalarGridSpec(
            num_scalar_prefetch=0,
            grid=(4,),                      # 4 x 512-wide LSTM gate chunks
            in_specs=in_specs,
            out_specs=tuple(out_specs),
            scratch_shapes=[pltpu.VMEM((3, batch, HIDDEN), jnp.float32)]),
        compiler_params=pltpu.CompilerParams(
            dimension_semantics=("arbitrary",),
            vmem_limit_bytes=32 * 1024 * 1024),
    )

    def step(features, hx, cx, *params):
        xh = jnp.concatenate(
            [features.astype(jnp.bfloat16), hx.astype(jnp.bfloat16)], axis=1)
        outs = call(xh, cx, *params)
        heads = outs[0]
        actor = heads[:, :num_actions]
        critic = heads[:, num_actions:num_actions + 1]
        if has_gate:
            return actor, critic, outs[1], outs[2], outs[3]
        return actor, critic, outs[1], outs[2]

    return jax.jit(step)


# ----------------------------------------------------------------------------
# Conv 3x3 / stride 2 / pad 1 + ReLU : im2col (jit-fused glue) + Pallas matmul
# ----------------------------------------------------------------------------
def _conv3x3_s2_relu(x_nhwc, w2d, b_row, out_dtype=jnp.float32):
    """x_nhwc: (N,H,W,Cin); w2d: (K, Cout) pre-reshaped (and K-padded) weight."""
    N, H, W, Cin = x_nhwc.shape
    K, Cout = w2d.shape
    Ho, Wo = (H - 1) // 2 + 1, (W - 1) // 2 + 1
    xp = jnp.pad(x_nhwc, ((0, 0), (1, 1), (1, 1), (0, 0)))
    cols = [
        xp[:, kh:kh + 2 * Ho:2, kw:kw + 2 * Wo:2, :]
        for kh in range(3)
        for kw in range(3)
    ]
    patches = jnp.stack(cols, axis=3).reshape(N * Ho * Wo, 9 * Cin)
    if K > 9 * Cin:  # conv1: contraction dim padded up to a sublane multiple of 8
        patches = jnp.pad(patches, ((0, 0), (0, K - 9 * Cin)))
    out = _mm_bias_relu(patches, w2d, b_row, out_dtype)
    return out.reshape(N, Ho, Wo, Cout)


@jax.jit
def _conv_stack_features(x_nchw, conv_w2ds, conv_bs):
    # NCHW -> NHWC once; the final flatten stays in (H, W, C) order — the LSTM
    # and gate weight columns were permuted at init to match it, so no per-step
    # NHWC->NCHW transpose is needed.  Last layer emits bf16 features directly.
    x = jnp.transpose(x_nchw, (0, 2, 3, 1))
    n_layers = len(conv_w2ds)
    for li, (w2d, b) in enumerate(zip(conv_w2ds, conv_bs)):
        out_dtype = jnp.bfloat16 if li == n_layers - 1 else jnp.float32
        x = _conv3x3_s2_relu(x, w2d, b, out_dtype)
    return x.reshape(x.shape[0], -1)  # (N, 6*6*32) bf16, (H, W, C) order


# ----------------------------------------------------------------------------
# Parameter init (deterministic, mirrors _initialize_weights)
# ----------------------------------------------------------------------------
def _xavier_uniform(key, shape, fan_in, fan_out):
    bound = math.sqrt(6.0 / (fan_in + fan_out))
    return jax.random.uniform(key, shape, jnp.float32, -bound, bound)


def _nchw_to_nhwc_flat_perm(C, H, W):
    """perm[j] = NCHW-flat index feeding NHWC-flat position j."""
    idx = jnp.arange(C * H * W)
    c = idx % C
    w = (idx // C) % W
    h = idx // (C * W)
    return c * (H * W) + h * W + w


class ActorCriticSeq:
    def __init__(self, num_inputs, num_actions, num_sequence, key):
        self.num_actions = num_actions
        self.num_sequence = num_sequence
        keys = jax.random.split(key, 16)

        def conv_w2d(k, cin, cout):
            w = _xavier_uniform(k, (cout, cin, 3, 3), cin * 9, cout * 9)
            # (Cout,Cin,kh,kw) -> (kh,kw,Cin,Cout) -> (9*Cin, Cout), matching
            # the im2col patch ordering; pad K up to a multiple of 8.
            w2d = jnp.transpose(w, (2, 3, 1, 0)).reshape(9 * cin, cout)
            k_pad = ((9 * cin + 7) // 8) * 8
            if k_pad > 9 * cin:
                w2d = jnp.pad(w2d, ((0, k_pad - 9 * cin), (0, 0)))
            return w2d, jnp.zeros((1, cout), jnp.float32)

        c1 = conv_w2d(keys[0], num_inputs, 32)
        c2 = conv_w2d(keys[1], 32, 32)
        c3 = conv_w2d(keys[2], 32, 32)
        c4 = conv_w2d(keys[3], 32, 32)
        self.conv_w2ds = (c1[0], c2[0], c3[0], c4[0])
        self.conv_bs = (c1[1], c2[1], c3[1], c4[1])

        # gate conv stack exists in the PyTorch __init__ but is never used in forward()
        self.conv_gate_params = tuple(
            conv_w2d(keys[4 + i], num_inputs if i == 0 else 32, 32)
            for i in range(4))

        perm = _nchw_to_nhwc_flat_perm(32, 6, 6)

        # PyTorch LSTMCell default weight init; _initialize_weights zeroes the biases.
        std = 1.0 / math.sqrt(HIDDEN)
        w_ih = jax.random.uniform(keys[8], (4 * HIDDEN, FEAT), jnp.float32, -std, std)
        w_hh = jax.random.uniform(keys[9], (4 * HIDDEN, HIDDEN), jnp.float32, -std, std)
        # Stacked [w_ih.T ; w_hh.T] with input columns permuted to NHWC flatten
        # order -> one (1664, 2048) bf16 weight consumed by the fused [x, h] matmul.
        self.w_big = jnp.concatenate([w_ih[:, perm].T, w_hh.T], axis=0
                                     ).astype(jnp.bfloat16)           # (1664, 2048)
        self.b_big = jnp.zeros((1, 4 * HIDDEN), jnp.float32)          # b_ih + b_hh (zero)

        w_c = _xavier_uniform(keys[10], (1, HIDDEN), HIDDEN, 1)
        w_a = _xavier_uniform(keys[11], (num_actions, HIDDEN), HIDDEN, num_actions)
        self.w_head = jnp.concatenate([w_a.T, w_c.T], axis=1).astype(jnp.bfloat16)
        self.b_head = jnp.zeros((1, num_actions + 1), jnp.float32)

        if num_sequence != 0:
            w_g = _xavier_uniform(keys[12], (num_sequence, FEAT), FEAT, num_sequence)
            self.w_gate = w_g[:, perm].T.astype(jnp.bfloat16)         # (1152, num_seq)
            self.b_gate = jnp.zeros((1, num_sequence), jnp.float32)
            self._step_params = (self.w_big, self.b_big, self.w_head, self.b_head,
                                 self.w_gate, self.b_gate)
        else:
            self._step_params = (self.w_big, self.b_big, self.w_head, self.b_head)

        self.counter = 0
        self.x_pre = None
        # TODO(synk): torch.distributions.Bernoulli uses torch's global RNG; here
        # the gate sample comes from a deterministically seeded host RNG.
        self._py_rng = random.Random(0)

    # -- helpers ------------------------------------------------------------
    def _conv_features(self, x_nchw):
        return _conv_stack_features(x_nchw, self.conv_w2ds, self.conv_bs)

    # -- forward ------------------------------------------------------------
    def forward(self, x, hx, cx, g, g_ini, gate_update=True, certain=False):
        update_state = False
        use_new_gate = False
        missing_msg = ("ActorCriticSeq.forward: cached features are empty; the "
                       "first call must run with g_ini=1 (or otherwise hit a "
                       "state update) so x_pre gets populated.")

        if g_ini == 1 or self.counter == self.num_sequence:
            seq_ini_flag1, seq_ini_flag2 = True, False
        else:
            seq_ini_flag1 = False
            # TODO(synk): this scalar read is one device->host sync per step
            # (PyTorch behaves the same via .data / sample()); hiding it needs
            # in-kernel Bernoulli sampling consumed one step later.
            p = float(g[0, self.counter])
            if certain:
                p = float(round(p))
            gate_sample = self._py_rng.random() < p
            if gate_sample:
                seq_ini_flag2 = False
                if gate_update:
                    self.counter += 1
            else:
                seq_ini_flag2 = True

        if gate_update:
            if seq_ini_flag1 or seq_ini_flag2:
                update_state = True
                self.counter = 0
                self.x_pre = self._conv_features(x)
                if self.num_sequence != 0:
                    use_new_gate = True  # new g comes out of the fused kernel
                else:
                    # mirrors PyTorch: zeros land in the `self.g` attribute; the
                    # returned `g` stays the unchanged input.
                    self.g = jnp.zeros((1, self.num_sequence), jnp.float32)
            if self.x_pre is None:
                raise RuntimeError(missing_msg)
            lstm_in = self.x_pre
        elif seq_ini_flag1 or seq_ini_flag2:
            update_state = True
            lstm_in = self._conv_features(x)
        else:
            if self.x_pre is None:
                raise RuntimeError(missing_msg)
            lstm_in = self.x_pre

        step = _build_fused_step(lstm_in.shape[0], self.num_actions,
                                 self.num_sequence)
        outs = step(lstm_in, hx, cx, *self._step_params)
        if self.num_sequence != 0:
            actor_out, critic_out, hx, cx, g_new = outs
            if use_new_gate:
                g = g_new
        else:
            actor_out, critic_out, hx, cx = outs

        return (actor_out, critic_out, hx, cx, g, self.counter,
                seq_ini_flag1, seq_ini_flag2, update_state)


# ----------------------------------------------------------------------------
# Pure-JAX reference of the fused step (same bf16 weights, f32 accumulation)
# ----------------------------------------------------------------------------
def _ref_step(model, feats_bf16, hx, cx):
    xh = jnp.concatenate([feats_bf16.astype(jnp.bfloat16),
                          hx.astype(jnp.bfloat16)], axis=1)
    gates = jnp.dot(xh, model.w_big, preferred_element_type=jnp.float32) + model.b_big
    i = jax.nn.sigmoid(gates[:, 0 * HIDDEN:1 * HIDDEN])
    f = jax.nn.sigmoid(gates[:, 1 * HIDDEN:2 * HIDDEN])
    gc = jnp.tanh(gates[:, 2 * HIDDEN:3 * HIDDEN])
    o = jax.nn.sigmoid(gates[:, 3 * HIDDEN:4 * HIDDEN])
    c_new = f * cx + i * gc
    h_new = o * jnp.tanh(c_new)
    heads = (jnp.dot(h_new.astype(jnp.bfloat16), model.w_head,
                     preferred_element_type=jnp.float32) + model.b_head)
    gate = jax.nn.sigmoid(
        jnp.dot(feats_bf16.astype(jnp.bfloat16), model.w_gate,
                preferred_element_type=jnp.float32) + model.b_gate)
    return (heads[:, :model.num_actions],
            heads[:, model.num_actions:model.num_actions + 1],
            h_new, c_new, gate)


def _max_diff(a, b):
    return float(jnp.max(jnp.abs(a.astype(jnp.float32) - b.astype(jnp.float32))))


# ----------------------------------------------------------------------------
if __name__ == "__main__":
    num_inputs, num_actions, num_sequence = 3, 6, 8
    key = jax.random.PRNGKey(0)
    k_param, k_x, k_g = jax.random.split(key, 3)

    model = ActorCriticSeq(num_inputs, num_actions, num_sequence, k_param)

    # 96x96 input -> 48 -> 24 -> 12 -> 6 spatial, matching the module's 32*6*6 flatten
    x = jax.random.normal(k_x, (1, num_inputs, 96, 96), jnp.float32)  # NCHW
    hx = jnp.zeros((1, HIDDEN), jnp.float32)
    cx = jnp.zeros((1, HIDDEN), jnp.float32)
    g = jax.random.uniform(k_g, (1, num_sequence), jnp.float32)

    # Step 1: forced state update (g_ini=1) -> conv stack + gate + LSTM + heads
    outs = model.forward(x, hx, cx, g, g_ini=1, gate_update=True)
    actor_out, critic_out, hx1, cx1, g1, counter, f1, f2, upd = outs
    jax.block_until_ready((actor_out, critic_out, hx1, cx1, g1))

    assert actor_out.shape == (1, num_actions)
    assert critic_out.shape == (1, 1)
    assert hx1.shape == (1, HIDDEN) and cx1.shape == (1, HIDDEN)
    assert g1.shape == (1, num_sequence)
    assert f1 is True and f2 is False and upd is True and counter == 0

    # Correctness check of the fused Pallas step against a pure-JAX reference
    ra, rv, rh, rc, rg = _ref_step(model, model.x_pre, hx, cx)
    tol = 1e-2
    assert _max_diff(actor_out, ra) < tol
    assert _max_diff(critic_out, rv) < tol
    assert _max_diff(hx1, rh) < tol
    assert _max_diff(cx1, rc) < tol
    assert _max_diff(g1, rg) < tol

    # Step 2: gate-sampling path (either reuses cached features or re-runs convs)
    outs2 = model.forward(x, hx1, cx1, g1, g_ini=0, gate_update=True)
    a2, v2, hx2, cx2, g2, counter2, f1b, f2b, upd2 = outs2
    jax.block_until_ready((a2, v2, hx2, cx2, g2))
    assert a2.shape == (1, num_actions) and v2.shape == (1, 1)
    assert hx2.shape == (1, HIDDEN) and cx2.shape == (1, HIDDEN)

    print("KERNEL_OK")
</pallas_src>

<mosaic_0001>
module attributes {stable_mosaic.version = 11 : i64} {
  func.func @_mm_bias_relu_kernel(%arg0: memref<2304x32xf32, #tpu.memory_space<vmem>>, %arg1: memref<32x32xf32, #tpu.memory_space<vmem>>, %arg2: memref<1x32xf32, #tpu.memory_space<vmem>>, %arg3: memref<2304x32xf32, #tpu.memory_space<vmem>>) attributes {dimension_semantics = [], scalar_prefetch = 0 : i64, scratch_operands = 0 : i64, tpu.core_type = #tpu.core_type<tc>} {
    %c0 = arith.constant 0 : index
    %c0_0 = arith.constant 0 : index
    %0 = vector.load %arg0[%c0, %c0_0] : memref<2304x32xf32, #tpu.memory_space<vmem>>, vector<2304x32xf32>
    %c0_1 = arith.constant 0 : index
    %c0_2 = arith.constant 0 : index
    %1 = vector.load %arg1[%c0_1, %c0_2] : memref<32x32xf32, #tpu.memory_space<vmem>>, vector<32x32xf32>
    %cst = arith.constant dense<0.000000e+00> : vector<2304x32xf32>
    %2 = tpu.matmul %0, %1, %cst {dimension_numbers = #tpu.dot_dimension_numbers<[1], [0], [0], [1], [0, 0, 1, 1], [], []>} : vector<2304x32xf32>, vector<32x32xf32>, vector<2304x32xf32> -> vector<2304x32xf32>
    %c0_3 = arith.constant 0 : index
    %c0_4 = arith.constant 0 : index
    %3 = vector.load %arg2[%c0_3, %c0_4] : memref<1x32xf32, #tpu.memory_space<vmem>>, vector<1x32xf32>
    %4 = vector.broadcast %3 : vector<1x32xf32> to vector<2304x32xf32>
    %5 = arith.addf %2, %4 : vector<2304x32xf32>
    %cst_5 = arith.constant 0.000000e+00 : f32
    %6 = vector.broadcast %cst_5 : f32 to vector<2304x32xf32>
    %7 = arith.maximumf %5, %6 : vector<2304x32xf32>
    %c0_6 = arith.constant 0 : index
    %c0_7 = arith.constant 0 : index
    %8 = vector.load %arg3[%c0_6, %c0_7] : memref<2304x32xf32, #tpu.memory_space<vmem>>, vector<2304x32xf32>
    tpu.vector_store %arg3[%c0_6, %c0_7], %7 {strides = array<i32>} : memref<2304x32xf32, #tpu.memory_space<vmem>>, vector<2304x32xf32>,
    return
  }
}

module attributes {stable_mosaic.version = 11 : i64} {
  func.func @_mm_bias_relu_kernel(%arg0: memref<576x288xf32, #tpu.memory_space<vmem>>, %arg1: memref<288x32xf32, #tpu.memory_space<vmem>>, %arg2: memref<1x32xf32, #tpu.memory_space<vmem>>, %arg3: memref<576x32xf32, #tpu.memory_space<vmem>>) attributes {dimension_semantics = [], scalar_prefetch = 0 : i64, scratch_operands = 0 : i64, tpu.core_type = #tpu.core_type<tc>} {
    %c0 = arith.constant 0 : index
    %c0_0 = arith.constant 0 : index
    %0 = vector.load %arg0[%c0, %c0_0] : memref<576x288xf32, #tpu.memory_space<vmem>>, vector<576x288xf32>
    %c0_1 = arith.constant 0 : index
    %c0_2 = arith.constant 0 : index
    %1 = vector.load %arg1[%c0_1, %c0_2] : memref<288x32xf32, #tpu.memory_space<vmem>>, vector<288x32xf32>
    %cst = arith.constant dense<0.000000e+00> : vector<576x32xf32>
    %2 = tpu.matmul %0, %1, %cst {dimension_numbers = #tpu.dot_dimension_numbers<[1], [0], [0], [1], [0, 0, 1, 1], [], []>} : vector<576x288xf32>, vector<288x32xf32>, vector<576x32xf32> -> vector<576x32xf32>
    %c0_3 = arith.constant 0 : index
    %c0_4 = arith.constant 0 : index
    %3 = vector.load %arg2[%c0_3, %c0_4] : memref<1x32xf32, #tpu.memory_space<vmem>>, vector<1x32xf32>
    %4 = vector.broadcast %3 : vector<1x32xf32> to vector<576x32xf32>
    %5 = arith.addf %2, %4 : vector<576x32xf32>
    %cst_5 = arith.constant 0.000000e+00 : f32
    %6 = vector.broadcast %cst_5 : f32 to vector<576x32xf32>
    %7 = arith.maximumf %5, %6 : vector<576x32xf32>
    %c0_6 = arith.constant 0 : index
    %c0_7 = arith.constant 0 : index
    %8 = vector.load %arg3[%c0_6, %c0_7] : memref<576x32xf32, #tpu.memory_space<vmem>>, vector<576x32xf32>
    tpu.vector_store %arg3[%c0_6, %c0_7], %7 {strides = array<i32>} : memref<576x32xf32, #tpu.memory_space<vmem>>, vector<576x32xf32>,
    return
  }
}

module attributes {stable_mosaic.version = 11 : i64} {
  func.func @_mm_bias_relu_kernel(%arg0: memref<144x288xf32, #tpu.memory_space<vmem>>, %arg1: memref<288x32xf32, #tpu.memory_space<vmem>>, %arg2: memref<1x32xf32, #tpu.memory_space<vmem>>, %arg3: memref<144x32xf32, #tpu.memory_space<vmem>>) attributes {dimension_semantics = [], scalar_prefetch = 0 : i64, scratch_operands = 0 : i64, tpu.core_type = #tpu.core_type<tc>} {
    %c0 = arith.constant 0 : index
    %c0_0 = arith.constant 0 : index
    %0 = vector.load %arg0[%c0, %c0_0] : memref<144x288xf32, #tpu.memory_space<vmem>>, vector<144x288xf32>
    %c0_1 = arith.constant 0 : index
    %c0_2 = arith.constant 0 : index
    %1 = vector.load %arg1[%c0_1, %c0_2] : memref<288x32xf32, #tpu.memory_space<vmem>>, vector<288x32xf32>
    %cst = arith.constant dense<0.000000e+00> : vector<144x32xf32>
    %2 = tpu.matmul %0, %1, %cst {dimension_numbers = #tpu.dot_dimension_numbers<[1], [0], [0], [1], [0, 0, 1, 1], [], []>} : vector<144x288xf32>, vector<288x32xf32>, vector<144x32xf32> -> vector<144x32xf32>
    %c0_3 = arith.constant 0 : index
    %c0_4 = arith.constant 0 : index
    %3 = vector.load %arg2[%c0_3, %c0_4] : memref<1x32xf32, #tpu.memory_space<vmem>>, vector<1x32xf32>
    %4 = vector.broadcast %3 : vector<1x32xf32> to vector<144x32xf32>
    %5 = arith.addf %2, %4 : vector<144x32xf32>
    %cst_5 = arith.constant 0.000000e+00 : f32
    %6 = vector.broadcast %cst_5 : f32 to vector<144x32xf32>
    %7 = arith.maximumf %5, %6 : vector<144x32xf32>
    %c0_6 = arith.constant 0 : index
    %c0_7 = arith.constant 0 : index
    %8 = vector.load %arg3[%c0_6, %c0_7] : memref<144x32xf32, #tpu.memory_space<vmem>>, vector<144x32xf32>
    tpu.vector_store %arg3[%c0_6, %c0_7], %7 {strides = array<i32>} : memref<144x32xf32, #tpu.memory_space<vmem>>, vector<144x32xf32>,
    return
  }
}

module attributes {stable_mosaic.version = 11 : i64} {
  func.func @_mm_bias_relu_kernel(%arg0: memref<36x288xf32, #tpu.memory_space<vmem>>, %arg1: memref<288x32xf32, #tpu.memory_space<vmem>>, %arg2: memref<1x32xf32, #tpu.memory_space<vmem>>, %arg3: memref<36x32xbf16, #tpu.memory_space<vmem>>) attributes {dimension_semantics = [], scalar_prefetch = 0 : i64, scratch_operands = 0 : i64, tpu.core_type = #tpu.core_type<tc>} {
    %c0 = arith.constant 0 : index
    %c0_0 = arith.constant 0 : index
    %0 = vector.load %arg0[%c0, %c0_0] : memref<36x288xf32, #tpu.memory_space<vmem>>, vector<36x288xf32>
    %c0_1 = arith.constant 0 : index
    %c0_2 = arith.constant 0 : index
    %1 = vector.load %arg1[%c0_1, %c0_2] : memref<288x32xf32, #tpu.memory_space<vmem>>, vector<288x32xf32>
    %cst = arith.constant dense<0.000000e+00> : vector<36x32xf32>
    %2 = tpu.matmul %0, %1, %cst {dimension_numbers = #tpu.dot_dimension_numbers<[1], [0], [0], [1], [0, 0, 1, 1], [], []>} : vector<36x288xf32>, vector<288x32xf32>, vector<36x32xf32> -> vector<36x32xf32>
    %c0_3 = arith.constant 0 : index
    %c0_4 = arith.constant 0 : index
    %3 = vector.load %arg2[%c0_3, %c0_4] : memref<1x32xf32, #tpu.memory_space<vmem>>, vector<1x32xf32>
    %4 = vector.broadcast %3 : vector<1x32xf32> to vector<36x32xf32>
    %5 = arith.addf %2, %4 : vector<36x32xf32>
    %cst_5 = arith.constant 0.000000e+00 : f32
    %6 = vector.broadcast %cst_5 : f32 to vector<36x32xf32>
    %7 = arith.maximumf %5, %6 : vector<36x32xf32>
    %8 = arith.truncf %7 : vector<36x32xf32> to vector<36x32xbf16>
    %c0_6 = arith.constant 0 : index
    %c0_7 = arith.constant 0 : index
    %9 = vector.load %arg3[%c0_6, %c0_7] : memref<36x32xbf16, #tpu.memory_space<vmem>>, vector<36x32xbf16>
    tpu.vector_store %arg3[%c0_6, %c0_7], %8 {strides = array<i32>} : memref<36x32xbf16, #tpu.memory_space<vmem>>, vector<36x32xbf16>,
    return
  }
}

</mosaic_0001>

<bundles_post_ra>
// kernel: _conv_stack_features.4
= control target key start
LH: loop header
LB: loop body
LE: loop exit
PB: predicated region body
PF: predicated region fallthrough
CT: control target
= control target key end

     0   :  { %vm313_vm0 = vcmask 261120   ;;  %s6937_s1 = inlined_call_operand.vmem [shape: f32[32,32], index: 1, kind: input, shape index: {}]   ;;  %s6938_s0 = inlined_call_operand.vmem [shape: f32[2304,32], index: 0, kind: input, shape index: {}]   ;;  %s6939_s2 = inlined_call_operand.vmem [shape: f32[1,32], index: 2, kind: input, shape index: {}]   ;;  %s6940_s3 = inlined_call_operand.vmem [shape: f32[2304,32], index: 3, kind: output, shape index: {}]  }
   0x1   :  { %v302_v0 = vld [vmem:[%s6937_s1] sm:$0xff]  ;;  %v303_v1 = vld [vmem:[%s6937_s1 + $0x8] sm:$0xff]  ;;  %v304_v2 = vld [vmem:[%s6937_s1 + $0x10] sm:$0xff] }
   0x2   :  { %v4284_v3 = vpack.c.bf16 %v303_v1, %v302_v0  ;;  %v305_v4 = vld [vmem:[%s6937_s1 + $0x18] sm:$0xff]  ;;  %v14_v5 = vld [vmem:[%s6938_s0] sm:$0xff]  ;;  %v15_v8 = vld [vmem:[%s6938_s0 + $0x8] sm:$0xff] }
   0x3   :  { %v158_v6 = vld [vmem:[%s6938_s0 + $0x480] sm:$0xff]  ;;  %v4288_v7 = vpack.c.bf16 %v305_v4, %v304_v2  ;;  %3852 = vmatprep.mubr.msk.f32.mxu0 %vm313_vm0, %v14_v5  ;;  %v159_v9 = vld [vmem:[%s6938_s0 + $0x488] sm:$0xff]  ;;  %v16_v10 = vld [vmem:[%s6938_s0 + $0x10] sm:$0xff] }
   0x4   :  { %4068 = vmatprep.mubr.msk.f32.mxu1 %vm313_vm0, %v158_v6  ;;  %4285 = vmatprep.subr.bf16.mxu0 %v4284_v3  ;;  %v160_v11 = vld [vmem:[%s6938_s0 + $0x490] sm:$0xff]  ;;  %v17_v12 = vld [vmem:[%s6938_s0 + $0x18] sm:$0xff]  ;;  %v18_v14 = vld [vmem:[%s6938_s0 + $0x20] sm:$0xff] }
   0x5   :  { %4292 = vmatprep.subr.bf16.mxu1 %v4284_v3  ;;  %4287 = vmatpush3.bf16.msra.mxu0 %v4284_v3  ;;  %v161_v13 = vld [vmem:[%s6938_s0 + $0x498] sm:$0xff]  ;;  %v162_v15 = vld [vmem:[%s6938_s0 + $0x4a0] sm:$0xff]  ;;  %v19_v16 = vld [vmem:[%s6938_s0 + $0x28] sm:$0xff] }
   0x6   :  { %4294 = vmatpush3.bf16.msra.mxu1 %v4284_v3  ;;  %4289 = vmatprep.subr.bf16.mxu0 %v4288_v7  ;;  %v163_v17 = vld [vmem:[%s6938_s0 + $0x4a8] sm:$0xff]  ;;  %v20_v18 = vld [vmem:[%s6938_s0 + $0x30] sm:$0xff]  ;;  %v21_v20 = vld [vmem:[%s6938_s0 + $0x38] sm:$0xff] }
   0x7   :  { %4293 = vmatprep.subr.bf16.mxu1 %v4288_v7  ;;  %v164_v19 = vld [vmem:[%s6938_s0 + $0x4b0] sm:$0xff]  ;;  %v165_v21 = vld [vmem:[%s6938_s0 + $0x4b8] sm:$0xff]  ;;  %v22_v22 = vld [vmem:[%s6938_s0 + $0x40] sm:$0xff] }
   0x8   :  { %v166_v23 = vld [vmem:[%s6938_s0 + $0x4c0] sm:$0xff]  ;;  %v23_v24 = vld [vmem:[%s6938_s0 + $0x48] sm:$0xff]  ;;  %v24_v26 = vld [vmem:[%s6938_s0 + $0x50] sm:$0xff] }
   0x9   :  { %4291 = vmatpush3.bf16.msra.mxu0 %v4288_v7  ;;  %v167_v25 = vld [vmem:[%s6938_s0 + $0x4c8] sm:$0xff]  ;;  %v168_v27 = vld [vmem:[%s6938_s0 + $0x4d0] sm:$0xff]  ;;  %v25_v28 = vld [vmem:[%s6938_s0 + $0x58] sm:$0xff] }
   0xa   :  { %4295 = vmatpush3.bf16.msra.mxu1 %v4288_v7  ;;  %v169_v29 = vld [vmem:[%s6938_s0 + $0x4d8] sm:$0xff]  ;;  %v26_v30 = vld [vmem:[%s6938_s0 + $0x60] sm:$0xff]  ;;  %v27_v32 = vld [vmem:[%s6938_s0 + $0x68] sm:$0xff] }
   0xb   :  { %v170_v31 = vld [vmem:[%s6938_s0 + $0x4e0] sm:$0xff]  ;;  %v171_v33 = vld [vmem:[%s6938_s0 + $0x4e8] sm:$0xff]  ;;  %v28_v34 = vld [vmem:[%s6938_s0 + $0x70] sm:$0xff] }
   0xc   :  { %3853 = vmatmul.mubr.msk.f32.vlgmr.msra.gmra.mrb[0].mxu0 %vm313_vm0, %v15_v8  ;;  %v172_v35 = vld [vmem:[%s6938_s0 + $0x4f0] sm:$0xff]  ;;  %v29_v36 = vld [vmem:[%s6938_s0 + $0x78] sm:$0xff]  ;;  %v30_v38 = vld [vmem:[%s6938_s0 + $0x80] sm:$0xff] }
   0xd   :  { %4069 = vmatmul.mubr.msk.f32.vlgmr.msra.gmra.mrb[0].mxu1 %vm313_vm0, %v159_v9  ;;  %3855 = vmatprep.mubr.msk.f32.mxu0 %vm313_vm0, %v16_v10  ;;  %v173_v37 = vld [vmem:[%s6938_s0 + $0x4f8] sm:$0xff]  ;;  %v174_v39 = vld [vmem:[%s6938_s0 + $0x500] sm:$0xff]  ;;  %v31_v40 = vld [vmem:[%s6938_s0 + $0x88] sm:$0xff] }
   0xe   :  { %4071 = vmatprep.mubr.msk.f32.mxu1 %vm313_vm0, %v160_v11  ;;  %v175_v41 = vld [vmem:[%s6938_s0 + $0x508] sm:$0xff]  ;;  %v32_v42 = vld [vmem:[%s6938_s0 + $0x90] sm:$0xff]  ;;  %v33_v44 = vld [vmem:[%s6938_s0 + $0x98] sm:$0xff] }
   0xf   :  { %v176_v43 = vld [vmem:[%s6938_s0 + $0x510] sm:$0xff]  ;;  %v177_v45 = vld [vmem:[%s6938_s0 + $0x518] sm:$0xff]  ;;  %v34_v46 = vld [vmem:[%s6938_s0 + $0xa0] sm:$0xff] }
  0x10   :  { %3856 = vmatmul.mubr.msk.f32.gmra.mrb[2].mxu0 %vm313_vm0, %v17_v12  ;;  %v178_v47 = vld [vmem:[%s6938_s0 + $0x520] sm:$0xff]  ;;  %v35_v48 = vld [vmem:[%s6938_s0 + $0xa8] sm:$0xff]  ;;  %v36_v50 = vld [vmem:[%s6938_s0 + $0xb0] sm:$0xff] }
  0x11   :  { %4072 = vmatmul.mubr.msk.f32.gmra.mrb[2].mxu1 %vm313_vm0, %v161_v13  ;;  %3858 = vmatprep.mubr.msk.f32.mxu0 %vm313_vm0, %v18_v14  ;;  %v179_v49 = vld [vmem:[%s6938_s0 + $0x528] sm:$0xff]  ;;  %v180_v51 = vld [vmem:[%s6938_s0 + $0x530] sm:$0xff]  ;;  %v37_v52 = vld [vmem:[%s6938_s0 + $0xb8] sm:$0xff] }
  0x12   :  { %4074 = vmatprep.mubr.msk.f32.mxu1 %vm313_vm0, %v162_v15  ;;  %v181_v53 = vld [vmem:[%s6938_s0 + $0x538] sm:$0xff]  ;;  %v38_v54 = vld [vmem:[%s6938_s0 + $0xc0] sm:$0xff]  ;;  %v39_v56 = vld [vmem:[%s6938_s0 + $0xc8] sm:$0xff] }
  0x13   :  { %v182_v55 = vld [vmem:[%s6938_s0 + $0x540] sm:$0xff]  ;;  %v183_v57 = vld [vmem:[%s6938_s0 + $0x548] sm:$0xff]  ;;  %v40_v58 = vld [vmem:[%s6938_s0 + $0xd0] sm:$0xff] }
  0x14   :  { %3859 = vmatmul.mubr.msk.f32.gmra.mrb[4].mxu0 %vm313_vm0, %v19_v16  ;;  %v184_v59 = vld [vmem:[%s6938_s0 + $0x550] sm:$0xff]  ;;  %v41_v60 = vld [vmem:[%s6938_s0 + $0xd8] sm:$0xff]  ;;  %v42_v62 = vld [vmem:[%s6938_s0 + $0xe0] sm:$0xff] }
  0x15   :  { %4075 = vmatmul.mubr.msk.f32.gmra.mrb[4].mxu1 %vm313_vm0, %v163_v17  ;;  %3861 = vmatprep.mubr.msk.f32.mxu0 %vm313_vm0, %v20_v18  ;;  %v185_v61 = vld [vmem:[%s6938_s0 + $0x558] sm:$0xff]  ;;  %v186_v63 = vld [vmem:[%s6938_s0 + $0x560] sm:$0xff]  ;;  %v43_v0 = vld [vmem:[%s6938_s0 + $0xe8] sm:$0xff] }
  0x16   :  { %4077 = vmatprep.mubr.msk.f32.mxu1 %vm313_vm0, %v164_v19  ;;  %v187_v1 = vld [vmem:[%s6938_s0 + $0x568] sm:$0xff]  ;;  %v44_v2 = vld [vmem:[%s6938_s0 + $0xf0] sm:$0xff]  ;;  %v45_v4 = vld [vmem:[%s6938_s0 + $0xf8] sm:$0xff] }
  0x17   :  { %v188_v3 = vld [vmem:[%s6938_s0 + $0x570] sm:$0xff]  ;;  %v189_v5 = vld [vmem:[%s6938_s0 + $0x578] sm:$0xff]  ;;  %v46_v6 = vld [vmem:[%s6938_s0 + $0x100] sm:$0xff] }
  0x18   :  { %3862 = vmatmul.mubr.msk.f32.gmra.mrb[6].mxu0 %vm313_vm0, %v21_v20  ;;  %v190_v7 = vld [vmem:[%s6938_s0 + $0x580] sm:$0xff]  ;;  %v47_v8 = vld [vmem:[%s6938_s0 + $0x108] sm:$0xff]  ;;  %v48_v10 = vld [vmem:[%s6938_s0 + $0x110] sm:$0xff] }
  0x19   :  { %4078 = vmatmul.mubr.msk.f32.gmra.mrb[6].mxu1 %vm313_vm0, %v165_v21  ;;  %3864 = vmatprep.mubr.msk.f32.mxu0 %vm313_vm0, %v22_v22  ;;  %v191_v9 = vld [vmem:[%s6938_s0 + $0x588] sm:$0xff]  ;;  %v192_v11 = vld [vmem:[%s6938_s0 + $0x590] sm:$0xff]  ;;  %v49_v12 = vld [vmem:[%s6938_s0 + $0x118] sm:$0xff] }
  0x1a   :  { %4080 = vmatprep.mubr.msk.f32.mxu1 %vm313_vm0, %v166_v23  ;;  %v193_v13 = vld [vmem:[%s6938_s0 + $0x598] sm:$0xff]  ;;  %v50_v14 = vld [vmem:[%s6938_s0 + $0x120] sm:$0xff]  ;;  %v51_v16 = vld [vmem:[%s6938_s0 + $0x128] sm:$0xff] }
  0x1b   :  { %v194_v15 = vld [vmem:[%s6938_s0 + $0x5a0] sm:$0xff]  ;;  %v195_v17 = vld [vmem:[%s6938_s0 + $0x5a8] sm:$0xff]  ;;  %v52_v18 = vld [vmem:[%s6938_s0 + $0x130] sm:$0xff] }
  0x1c   :  { %3865 = vmatmul.mubr.msk.f32.gmra.mrb[8].mxu0 %vm313_vm0, %v23_v24  ;;  %v196_v19 = vld [vmem:[%s6938_s0 + $0x5b0] sm:$0xff]  ;;  %v53_v20 = vld [vmem:[%s6938_s0 + $0x138] sm:$0xff]  ;;  %v54_v22 = vld [vmem:[%s6938_s0 + $0x140] sm:$0xff] }
  0x1d   :  { %4081 = vmatmul.mubr.msk.f32.gmra.mrb[8].mxu1 %vm313_vm0, %v167_v25  ;;  %3867 = vmatprep.mubr.msk.f32.mxu0 %vm313_vm0, %v24_v26  ;;  %v197_v21 = vld [vmem:[%s6938_s0 + $0x5b8] sm:$0xff]  ;;  %v198_v23 = vld [vmem:[%s6938_s0 + $0x5c0] sm:$0xff]  ;;  %v55_v24 = vld [vmem:[%s6938_s0 + $0x148] sm:$0xff] }
  0x1e   :  { %4083 = vmatprep.mubr.msk.f32.mxu1 %vm313_vm0, %v168_v27  ;;  %v199_v25 = vld [vmem:[%s6938_s0 + $0x5c8] sm:$0xff]  ;;  %v56_v26 = vld [vmem:[%s6938_s0 + $0x150] sm:$0xff] }
  0x1f   :  { %v200_v27 = vld [vmem:[%s6938_s0 + $0x5d0] sm:$0xff] }
  0x20   :  { %3868 = vmatmul.mubr.msk.f32.gmra.mrb[10].mxu0 %vm313_vm0, %v25_v28  ;;  %v57_v28 = vld [vmem:[%s6938_s0 + $0x158] sm:$0xff] }
  0x21   :  { %4084 = vmatmul.mubr.msk.f32.gmra.mrb[10].mxu1 %vm313_vm0, %v169_v29  ;;  %3870 = vmatprep.mubr.msk.f32.mxu0 %vm313_vm0, %v26_v30  ;;  %v201_v29 = vld [vmem:[%s6938_s0 + $0x5d8] sm:$0xff]  ;;  %v58_v30 = vld [vmem:[%s6938_s0 + $0x160] sm:$0xff] }
  0x22   :  { %4086 = vmatprep.mubr.msk.f32.mxu1 %vm313_vm0, %v170_v31  ;;  %v202_v31 = vld [vmem:[%s6938_s0 + $0x5e0] sm:$0xff] }
  0x24   :  { %3871 = vmatmul.mubr.msk.f32.gmra.mrb[12].mxu0 %vm313_vm0, %v27_v32  ;;  %v59_v32 = vld [vmem:[%s6938_s0 + $0x168] sm:$0xff] }
  0x25   :  { %4087 = vmatmul.mubr.msk.f32.gmra.mrb[12].mxu1 %vm313_vm0, %v171_v33  ;;  %3873 = vmatprep.mubr.msk.f32.mxu0 %vm313_vm0, %v28_v34  ;;  %v203_v33 = vld [vmem:[%s6938_s0 + $0x5e8] sm:$0xff]  ;;  %v60_v34 = vld [vmem:[%s6938_s0 + $0x170] sm:$0xff] }
  0x26   :  { %4089 = vmatprep.mubr.msk.f32.mxu1 %vm313_vm0, %v172_v35  ;;  %v204_v35 = vld [vmem:[%s6938_s0 + $0x5f0] sm:$0xff] }
  0x28   :  { %3874 = vmatmul.mubr.msk.f32.gmra.mrb[14].mxu0 %vm313_vm0, %v29_v36  ;;  %v61_v36 = vld [vmem:[%s6938_s0 + $0x178] sm:$0xff] }
  0x29   :  { %4090 = vmatmul.mubr.msk.f32.gmra.mrb[14].mxu1 %vm313_vm0, %v173_v37  ;;  %3876 = vmatprep.mubr.msk.f32.mxu0 %vm313_vm0, %v30_v38  ;;  %v205_v37 = vld [vmem:[%s6938_s0 + $0x5f8] sm:$0xff]  ;;  %v62_v38 = vld [vmem:[%s6938_s0 + $0x180] sm:$0xff] }
  0x2a   :  { %4092 = vmatprep.mubr.msk.f32.mxu1 %vm313_vm0, %v174_v39  ;;  %v206_v39 = vld [vmem:[%s6938_s0 + $0x600] sm:$0xff] }
  0x2c   :  { %3877 = vmatmul.mubr.msk.f32.gmra.mrb[16].mxu0 %vm313_vm0, %v31_v40  ;;  %v63_v40 = vld [vmem:[%s6938_s0 + $0x188] sm:$0xff] }
  0x2d   :  { %4093 = vmatmul.mubr.msk.f32.gmra.mrb[16].mxu1 %vm313_vm0, %v175_v41  ;;  %3879 = vmatprep.mubr.msk.f32.mxu0 %vm313_vm0, %v32_v42  ;;  %v207_v41 = vld [vmem:[%s6938_s0 + $0x608] sm:$0xff]  ;;  %v64_v42 = vld [vmem:[%s6938_s0 + $0x190] sm:$0xff] }
  0x2e   :  { %4095 = vmatprep.mubr.msk.f32.mxu1 %vm313_vm0, %v176_v43  ;;  %v208_v43 = vld [vmem:[%s6938_s0 + $0x610] sm:$0xff] }
  0x30   :  { %3880 = vmatmul.mubr.msk.f32.gmra.mrb[18].mxu0 %vm313_vm0, %v33_v44  ;;  %v65_v44 = vld [vmem:[%s6938_s0 + $0x198] sm:$0xff] }
  0x31   :  { %4096 = vmatmul.mubr.msk.f32.gmra.mrb[18].mxu1 %vm313_vm0, %v177_v45  ;;  %3882 = vmatprep.mubr.msk.f32.mxu0 %vm313_vm0, %v34_v46  ;;  %v209_v45 = vld [vmem:[%s6938_s0 + $0x618] sm:$0xff]  ;;  %v66_v46 = vld [vmem:[%s6938_s0 + $0x1a0] sm:$0xff] }
  0x32   :  { %4098 = vmatprep.mubr.msk.f32.mxu1 %vm313_vm0, %v178_v47  ;;  %v210_v47 = vld [vmem:[%s6938_s0 + $0x620] sm:$0xff] }
  0x34   :  { %3883 = vmatmul.mubr.msk.f32.gmra.mrb[20].mxu0 %vm313_vm0, %v35_v48  ;;  %v67_v48 = vld [vmem:[%s6938_s0 + $0x1a8] sm:$0xff] }
  0x35   :  { %4099 = vmatmul.mubr.msk.f32.gmra.mrb[20].mxu1 %vm313_vm0, %v179_v49  ;;  %3885 = vmatprep.mubr.msk.f32.mxu0 %vm313_vm0, %v36_v50  ;;  %v211_v49 = vld [vmem:[%s6938_s0 + $0x628] sm:$0xff]  ;;  %v68_v50 = vld [vmem:[%s6938_s0 + $0x1b0] sm:$0xff] }
  0x36   :  { %4101 = vmatprep.mubr.msk.f32.mxu1 %vm313_vm0, %v180_v51  ;;  %v212_v51 = vld [vmem:[%s6938_s0 + $0x630] sm:$0xff] }
  0x38   :  { %3886 = vmatmul.mubr.msk.f32.gmra.mrb[22].mxu0 %vm313_vm0, %v37_v52  ;;  %v69_v52 = vld [vmem:[%s6938_s0 + $0x1b8] sm:$0xff] }
  0x39   :  { %4102 = vmatmul.mubr.msk.f32.gmra.mrb[22].mxu1 %vm313_vm0, %v181_v53  ;;  %3888 = vmatprep.mubr.msk.f32.mxu0 %vm313_vm0, %v38_v54  ;;  %v213_v53 = vld [vmem:[%s6938_s0 + $0x638] sm:$0xff]  ;;  %v70_v54 = vld [vmem:[%s6938_s0 + $0x1c0] sm:$0xff] }
  0x3a   :  { %4104 = vmatprep.mubr.msk.f32.mxu1 %vm313_vm0, %v182_v55  ;;  %v214_v55 = vld [vmem:[%s6938_s0 + $0x640] sm:$0xff] }
  0x3c   :  { %3889 = vmatmul.mubr.msk.f32.gmra.mrb[24].mxu0 %vm313_vm0, %v39_v56  ;;  %v71_v56 = vld [vmem:[%s6938_s0 + $0x1c8] sm:$0xff] }
  0x3d   :  { %4105 = vmatmul.mubr.msk.f32.gmra.mrb[24].mxu1 %vm313_vm0, %v183_v57  ;;  %3891 = vmatprep.mubr.msk.f32.mxu0 %vm313_vm0, %v40_v58  ;;  %v215_v57 = vld [vmem:[%s6938_s0 + $0x648] sm:$0xff]  ;;  %v72_v58 = vld [vmem:[%s6938_s0 + $0x1d0] sm:$0xff] }
  0x3e   :  { %4107 = vmatprep.mubr.msk.f32.mxu1 %vm313_vm0, %v184_v59  ;;  %v216_v59 = vld [vmem:[%s6938_s0 + $0x650] sm:$0xff] }
  0x40   :  { %3892 = vmatmul.mubr.msk.f32.gmra.mrb[26].mxu0 %vm313_vm0, %v41_v60  ;;  %v73_v60 = vld [vmem:[%s6938_s0 + $0x1d8] sm:$0xff] }
  0x41   :  { %4108 = vmatmul.mubr.msk.f32.gmra.mrb[26].mxu1 %vm313_vm0, %v185_v61  ;;  %3894 = vmatprep.mubr.msk.f32.mxu0 %vm313_vm0, %v42_v62  ;;  %v217_v61 = vld [vmem:[%s6938_s0 + $0x658] sm:$0xff]  ;;  %v74_v62 = vld [vmem:[%s6938_s0 + $0x1e0] sm:$0xff] }
  0x42   :  { %4110 = vmatprep.mubr.msk.f32.mxu1 %vm313_vm0, %v186_v63  ;;  %v218_v63 = vld [vmem:[%s6938_s0 + $0x660] sm:$0xff] }
  0x44   :  { %3895 = vmatmul.mubr.msk.f32.gmra.mrb[28].mxu0 %vm313_vm0, %v43_v0  ;;  %v75_v0 = vld [vmem:[%s6938_s0 + $0x1e8] sm:$0xff] }
  0x45   :  { %4111 = vmatmul.mubr.msk.f32.gmra.mrb[28].mxu1 %vm313_vm0, %v187_v1  ;;  %3897 = vmatprep.mubr.msk.f32.mxu0 %vm313_vm0, %v44_v2  ;;  %v219_v1 = vld [vmem:[%s6938_s0 + $0x668] sm:$0xff]  ;;  %v76_v2 = vld [vmem:[%s6938_s0 + $0x1f0] sm:$0xff] }
  0x46   :  { %4113 = vmatprep.mubr.msk.f32.mxu1 %vm313_vm0, %v188_v3  ;;  %v220_v3 = vld [vmem:[%s6938_s0 + $0x670] sm:$0xff] }
  0x48   :  { %3898 = vmatmul.mubr.msk.f32.gmra.mrb[30].mxu0 %vm313_vm0, %v45_v4  ;;  %v77_v4 = vld [vmem:[%s6938_s0 + $0x1f8] sm:$0xff] }
  0x49   :  { %4114 = vmatmul.mubr.msk.f32.gmra.mrb[30].mxu1 %vm313_vm0, %v189_v5  ;;  %3900 = vmatprep.mubr.msk.f32.mxu0 %vm313_vm0, %v46_v6  ;;  %v221_v5 = vld [vmem:[%s6938_s0 + $0x678] sm:$0xff]  ;;  %v78_v6 = vld [vmem:[%s6938_s0 + $0x200] sm:$0xff] }
  0x4a   :  { %4116 = vmatprep.mubr.msk.f32.mxu1 %vm313_vm0, %v190_v7  ;;  %v222_v7 = vld [vmem:[%s6938_s0 + $0x680] sm:$0xff] }
  0x4c   :  { %3901 = vmatmul.mubr.msk.f32.gmra.mrb[32].mxu0 %vm313_vm0, %v47_v8  ;;  %v79_v8 = vld [vmem:[%s6938_s0 + $0x208] sm:$0xff] }
  0x4d   :  { %4117 = vmatmul.mubr.msk.f32.gmra.mrb[32].mxu1 %vm313_vm0, %v191_v9  ;;  %3903 = vmatprep.mubr.msk.f32.mxu0 %vm313_vm0, %v48_v10  ;;  %v223_v9 = vld [vmem:[%s6938_s0 + $0x688] sm:$0xff]  ;;  %v80_v10 = vld [vmem:[%s6938_s0 + $0x210] sm:$0xff] }
  0x4e   :  { %4119 = vmatprep.mubr.msk.f32.mxu1 %vm313_vm0, %v192_v11  ;;  %v224_v11 = vld [vmem:[%s6938_s0 + $0x690] sm:$0xff] }
  0x50   :  { %3904 = vmatmul.mubr.msk.f32.gmra.mrb[34].mxu0 %vm313_vm0, %v49_v12  ;;  %v81_v12 = vld [vmem:[%s6938_s0 + $0x218] sm:$0xff] }
  0x51   :  { %4120 = vmatmul.mubr.msk.f32.gmra.mrb[34].mxu1 %vm313_vm0, %v193_v13  ;;  %3906 = vmatprep.mubr.msk.f32.mxu0 %vm313_vm0, %v50_v14  ;;  %v225_v13 = vld [vmem:[%s6938_s0 + $0x698] sm:$0xff]  ;;  %v82_v14 = vld [vmem:[%s6938_s0 + $0x220] sm:$0xff] }
  0x52   :  { %4122 = vmatprep.mubr.msk.f32.mxu1 %vm313_vm0, %v194_v15  ;;  %v226_v15 = vld [vmem:[%s6938_s0 + $0x6a0] sm:$0xff] }
  0x54   :  { %3907 = vmatmul.mubr.msk.f32.gmra.mrb[36].mxu0 %vm313_vm0, %v51_v16  ;;  %v83_v16 = vld [vmem:[%s6938_s0 + $0x228] sm:$0xff] }
  0x55   :  { %4123 = vmatmul.mubr.msk.f32.gmra.mrb[36].mxu1 %vm313_vm0, %v195_v17  ;;  %3909 = vmatprep.mubr.msk.f32.mxu0 %vm313_vm0, %v52_v18  ;;  %v227_v17 = vld [vmem:[%s6938_s0 + $0x6a8] sm:$0xff]  ;;  %v84_v18 = vld [vmem:[%s6938_s0 + $0x230] sm:$0xff] }
  0x56   :  { %4125 = vmatprep.mubr.msk.f32.mxu1 %vm313_vm0, %v196_v19  ;;  %v228_v19 = vld [vmem:[%s6938_s0 + $0x6b0] sm:$0xff] }
  0x58   :  { %3910 = vmatmul.mubr.msk.f32.gmra.mrb[38].mxu0 %vm313_vm0, %v53_v20  ;;  %v85_v20 = vld [vmem:[%s6938_s0 + $0x238] sm:$0xff] }
  0x59   :  { %4126 = vmatmul.mubr.msk.f32.gmra.mrb[38].mxu1 %vm313_vm0, %v197_v21  ;;  %3912 = vmatprep.mubr.msk.f32.mxu0 %vm313_vm0, %v54_v22  ;;  %v229_v21 = vld [vmem:[%s6938_s0 + $0x6b8] sm:$0xff]  ;;  %v86_v22 = vld [vmem:[%s6938_s0 + $0x240] sm:$0xff] }
  0x5a   :  { %4128 = vmatprep.mubr.msk.f32.mxu1 %vm313_vm0, %v198_v23  ;;  %v230_v23 = vld [vmem:[%s6938_s0 + $0x6c0] sm:$0xff] }
  0x5c   :  { %3913 = vmatmul.mubr.msk.f32.gmra.mrb[40].mxu0 %vm313_vm0, %v55_v24  ;;  %v87_v24 = vld [vmem:[%s6938_s0 + $0x248] sm:$0xff] }
  0x5d   :  { %4129 = vmatmul.mubr.msk.f32.gmra.mrb[40].mxu1 %vm313_vm0, %v199_v25  ;;  %3915 = vmatprep.mubr.msk.f32.mxu0 %vm313_vm0, %v56_v26  ;;  %v231_v25 = vld [vmem:[%s6938_s0 + $0x6c8] sm:$0xff]  ;;  %v88_v26 = vld [vmem:[%s6938_s0 + $0x250] sm:$0xff] }
  0x5e   :  { %4131 = vmatprep.mubr.msk.f32.mxu1 %vm313_vm0, %v200_v27  ;;  %v232_v27 = vld [vmem:[%s6938_s0 + $0x6d0] sm:$0xff] }
  0x60   :  { %3916 = vmatmul.mubr.msk.f32.gmra.mrb[42].mxu0 %vm313_vm0, %v57_v28  ;;  %v89_v28 = vld [vmem:[%s6938_s0 + $0x258] sm:$0xff] }
  0x61   :  { %4132 = vmatmul.mubr.msk.f32.gmra.mrb[42].mxu1 %vm313_vm0, %v201_v29  ;;  %3918 = vmatprep.mubr.msk.f32.mxu0 %vm313_vm0, %v58_v30  ;;  %v233_v29 = vld [vmem:[%s6938_s0 + $0x6d8] sm:$0xff]  ;;  %v90_v30 = vld [vmem:[%s6938_s0 + $0x260] sm:$0xff] }
  0x62   :  { %4134 = vmatprep.mubr.msk.f32.mxu1 %vm313_vm0, %v202_v31  ;;  %v234_v31 = vld [vmem:[%s6938_s0 + $0x6e0] sm:$0xff] }
  0x64   :  { %3919 = vmatmul.mubr.msk.f32.gmra.mrb[44].mxu0 %vm313_vm0, %v59_v32  ;;  %v91_v32 = vld [vmem:[%s6938_s0 + $0x268] sm:$0xff] }
  0x65   :  { %4135 = vmatmul.mubr.msk.f32.gmra.mrb[44].mxu1 %vm313_vm0, %v203_v33  ;;  %3921 = vmatprep.mubr.msk.f32.mxu0 %vm313_vm0, %v60_v34  ;;  %v235_v33 = vld [vmem:[%s6938_s0 + $0x6e8] sm:$0xff]  ;;  %v92_v34 = vld [vmem:[%s6938_s0 + $0x270] sm:$0xff] }
  0x66   :  { %4137 = vmatprep.mubr.msk.f32.mxu1 %vm313_vm0, %v204_v35  ;;  %v236_v35 = vld [vmem:[%s6938_s0 + $0x6f0] sm:$0xff] }
  0x68   :  { %3922 = vmatmul.mubr.msk.f32.gmra.mrb[46].mxu0 %vm313_vm0, %v61_v36  ;;  %v93_v36 = vld [vmem:[%s6938_s0 + $0x278] sm:$0xff] }
  0x69   :  { %4138 = vmatmul.mubr.msk.f32.gmra.mrb[46].mxu1 %vm313_vm0, %v205_v37  ;;  %3924 = vmatprep.mubr.msk.f32.mxu0 %vm313_vm0, %v62_v38  ;;  %v237_v37 = vld [vmem:[%s6938_s0 + $0x6f8] sm:$0xff]  ;;  %v94_v38 = vld [vmem:[%s6938_s0 + $0x280] sm:$0xff] }
  0x6a   :  { %4140 = vmatprep.mubr.msk.f32.mxu1 %vm313_vm0, %v206_v39  ;;  %v238_v39 = vld [vmem:[%s6938_s0 + $0x700] sm:$0xff] }
  0x6c   :  { %3925 = vmatmul.mubr.msk.f32.gmra.mrb[48].mxu0 %vm313_vm0, %v63_v40  ;;  %v95_v40 = vld [vmem:[%s6938_s0 + $0x288] sm:$0xff] }
  0x6d   :  { %4141 = vmatmul.mubr.msk.f32.gmra.mrb[48].mxu1 %vm313_vm0, %v207_v41  ;;  %3927 = vmatprep.mubr.msk.f32.mxu0 %vm313_vm0, %v64_v42  ;;  %v239_v41 = vld [vmem:[%s6938_s0 + $0x708] sm:$0xff]  ;;  %v96_v42 = vld [vmem:[%s6938_s0 + $0x290] sm:$0xff] }
  0x6e   :  { %4143 = vmatprep.mubr.msk.f32.mxu1 %vm313_vm0, %v208_v43  ;;  %v240_v43 = vld [vmem:[%s6938_s0 + $0x710] sm:$0xff] }
  0x70   :  { %3928 = vmatmul.mubr.msk.f32.gmra.mrb[50].mxu0 %vm313_vm0, %v65_v44  ;;  %v97_v44 = vld [vmem:[%s6938_s0 + $0x298] sm:$0xff] }
  0x71   :  { %4144 = vmatmul.mubr.msk.f32.gmra.mrb[50].mxu1 %vm313_vm0, %v209_v45  ;;  %3930 = vmatprep.mubr.msk.f32.mxu0 %vm313_vm0, %v66_v46  ;;  %v241_v45 = vld [vmem:[%s6938_s0 + $0x718] sm:$0xff]  ;;  %v98_v46 = vld [vmem:[%s6938_s0 + $0x2a0] sm:$0xff] }
  0x72   :  { %4146 = vmatprep.mubr.msk.f32.mxu1 %vm313_vm0, %v210_v47  ;;  %v242_v47 = vld [vmem:[%s6938_s0 + $0x720] sm:$0xff] }
  0x74   :  { %3931 = vmatmul.mubr.msk.f32.gmra.mrb[52].mxu0 %vm313_vm0, %v67_v48  ;;  %v99_v48 = vld [vmem:[%s6938_s0 + $0x2a8] sm:$0xff] }
  0x75   :  { %4147 = vmatmul.mubr.msk.f32.gmra.mrb[52].mxu1 %vm313_vm0, %v211_v49  ;;  %3933 = vmatprep.mubr.msk.f32.mxu0 %vm313_vm0, %v68_v50  ;;  %v243_v49 = vld [vmem:[%s6938_s0 + $0x728] sm:$0xff]  ;;  %v100_v50 = vld [vmem:[%s6938_s0 + $0x2b0] sm:$0xff] }
  0x76   :  { %4149 = vmatprep.mubr.msk.f32.mxu1 %vm313_vm0, %v212_v51  ;;  %v244_v51 = vld [vmem:[%s6938_s0 + $0x730] sm:$0xff] }
  0x78   :  { %3934 = vmatmul.mubr.msk.f32.gmra.mrb[54].mxu0 %vm313_vm0, %v69_v52  ;;  %v101_v52 = vld [vmem:[%s6938_s0 + $0x2b8] sm:$0xff] }
  0x79   :  { %4150 = vmatmul.mubr.msk.f32.gmra.mrb[54].mxu1 %vm313_vm0, %v213_v53  ;;  %3936 = vmatprep.mubr.msk.f32.mxu0 %vm313_vm0, %v70_v54  ;;  %v245_v53 = vld [vmem:[%s6938_s0 + $0x738] sm:$0xff]  ;;  %v102_v54 = vld [vmem:[%s6938_s0 + $0x2c0] sm:$0xff] }
  0x7a   :  { %4152 = vmatprep.mubr.msk.f32.mxu1 %vm313_vm0, %v214_v55  ;;  %v246_v55 = vld [vmem:[%s6938_s0 + $0x740] sm:$0xff] }
  0x7c   :  { %3937 = vmatmul.mubr.msk.f32.gmra.mrb[56].mxu0 %vm313_vm0, %v71_v56  ;;  %v103_v56 = vld [vmem:[%s6938_s0 + $0x2c8] sm:$0xff] }
  0x7d   :  { %4153 = vmatmul.mubr.msk.f32.gmra.mrb[56].mxu1 %vm313_vm0, %v215_v57  ;;  %3939 = vmatprep.mubr.msk.f32.mxu0 %vm313_vm0, %v72_v58  ;;  %v247_v57 = vld [vmem:[%s6938_s0 + $0x748] sm:$0xff]  ;;  %v104_v58 = vld [vmem:[%s6938_s0 + $0x2d0] sm:$0xff] }
  0x7e   :  { %4155 = vmatprep.mubr.msk.f32.mxu1 %vm313_vm0, %v216_v59  ;;  %v248_v59 = vld [vmem:[%s6938_s0 + $0x750] sm:$0xff] }
  0x80   :  { %3940 = vmatmul.mubr.msk.f32.gmra.mrb[58].mxu0 %vm313_vm0, %v73_v60  ;;  %v105_v60 = vld [vmem:[%s6938_s0 + $0x2d8] sm:$0xff] }
  0x81   :  { %4156 = vmatmul.mubr.msk.f32.gmra.mrb[58].mxu1 %vm313_vm0, %v217_v61  ;;  %3942 = vmatprep.mubr.msk.f32.mxu0 %vm313_vm0, %v74_v62  ;;  %v249_v61 = vld [vmem:[%s6938_s0 + $0x758] sm:$0xff]  ;;  %v106_v62 = vld [vmem:[%s6938_s0 + $0x2e0] sm:$0xff] }
  0x82   :  { %4158 = vmatprep.mubr.msk.f32.mxu1 %vm313_vm0, %v218_v63  ;;  %v250_v63 = vld [vmem:[%s6938_s0 + $0x760] sm:$0xff] }
  0x84   :  { %3943 = vmatmul.mubr.msk.f32.gmra.mrb[60].mxu0 %vm313_vm0, %v75_v0  ;;  %v107_v0 = vld [vmem:[%s6938_s0 + $0x2e8] sm:$0xff] }
  0x85   :  { %4159 = vmatmul.mubr.msk.f32.gmra.mrb[60].mxu1 %vm313_vm0, %v219_v1  ;;  %3945 = vmatprep.mubr.msk.f32.mxu0 %vm313_vm0, %v76_v2  ;;  %v251_v1 = vld [vmem:[%s6938_s0 + $0x768] sm:$0xff]  ;;  %v108_v2 = vld [vmem:[%s6938_s0 + $0x2f0] sm:$0xff] }
  0x86   :  { %4161 = vmatprep.mubr.msk.f32.mxu1 %vm313_vm0, %v220_v3  ;;  %v252_v3 = vld [vmem:[%s6938_s0 + $0x770] sm:$0xff] }
  0x88   :  { %3946 = vmatmul.mubr.msk.f32.gmra.mrb[62].mxu0 %vm313_vm0, %v77_v4  ;;  %v109_v4 = vld [vmem:[%s6938_s0 + $0x2f8] sm:$0xff] }
  0x89   :  { %4162 = vmatmul.mubr.msk.f32.gmra.mrb[62].mxu1 %vm313_vm0, %v221_v5  ;;  %3948 = vmatprep.mubr.msk.f32.mxu0 %vm313_vm0, %v78_v6  ;;  %v253_v5 = vld [vmem:[%s6938_s0 + $0x778] sm:$0xff]  ;;  %v110_v6 = vld [vmem:[%s6938_s0 + $0x300] sm:$0xff] }
  0x8a   :  { %4164 = vmatprep.mubr.msk.f32.mxu1 %vm313_vm0, %v222_v7  ;;  %v254_v7 = vld [vmem:[%s6938_s0 + $0x780] sm:$0xff] }
  0x8c   :  { %3949 = vmatmul.mubr.msk.f32.gmra.mrb[64].mxu0 %vm313_vm0, %v79_v8  ;;  %v111_v8 = vld [vmem:[%s6938_s0 + $0x308] sm:$0xff] }
  0x8d   :  { %4165 = vmatmul.mubr.msk.f32.gmra.mrb[64].mxu1 %vm313_vm0, %v223_v9  ;;  %3951 = vmatprep.mubr.msk.f32.mxu0 %vm313_vm0, %v80_v10  ;;  %v255_v9 = vld [vmem:[%s6938_s0 + $0x788] sm:$0xff]  ;;  %v112_v10 = vld [vmem:[%s6938_s0 + $0x310] sm:$0xff] }
  0x8e   :  { %4167 = vmatprep.mubr.msk.f32.mxu1 %vm313_vm0, %v224_v11  ;;  %v256_v11 = vld [vmem:[%s6938_s0 + $0x790] sm:$0xff] }
  0x90   :  { %3952 = vmatmul.mubr.msk.f32.gmra.mrb[66].mxu0 %vm313_vm0, %v81_v12  ;;  %v113_v12 = vld [vmem:[%s6938_s0 + $0x318] sm:$0xff] }
  0x91   :  { %4168 = vmatmul.mubr.msk.f32.gmra.mrb[66].mxu1 %vm313_vm0, %v225_v13  ;;  %3954 = vmatprep.mubr.msk.f32.mxu0 %vm313_vm0, %v82_v14  ;;  %v257_v13 = vld [vmem:[%s6938_s0 + $0x798] sm:$0xff]  ;;  %v114_v14 = vld [vmem:[%s6938_s0 + $0x320] sm:$0xff] }
  0x92   :  { %4170 = vmatprep.mubr.msk.f32.mxu1 %vm313_vm0, %v226_v15  ;;  %v258_v15 = vld [vmem:[%s6938_s0 + $0x7a0] sm:$0xff] }
  0x94   :  { %3955 = vmatmul.mubr.msk.f32.gmra.mrb[68].mxu0 %vm313_vm0, %v83_v16  ;;  %v115_v16 = vld [vmem:[%s6938_s0 + $0x328] sm:$0xff] }
  0x95   :  { %4171 = vmatmul.mubr.msk.f32.gmra.mrb[68].mxu1 %vm313_vm0, %v227_v17  ;;  %3957 = vmatprep.mubr.msk.f32.mxu0 %vm313_vm0, %v84_v18  ;;  %v259_v17 = vld [vmem:[%s6938_s0 + $0x7a8] sm:$0xff]  ;;  %v116_v18 = vld [vmem:[%s6938_s0 + $0x330] sm:$0xff] }
  0x96   :  { %4173 = vmatprep.mubr.msk.f32.mxu1 %vm313_vm0, %v228_v19  ;;  %v260_v19 = vld [vmem:[%s6938_s0 + $0x7b0] sm:$0xff] }
  0x98   :  { %3958 = vmatmul.mubr.msk.f32.gmra.mrb[70].mxu0 %vm313_vm0, %v85_v20  ;;  %v117_v20 = vld [vmem:[%s6938_s0 + $0x338] sm:$0xff] }
  0x99   :  { %4174 = vmatmul.mubr.msk.f32.gmra.mrb[70].mxu1 %vm313_vm0, %v229_v21  ;;  %3960 = vmatprep.mubr.msk.f32.mxu0 %vm313_vm0, %v86_v22  ;;  %v261_v21 = vld [vmem:[%s6938_s0 + $0x7b8] sm:$0xff]  ;;  %v118_v22 = vld [vmem:[%s6938_s0 + $0x340] sm:$0xff] }
  0x9a   :  { %4176 = vmatprep.mubr.msk.f32.mxu1 %vm313_vm0, %v230_v23  ;;  %v262_v23 = vld [vmem:[%s6938_s0 + $0x7c0] sm:$0xff] }
  0x9c   :  { %3961 = vmatmul.mubr.msk.f32.gmra.mrb[72].mxu0 %vm313_vm0, %v87_v24  ;;  %v119_v24 = vld [vmem:[%s6938_s0 + $0x348] sm:$0xff] }
  0x9d   :  { %4177 = vmatmul.mubr.msk.f32.gmra.mrb[72].mxu1 %vm313_vm0, %v231_v25  ;;  %3963 = vmatprep.mubr.msk.f32.mxu0 %vm313_vm0, %v88_v26  ;;  %v263_v25 = vld [vmem:[%s6938_s0 + $0x7c8] sm:$0xff]  ;;  %v120_v26 = vld [vmem:[%s6938_s0 + $0x350] sm:$0xff] }
  0x9e   :  { %4179 = vmatprep.mubr.msk.f32.mxu1 %vm313_vm0, %v232_v27  ;;  %v264_v27 = vld [vmem:[%s6938_s0 + $0x7d0] sm:$0xff] }
  0xa0   :  { %3964 = vmatmul.mubr.msk.f32.gmra.mrb[74].mxu0 %vm313_vm0, %v89_v28  ;;  %v5187_v28 = vld [vmem:[%s6939_s2] ss:$0 sm:$0xff] }
  0xa1   :  { %4180 = vmatmul.mubr.msk.f32.gmra.mrb[74].mxu1 %vm313_vm0, %v233_v29  ;;  %3966 = vmatprep.mubr.msk.f32.mxu0 %vm313_vm0, %v90_v30  ;;  %v121_v29 = vld [vmem:[%s6938_s0 + $0x358] sm:$0xff] }
  0xa2   :  { %4182 = vmatprep.mubr.msk.f32.mxu1 %vm313_vm0, %v234_v31  ;;  %v265_v30 = vld [vmem:[%s6938_s0 + $0x7d8] sm:$0xff]  ;;  %v122_v31 = vld [vmem:[%s6938_s0 + $0x360] sm:$0xff] }
  0xa4   :  { %3967 = vmatmul.mubr.msk.f32.gmra.mrb[76].mxu0 %vm313_vm0, %v91_v32  ;;  %v266_v32 = vld [vmem:[%s6938_s0 + $0x7e0] sm:$0xff] }
  0xa5   :  { %4183 = vmatmul.mubr.msk.f32.gmra.mrb[76].mxu1 %vm313_vm0, %v235_v33  ;;  %3969 = vmatprep.mubr.msk.f32.mxu0 %vm313_vm0, %v92_v34 }
  0xa6   :  { %4185 = vmatprep.mubr.msk.f32.mxu1 %vm313_vm0, %v236_v35 }
  0xa8   :  { %3970 = vmatmul.mubr.msk.f32.gmra.mrb[78].mxu0 %vm313_vm0, %v93_v36 }
  0xa9   :  { %4186 = vmatmul.mubr.msk.f32.gmra.mrb[78].mxu1 %vm313_vm0, %v237_v37  ;;  %3972 = vmatprep.mubr.msk.f32.mxu0 %vm313_vm0, %v94_v38 }
  0xaa   :  { %4188 = vmatprep.mubr.msk.f32.mxu1 %vm313_vm0, %v238_v39 }
  0xac   :  { %3973 = vmatmul.mubr.msk.f32.gmra.mrb[80].mxu0 %vm313_vm0, %v95_v40 }
  0xad   :  { %4189 = vmatmul.mubr.msk.f32.gmra.mrb[80].mxu1 %vm313_vm0, %v239_v41  ;;  %3975 = vmatprep.mubr.msk.f32.mxu0 %vm313_vm0, %v96_v42  ;;  %v123_v41 = vld [vmem:[%s6938_s0 + $0x368] sm:$0xff] }
  0xae   :  { %4191 = vmatprep.mubr.msk.f32.mxu1 %vm313_vm0, %v240_v43  ;;  %v267_v42 = vld [vmem:[%s6938_s0 + $0x7e8] sm:$0xff] }
  0xb0   :  { %3976 = vmatmul.mubr.msk.f32.gmra.mrb[82].mxu0 %vm313_vm0, %v97_v44 }
  0xb1   :  { %4192 = vmatmul.mubr.msk.f32.gmra.mrb[82].mxu1 %vm313_vm0, %v241_v45  ;;  %3978 = vmatprep.mubr.msk.f32.mxu0 %vm313_vm0, %v98_v46  ;;  %v124_v45 = vld [vmem:[%s6938_s0 + $0x370] sm:$0xff] }
  0xb2   :  { %4194 = vmatprep.mubr.msk.f32.mxu1 %vm313_vm0, %v242_v47  ;;  %v268_v46 = vld [vmem:[%s6938_s0 + $0x7f0] sm:$0xff] }
  0xb4   :  { %3979 = vmatmul.mubr.msk.f32.gmra.mrb[84].mxu0 %vm313_vm0, %v99_v48 }
  0xb5   :  { %4195 = vmatmul.mubr.msk.f32.gmra.mrb[84].mxu1 %vm313_vm0, %v243_v49  ;;  %3981 = vmatprep.mubr.msk.f32.mxu0 %vm313_vm0, %v100_v50 }
  0xb6   :  { %4197 = vmatprep.mubr.msk.f32.mxu1 %vm313_vm0, %v244_v51 }
  0xb8   :  { %3982 = vmatmul.mubr.msk.f32.gmra.mrb[86].mxu0 %vm313_vm0, %v101_v52 }
  0xb9   :  { %4198 = vmatmul.mubr.msk.f32.gmra.mrb[86].mxu1 %vm313_vm0, %v245_v53  ;;  %3984 = vmatprep.mubr.msk.f32.mxu0 %vm313_vm0, %v102_v54 }
  0xba   :  { %4200 = vmatprep.mubr.msk.f32.mxu1 %vm313_vm0, %v246_v55 }
  0xbc   :  { %3985 = vmatmul.mubr.msk.f32.gmra.mrb[88].mxu0 %vm313_vm0, %v103_v56 }
  0xbd   :  { %4201 = vmatmul.mubr.msk.f32.gmra.mrb[88].mxu1 %vm313_vm0, %v247_v57  ;;  %3987 = vmatprep.mubr.msk.f32.mxu0 %vm313_vm0, %v104_v58  ;;  %v125_v57 = vld [vmem:[%s6938_s0 + $0x378] sm:$0xff] }
  0xbe   :  { %4203 = vmatprep.mubr.msk.f32.mxu1 %vm313_vm0, %v248_v59  ;;  %v269_v58 = vld [vmem:[%s6938_s0 + $0x7f8] sm:$0xff] }
  0xc0   :  { %3988 = vmatmul.mubr.msk.f32.gmra.mrb[90].mxu0 %vm313_vm0, %v105_v60 }
  0xc1   :  { %4204 = vmatmul.mubr.msk.f32.gmra.mrb[90].mxu1 %vm313_vm0, %v249_v61  ;;  %3990 = vmatprep.mubr.msk.f32.mxu0 %vm313_vm0, %v106_v62  ;;  %v126_v61 = vld [vmem:[%s6938_s0 + $0x380] sm:$0xff] }
  0xc2   :  { %4206 = vmatprep.mubr.msk.f32.mxu1 %vm313_vm0, %v250_v63  ;;  %v270_v62 = vld [vmem:[%s6938_s0 + $0x800] sm:$0xff] }
  0xc4   :  { %3991 = vmatmul.mubr.msk.f32.gmra.mrb[92].mxu0 %vm313_vm0, %v107_v0 }
  0xc5   :  { %4207 = vmatmul.mubr.msk.f32.gmra.mrb[92].mxu1 %vm313_vm0, %v251_v1  ;;  %3993 = vmatprep.mubr.msk.f32.mxu0 %vm313_vm0, %v108_v2 }
  0xc6   :  { %4209 = vmatprep.mubr.msk.f32.mxu1 %vm313_vm0, %v252_v3 }
  0xc8   :  { %3994 = vmatmul.mubr.msk.f32.gmra.mrb[94].mxu0 %vm313_vm0, %v109_v4 }
  0xc9   :  { %4210 = vmatmul.mubr.msk.f32.gmra.mrb[94].mxu1 %vm313_vm0, %v253_v5  ;;  %3996 = vmatprep.mubr.msk.f32.mxu0 %vm313_vm0, %v110_v6 }
  0xca   :  { %4212 = vmatprep.mubr.msk.f32.mxu1 %vm313_vm0, %v254_v7 }
  0xcc   :  { %3997 = vmatmul.mubr.msk.f32.gmra.mrb[96].mxu0 %vm313_vm0, %v111_v8 }
  0xcd   :  { %4213 = vmatmul.mubr.msk.f32.gmra.mrb[96].mxu1 %vm313_vm0, %v255_v9  ;;  %3999 = vmatprep.mubr.msk.f32.mxu0 %vm313_vm0, %v112_v10  ;;  %v127_v9 = vld [vmem:[%s6938_s0 + $0x388] sm:$0xff] }
  0xce   :  { %4215 = vmatprep.mubr.msk.f32.mxu1 %vm313_vm0, %v256_v11  ;;  %v271_v10 = vld [vmem:[%s6938_s0 + $0x808] sm:$0xff] }
  0xd0   :  { %4000 = vmatmul.mubr.msk.f32.gmra.mrb[98].mxu0 %vm313_vm0, %v113_v12 }
  0xd1   :  { %4216 = vmatmul.mubr.msk.f32.gmra.mrb[98].mxu1 %vm313_vm0, %v257_v13  ;;  %4002 = vmatprep.mubr.msk.f32.mxu0 %vm313_vm0, %v114_v14  ;;  %v128_v13 = vld [vmem:[%s6938_s0 + $0x390] sm:$0xff] }
  0xd2   :  { %4218 = vmatprep.mubr.msk.f32.mxu1 %vm313_vm0, %v258_v15  ;;  %v272_v14 = vld [vmem:[%s6938_s0 + $0x810] sm:$0xff] }
  0xd4   :  { %4003 = vmatmul.mubr.msk.f32.gmra.mrb[100].mxu0 %vm313_vm0, %v115_v16 }
  0xd5   :  { %4219 = vmatmul.mubr.msk.f32.gmra.mrb[100].mxu1 %vm313_vm0, %v259_v17  ;;  %4005 = vmatprep.mubr.msk.f32.mxu0 %vm313_vm0, %v116_v18 }
  0xd6   :  { %4221 = vmatprep.mubr.msk.f32.mxu1 %vm313_vm0, %v260_v19 }
  0xd8   :  { %4006 = vmatmul.mubr.msk.f32.gmra.mrb[102].mxu0 %vm313_vm0, %v117_v20 }
  0xd9   :  { %4222 = vmatmul.mubr.msk.f32.gmra.mrb[102].mxu1 %vm313_vm0, %v261_v21  ;;  %4008 = vmatprep.mubr.msk.f32.mxu0 %vm313_vm0, %v118_v22 }
  0xda   :  { %4224 = vmatprep.mubr.msk.f32.mxu1 %vm313_vm0, %v262_v23 }
  0xdc   :  { %4009 = vmatmul.mubr.msk.f32.gmra.mrb[104].mxu0 %vm313_vm0, %v119_v24 }
  0xdd   :  { %4225 = vmatmul.mubr.msk.f32.gmra.mrb[104].mxu1 %vm313_vm0, %v263_v25  ;;  %4011 = vmatprep.mubr.msk.f32.mxu0 %vm313_vm0, %v120_v26  ;;  %v129_v25 = vld [vmem:[%s6938_s0 + $0x398] sm:$0xff] }
  0xde   :  { %4227 = vmatprep.mubr.msk.f32.mxu1 %vm313_vm0, %v264_v27  ;;  %v273_v26 = vld [vmem:[%s6938_s0 + $0x818] sm:$0xff] }
  0xdf   :  { %v3854_v33 = vpop.f32.mrb[0].mxu0 }
  0xe0   :  { %v4070_v34 = vpop.f32.mrb[0].mxu1  ;;  %v1250_v35 = vadd.f32 %v3854_v33, %v5187_v28  ;;  %v1244_v37 = vpop.f32.mrb[1].mxu0  ;;  %4012 = vmatmul.mubr.msk.f32.gmra.mrb[106].mxu0 %vm313_vm0, %v121_v29 }
  0xe1   :  { %v1970_v36 = vadd.f32 %v4070_v34, %v5187_v28  ;;  %v1964_v38 = vpop.f32.mrb[1].mxu1  ;;  %4228 = vmatmul.mubr.msk.f32.gmra.mrb[106].mxu1 %vm313_vm0, %v265_v30  ;;  %v1245_v39 = vadd.f32 %v5187_v28, %v1244_v37  ;;  %4014 = vmatprep.mubr.msk.f32.mxu0 %vm313_vm0, %v122_v31  ;;  %v130_v30 = vld [vmem:[%s6938_s0 + $0x3a0] sm:$0xff] }
  0xe2   :  { %v1965_v40 = vadd.f32 %v5187_v28, %v1964_v38  ;;  %4230 = vmatprep.mubr.msk.f32.mxu1 %vm313_vm0, %v266_v32  ;;  %v2684_v43 = vmax.f32 %v1250_v35, 0.0  ;;  %v274_v31 = vld [vmem:[%s6938_s0 + $0x820] sm:$0xff] }
  0xe3   :  { %v2828_v44 = vmax.f32 %v1970_v36, 0.0  ;;  %v2683_v47 = vmax.f32 %v1245_v39, 0.0  ;;  %v3857_v49 = vpop.f32.mrb[2].mxu0 }
  0xe4   :  { %v2827_v48 = vmax.f32 %v1965_v40, 0.0  ;;  %v4073_v50 = vpop.f32.mrb[2].mxu1  ;;  %2972 = vst.msk [vmem:[%s6940_s3 + $0x8] sm:$0xff] %vm313_vm0, %v2684_v43  ;;  %v1260_v51 = vadd.f32 %v3857_v49, %v5187_v28  ;;  %v1254_v53 = vpop.f32.mrb[3].mxu0  ;;  %4015 = vmatmul.mubr.msk.f32.gmra.mrb[108].mxu0 %vm313_vm0, %v123_v41  ;;  %v275_v43 = vld [vmem:[%s6938_s0 + $0x828] sm:$0xff] }
  0xe5   :  { %3116 = vst.msk [vmem:[%s6940_s3 + $0x488] sm:$0xff] %vm313_vm0, %v2828_v44  ;;  %v1980_v52 = vadd.f32 %v4073_v50, %v5187_v28  ;;  %v1974_v54 = vpop.f32.mrb[3].mxu1  ;;  %4231 = vmatmul.mubr.msk.f32.gmra.mrb[108].mxu1 %vm313_vm0, %v267_v42  ;;  %2971 = vst.msk [vmem:[%s6940_s3] sm:$0xff] %vm313_vm0, %v2683_v47  ;;  %v1255_v55 = vadd.f32 %v5187_v28, %v1254_v53  ;;  %4017 = vmatprep.mubr.msk.f32.mxu0 %vm313_vm0, %v124_v45  ;;  %v131_v42 = vld [vmem:[%s6938_s0 + $0x3a8] sm:$0xff]  ;;  %v276_v47 = vld [vmem:[%s6938_s0 + $0x830] sm:$0xff] }
  0xe6   :  { %3115 = vst.msk [vmem:[%s6940_s3 + $0x480] sm:$0xff] %vm313_vm0, %v2827_v48  ;;  %v1975_v56 = vadd.f32 %v5187_v28, %v1974_v54  ;;  %4233 = vmatprep.mubr.msk.f32.mxu1 %vm313_vm0, %v268_v46  ;;  %v2686_v59 = vmax.f32 %v1260_v51, 0.0  ;;  %v132_v46 = vld [vmem:[%s6938_s0 + $0x3b0] sm:$0xff] }
  0xe7   :  { %v2830_v60 = vmax.f32 %v1980_v52, 0.0  ;;  %v2685_v63 = vmax.f32 %v1255_v55, 0.0  ;;  %v3860_v1 = vpop.f32.mrb[4].mxu0 }
  0xe8   :  { %v2829_v0 = vmax.f32 %v1975_v56, 0.0  ;;  %v4076_v2 = vpop.f32.mrb[4].mxu1  ;;  %2974 = vst.msk [vmem:[%s6940_s3 + $0x18] sm:$0xff] %vm313_vm0, %v2686_v59  ;;  %v1270_v3 = vadd.f32 %v3860_v1, %v5187_v28  ;;  %v1264_v5 = vpop.f32.mrb[5].mxu0  ;;  %4018 = vmatmul.mubr.msk.f32.gmra.mrb[110].mxu0 %vm313_vm0, %v125_v57  ;;  %v277_v59 = vld [vmem:[%s6938_s0 + $0x838] sm:$0xff] }
  0xe9   :  { %3118 = vst.msk [vmem:[%s6940_s3 + $0x498] sm:$0xff] %vm313_vm0, %v2830_v60  ;;  %v1990_v4 = vadd.f32 %v4076_v2, %v5187_v28  ;;  %v1984_v6 = vpop.f32.mrb[5].mxu1  ;;  %4234 = vmatmul.mubr.msk.f32.gmra.mrb[110].mxu1 %vm313_vm0, %v269_v58  ;;  %2973 = vst.msk [vmem:[%s6940_s3 + $0x10] sm:$0xff] %vm313_vm0, %v2685_v63  ;;  %v1265_v7 = vadd.f32 %v5187_v28, %v1264_v5  ;;  %4020 = vmatprep.mubr.msk.f32.mxu0 %vm313_vm0, %v126_v61  ;;  %v133_v58 = vld [vmem:[%s6938_s0 + $0x3b8] sm:$0xff]  ;;  %v278_v63 = vld [vmem:[%s6938_s0 + $0x840] sm:$0xff] }
  0xea   :  { %3117 = vst.msk [vmem:[%s6940_s3 + $0x490] sm:$0xff] %vm313_vm0, %v2829_v0  ;;  %v1985_v8 = vadd.f32 %v5187_v28, %v1984_v6  ;;  %4236 = vmatprep.mubr.msk.f32.mxu1 %vm313_vm0, %v270_v62  ;;  %v2688_v11 = vmax.f32 %v1270_v3, 0.0  ;;  %v134_v62 = vld [vmem:[%s6938_s0 + $0x3c0] sm:$0xff] }
  0xeb   :  { %v2832_v12 = vmax.f32 %v1990_v4, 0.0  ;;  %v2687_v15 = vmax.f32 %v1265_v7, 0.0  ;;  %v3863_v17 = vpop.f32.mrb[6].mxu0 }
  0xec   :  { %v2831_v16 = vmax.f32 %v1985_v8, 0.0  ;;  %v4079_v18 = vpop.f32.mrb[6].mxu1  ;;  %2976 = vst.msk [vmem:[%s6940_s3 + $0x28] sm:$0xff] %vm313_vm0, %v2688_v11  ;;  %v1280_v19 = vadd.f32 %v3863_v17, %v5187_v28  ;;  %v1274_v21 = vpop.f32.mrb[7].mxu0  ;;  %4021 = vmatmul.mubr.msk.f32.gmra.mrb[112].mxu0 %vm313_vm0, %v127_v9  ;;  %v279_v11 = vld [vmem:[%s6938_s0 + $0x848] sm:$0xff] }
  0xed   :  { %3120 = vst.msk [vmem:[%s6940_s3 + $0x4a8] sm:$0xff] %vm313_vm0, %v2832_v12  ;;  %v2000_v20 = vadd.f32 %v4079_v18, %v5187_v28  ;;  %v1994_v22 = vpop.f32.mrb[7].mxu1  ;;  %4237 = vmatmul.mubr.msk.f32.gmra.mrb[112].mxu1 %vm313_vm0, %v271_v10  ;;  %2975 = vst.msk [vmem:[%s6940_s3 + $0x20] sm:$0xff] %vm313_vm0, %v2687_v15  ;;  %v1275_v23 = vadd.f32 %v5187_v28, %v1274_v21  ;;  %4023 = vmatprep.mubr.msk.f32.mxu0 %vm313_vm0, %v128_v13  ;;  %v135_v10 = vld [vmem:[%s6938_s0 + $0x3c8] sm:$0xff]  ;;  %v280_v15 = vld [vmem:[%s6938_s0 + $0x850] sm:$0xff] }
  0xee   :  { %3119 = vst.msk [vmem:[%s6940_s3 + $0x4a0] sm:$0xff] %vm313_vm0, %v2831_v16  ;;  %v1995_v24 = vadd.f32 %v5187_v28, %v1994_v22  ;;  %4239 = vmatprep.mubr.msk.f32.mxu1 %vm313_vm0, %v272_v14  ;;  %v2690_v27 = vmax.f32 %v1280_v19, 0.0  ;;  %v136_v14 = vld [vmem:[%s6938_s0 + $0x3d0] sm:$0xff] }
  0xef   :  { %v2834_v29 = vmax.f32 %v2000_v20, 0.0  ;;  %v2689_v32 = vmax.f32 %v1275_v23, 0.0  ;;  %v3866_v34 = vpop.f32.mrb[8].mxu0 }
  0xf0   :  { %v2833_v33 = vmax.f32 %v1995_v24, 0.0  ;;  %v4082_v35 = vpop.f32.mrb[8].mxu1  ;;  %2978 = vst.msk [vmem:[%s6940_s3 + $0x38] sm:$0xff] %vm313_vm0, %v2690_v27  ;;  %v1290_v36 = vadd.f32 %v3866_v34, %v5187_v28  ;;  %v1284_v38 = vpop.f32.mrb[9].mxu0  ;;  %4024 = vmatmul.mubr.msk.f32.gmra.mrb[114].mxu0 %vm313_vm0, %v129_v25  ;;  %v281_v27 = vld [vmem:[%s6938_s0 + $0x858] sm:$0xff] }
  0xf1   :  { %3122 = vst.msk [vmem:[%s6940_s3 + $0x4b8] sm:$0xff] %vm313_vm0, %v2834_v29  ;;  %v2010_v37 = vadd.f32 %v4082_v35, %v5187_v28  ;;  %v2004_v39 = vpop.f32.mrb[9].mxu1  ;;  %4240 = vmatmul.mubr.msk.f32.gmra.mrb[114].mxu1 %vm313_vm0, %v273_v26  ;;  %2977 = vst.msk [vmem:[%s6940_s3 + $0x30] sm:$0xff] %vm313_vm0, %v2689_v32  ;;  %v1285_v40 = vadd.f32 %v5187_v28, %v1284_v38  ;;  %4026 = vmatprep.mubr.msk.f32.mxu0 %vm313_vm0, %v130_v30  ;;  %v137_v26 = vld [vmem:[%s6938_s0 + $0x3d8] sm:$0xff]  ;;  %v282_v32 = vld [vmem:[%s6938_s0 + $0x860] sm:$0xff] }
  0xf2   :  { %3121 = vst.msk [vmem:[%s6940_s3 + $0x4b0] sm:$0xff] %vm313_vm0, %v2833_v33  ;;  %v2005_v41 = vadd.f32 %v5187_v28, %v2004_v39  ;;  %4242 = vmatprep.mubr.msk.f32.mxu1 %vm313_vm0, %v274_v31  ;;  %v2692_v44 = vmax.f32 %v1290_v36, 0.0  ;;  %v138_v31 = vld [vmem:[%s6938_s0 + $0x3e0] sm:$0xff] }
  0xf3   :  { %v2836_v45 = vmax.f32 %v2010_v37, 0.0  ;;  %v2691_v48 = vmax.f32 %v1285_v40, 0.0  ;;  %v3869_v50 = vpop.f32.mrb[10].mxu0 }
  0xf4   :  { %v2835_v49 = vmax.f32 %v2005_v41, 0.0  ;;  %v4085_v51 = vpop.f32.mrb[10].mxu1  ;;  %2980 = vst.msk [vmem:[%s6940_s3 + $0x48] sm:$0xff] %vm313_vm0, %v2692_v44  ;;  %v1300_v52 = vadd.f32 %v3869_v50, %v5187_v28  ;;  %v1294_v54 = vpop.f32.mrb[11].mxu0  ;;  %4027 = vmatmul.mubr.msk.f32.gmra.mrb[116].mxu0 %vm313_vm0, %v131_v42  ;;  %v283_v44 = vld [vmem:[%s6938_s0 + $0x868] sm:$0xff] }
  0xf5   :  { %3124 = vst.msk [vmem:[%s6940_s3 + $0x4c8] sm:$0xff] %vm313_vm0, %v2836_v45  ;;  %v2020_v53 = vadd.f32 %v4085_v51, %v5187_v28  ;;  %v2014_v55 = vpop.f32.mrb[11].mxu1  ;;  %4243 = vmatmul.mubr.msk.f32.gmra.mrb[116].mxu1 %vm313_vm0, %v275_v43  ;;  %2979 = vst.msk [vmem:[%s6940_s3 + $0x40] sm:$0xff] %vm313_vm0, %v2691_v48  ;;  %v1295_v56 = vadd.f32 %v5187_v28, %v1294_v54  ;;  %4029 = vmatprep.mubr.msk.f32.mxu0 %vm313_vm0, %v132_v46  ;;  %v139_v43 = vld [vmem:[%s6938_s0 + $0x3e8] sm:$0xff]  ;;  %v284_v48 = vld [vmem:[%s6938_s0 + $0x870] sm:$0xff] }
  0xf6   :  { %3123 = vst.msk [vmem:[%s6940_s3 + $0x4c0] sm:$0xff] %vm313_vm0, %v2835_v49  ;;  %v2015_v57 = vadd.f32 %v5187_v28, %v2014_v55  ;;  %4245 = vmatprep.mubr.msk.f32.mxu1 %vm313_vm0, %v276_v47  ;;  %v2694_v60 = vmax.f32 %v1300_v52, 0.0  ;;  %v140_v47 = vld [vmem:[%s6938_s0 + $0x3f0] sm:$0xff] }
  0xf7   :  { %v2838_v61 = vmax.f32 %v2020_v53, 0.0  ;;  %v2693_v0 = vmax.f32 %v1295_v56, 0.0  ;;  %v3872_v2 = vpop.f32.mrb[12].mxu0 }
  0xf8   :  { %v2837_v1 = vmax.f32 %v2015_v57, 0.0  ;;  %v4088_v3 = vpop.f32.mrb[12].mxu1  ;;  %2982 = vst.msk [vmem:[%s6940_s3 + $0x58] sm:$0xff] %vm313_vm0, %v2694_v60  ;;  %v1310_v4 = vadd.f32 %v3872_v2, %v5187_v28  ;;  %v1304_v6 = vpop.f32.mrb[13].mxu0  ;;  %4030 = vmatmul.mubr.msk.f32.gmra.mrb[118].mxu0 %vm313_vm0, %v133_v58  ;;  %v285_v60 = vld [vmem:[%s6938_s0 + $0x878] sm:$0xff] }
  0xf9   :  { %3126 = vst.msk [vmem:[%s6940_s3 + $0x4d8] sm:$0xff] %vm313_vm0, %v2838_v61  ;;  %v2030_v5 = vadd.f32 %v4088_v3, %v5187_v28  ;;  %v2024_v7 = vpop.f32.mrb[13].mxu1  ;;  %4246 = vmatmul.mubr.msk.f32.gmra.mrb[118].mxu1 %vm313_vm0, %v277_v59  ;;  %2981 = vst.msk [vmem:[%s6940_s3 + $0x50] sm:$0xff] %vm313_vm0, %v2693_v0  ;;  %v1305_v8 = vadd.f32 %v5187_v28, %v1304_v6  ;;  %4032 = vmatprep.mubr.msk.f32.mxu0 %vm313_vm0, %v134_v62  ;;  %v141_v59 = vld [vmem:[%s6938_s0 + $0x3f8] sm:$0xff]  ;;  %v286_v0 = vld [vmem:[%s6938_s0 + $0x880] sm:$0xff] }
  0xfa   :  { %3125 = vst.msk [vmem:[%s6940_s3 + $0x4d0] sm:$0xff] %vm313_vm0, %v2837_v1  ;;  %v2025_v9 = vadd.f32 %v5187_v28, %v2024_v7  ;;  %4248 = vmatprep.mubr.msk.f32.mxu1 %vm313_vm0, %v278_v63  ;;  %v2696_v12 = vmax.f32 %v1310_v4, 0.0  ;;  %v142_v63 = vld [vmem:[%s6938_s0 + $0x400] sm:$0xff] }
  0xfb   :  { %v2840_v13 = vmax.f32 %v2030_v5, 0.0  ;;  %v2695_v16 = vmax.f32 %v1305_v8, 0.0  ;;  %v3875_v18 = vpop.f32.mrb[14].mxu0 }
  0xfc   :  { %v2839_v17 = vmax.f32 %v2025_v9, 0.0  ;;  %v4091_v19 = vpop.f32.mrb[14].mxu1  ;;  %2984 = vst.msk [vmem:[%s6940_s3 + $0x68] sm:$0xff] %vm313_vm0, %v2696_v12  ;;  %v1320_v20 = vadd.f32 %v3875_v18, %v5187_v28  ;;  %v1314_v22 = vpop.f32.mrb[15].mxu0  ;;  %4033 = vmatmul.mubr.msk.f32.gmra.mrb[120].mxu0 %vm313_vm0, %v135_v10  ;;  %v287_v12 = vld [vmem:[%s6938_s0 + $0x888] sm:$0xff] }
  0xfd   :  { %3128 = vst.msk [vmem:[%s6940_s3 + $0x4e8] sm:$0xff] %vm313_vm0, %v2840_v13  ;;  %v2040_v21 = vadd.f32 %v4091_v19, %v5187_v28  ;;  %v2034_v23 = vpop.f32.mrb[15].mxu1  ;;  %4249 = vmatmul.mubr.msk.f32.gmra.mrb[120].mxu1 %vm313_vm0, %v279_v11  ;;  %2983 = vst.msk [vmem:[%s6940_s3 + $0x60] sm:$0xff] %vm313_vm0, %v2695_v16  ;;  %v1315_v24 = vadd.f32 %v5187_v28, %v1314_v22  ;;  %4035 = vmatprep.mubr.msk.f32.mxu0 %vm313_vm0, %v136_v14  ;;  %v143_v11 = vld [vmem:[%s6938_s0 + $0x408] sm:$0xff]  ;;  %v288_v16 = vld [vmem:[%s6938_s0 + $0x890] sm:$0xff] }
  0xfe   :  { %3127 = vst.msk [vmem:[%s6940_s3 + $0x4e0] sm:$0xff] %vm313_vm0, %v2839_v17  ;;  %v2035_v25 = vadd.f32 %v5187_v28, %v2034_v23  ;;  %4251 = vmatprep.mubr.msk.f32.mxu1 %vm313_vm0, %v280_v15  ;;  %v2698_v29 = vmax.f32 %v1320_v20, 0.0  ;;  %v144_v15 = vld [vmem:[%s6938_s0 + $0x410] sm:$0xff] }
  0xff   :  { %v2842_v30 = vmax.f32 %v2040_v21, 0.0  ;;  %v2697_v33 = vmax.f32 %v1315_v24, 0.0  ;;  %v3878_v35 = vpop.f32.mrb[16].mxu0 }
 0x100   :  { %v2841_v34 = vmax.f32 %v2035_v25, 0.0  ;;  %v4094_v36 = vpop.f32.mrb[16].mxu1  ;;  %2986 = vst.msk [vmem:[%s6940_s3 + $0x78] sm:$0xff] %vm313_vm0, %v2698_v29  ;;  %v1330_v37 = vadd.f32 %v3878_v35, %v5187_v28  ;;  %v1324_v39 = vpop.f32.mrb[17].mxu0  ;;  %4036 = vmatmul.mubr.msk.f32.gmra.mrb[122].mxu0 %vm313_vm0, %v137_v26  ;;  %v289_v29 = vld [vmem:[%s6938_s0 + $0x898] sm:$0xff] }
 0x101   :  { %3130 = vst.msk [vmem:[%s6940_s3 + $0x4f8] sm:$0xff] %vm313_vm0, %v2842_v30  ;;  %v2050_v38 = vadd.f32 %v4094_v36, %v5187_v28  ;;  %v2044_v40 = vpop.f32.mrb[17].mxu1  ;;  %4252 = vmatmul.mubr.msk.f32.gmra.mrb[122].mxu1 %vm313_vm0, %v281_v27  ;;  %2985 = vst.msk [vmem:[%s6940_s3 + $0x70] sm:$0xff] %vm313_vm0, %v2697_v33  ;;  %v1325_v41 = vadd.f32 %v5187_v28, %v1324_v39  ;;  %4038 = vmatprep.mubr.msk.f32.mxu0 %vm313_vm0, %v138_v31  ;;  %v145_v27 = vld [vmem:[%s6938_s0 + $0x418] sm:$0xff]  ;;  %v290_v33 = vld [vmem:[%s6938_s0 + $0x8a0] sm:$0xff] }
 0x102   :  { %3129 = vst.msk [vmem:[%s6940_s3 + $0x4f0] sm:$0xff] %vm313_vm0, %v2841_v34  ;;  %v2045_v42 = vadd.f32 %v5187_v28, %v2044_v40  ;;  %4254 = vmatprep.mubr.msk.f32.mxu1 %vm313_vm0, %v282_v32  ;;  %v2700_v45 = vmax.f32 %v1330_v37, 0.0  ;;  %v146_v32 = vld [vmem:[%s6938_s0 + $0x420] sm:$0xff] }
 0x103   :  { %v2844_v46 = vmax.f32 %v2050_v38, 0.0  ;;  %v2699_v49 = vmax.f32 %v1325_v41, 0.0  ;;  %v3881_v51 = vpop.f32.mrb[18].mxu0 }
 0x104   :  { %v2843_v50 = vmax.f32 %v2045_v42, 0.0  ;;  %v4097_v52 = vpop.f32.mrb[18].mxu1  ;;  %2988 = vst.msk [vmem:[%s6940_s3 + $0x88] sm:$0xff] %vm313_vm0, %v2700_v45  ;;  %v1340_v53 = vadd.f32 %v3881_v51, %v5187_v28  ;;  %v1334_v55 = vpop.f32.mrb[19].mxu0  ;;  %4039 = vmatmul.mubr.msk.f32.gmra.mrb[124].mxu0 %vm313_vm0, %v139_v43  ;;  %v291_v45 = vld [vmem:[%s6938_s0 + $0x8a8] sm:$0xff] }
 0x105   :  { %3132 = vst.msk [vmem:[%s6940_s3 + $0x508] sm:$0xff] %vm313_vm0, %v2844_v46  ;;  %v2060_v54 = vadd.f32 %v4097_v52, %v5187_v28  ;;  %v2054_v56 = vpop.f32.mrb[19].mxu1  ;;  %4255 = vmatmul.mubr.msk.f32.gmra.mrb[124].mxu1 %vm313_vm0, %v283_v44  ;;  %2987 = vst.msk [vmem:[%s6940_s3 + $0x80] sm:$0xff] %vm313_vm0, %v2699_v49  ;;  %v1335_v57 = vadd.f32 %v5187_v28, %v1334_v55  ;;  %4041 = vmatprep.mubr.msk.f32.mxu0 %vm313_vm0, %v140_v47  ;;  %v147_v44 = vld [vmem:[%s6938_s0 + $0x428] sm:$0xff]  ;;  %v292_v49 = vld [vmem:[%s6938_s0 + $0x8b0] sm:$0xff] }
 0x106   :  { %3131 = vst.msk [vmem:[%s6940_s3 + $0x500] sm:$0xff] %vm313_vm0, %v2843_v50  ;;  %v2055_v58 = vadd.f32 %v5187_v28, %v2054_v56  ;;  %4257 = vmatprep.mubr.msk.f32.mxu1 %vm313_vm0, %v284_v48  ;;  %v2702_v61 = vmax.f32 %v1340_v53, 0.0  ;;  %v148_v48 = vld [vmem:[%s6938_s0 + $0x430] sm:$0xff] }
 0x107   :  { %v2846_v62 = vmax.f32 %v2060_v54, 0.0  ;;  %v2701_v1 = vmax.f32 %v1335_v57, 0.0  ;;  %v3884_v3 = vpop.f32.mrb[20].mxu0 }
 0x108   :  { %v2845_v2 = vmax.f32 %v2055_v58, 0.0  ;;  %v4100_v4 = vpop.f32.mrb[20].mxu1  ;;  %2990 = vst.msk [vmem:[%s6940_s3 + $0x98] sm:$0xff] %vm313_vm0, %v2702_v61  ;;  %v1350_v5 = vadd.f32 %v3884_v3, %v5187_v28  ;;  %v1344_v7 = vpop.f32.mrb[21].mxu0  ;;  %4042 = vmatmul.mubr.msk.f32.gmra.mrb[126].mxu0 %vm313_vm0, %v141_v59  ;;  %v293_v61 = vld [vmem:[%s6938_s0 + $0x8b8] sm:$0xff] }
 0x109   :  { %3134 = vst.msk [vmem:[%s6940_s3 + $0x518] sm:$0xff] %vm313_vm0, %v2846_v62  ;;  %v2070_v6 = vadd.f32 %v4100_v4, %v5187_v28  ;;  %v2064_v8 = vpop.f32.mrb[21].mxu1  ;;  %4258 = vmatmul.mubr.msk.f32.gmra.mrb[126].mxu1 %vm313_vm0, %v285_v60  ;;  %2989 = vst.msk [vmem:[%s6940_s3 + $0x90] sm:$0xff] %vm313_vm0, %v2701_v1  ;;  %v1345_v9 = vadd.f32 %v5187_v28, %v1344_v7  ;;  %4044 = vmatprep.mubr.msk.f32.mxu0 %vm313_vm0, %v142_v63  ;;  %v149_v60 = vld [vmem:[%s6938_s0 + $0x438] sm:$0xff]  ;;  %v294_v1 = vld [vmem:[%s6938_s0 + $0x8c0] sm:$0xff] }
 0x10a   :  { %3133 = vst.msk [vmem:[%s6940_s3 + $0x510] sm:$0xff] %vm313_vm0, %v2845_v2  ;;  %v2065_v10 = vadd.f32 %v5187_v28, %v2064_v8  ;;  %4260 = vmatprep.mubr.msk.f32.mxu1 %vm313_vm0, %v286_v0  ;;  %v2704_v13 = vmax.f32 %v1350_v5, 0.0  ;;  %v150_v0 = vld [vmem:[%s6938_s0 + $0x440] sm:$0xff] }
 0x10b   :  { %v2848_v14 = vmax.f32 %v2070_v6, 0.0  ;;  %v2703_v17 = vmax.f32 %v1345_v9, 0.0  ;;  %v3887_v19 = vpop.f32.mrb[22].mxu0 }
 0x10c   :  { %v2847_v18 = vmax.f32 %v2065_v10, 0.0  ;;  %v4103_v20 = vpop.f32.mrb[22].mxu1  ;;  %2992 = vst.msk [vmem:[%s6940_s3 + $0xa8] sm:$0xff] %vm313_vm0, %v2704_v13  ;;  %v1360_v21 = vadd.f32 %v3887_v19, %v5187_v28  ;;  %v1354_v23 = vpop.f32.mrb[23].mxu0  ;;  %4045 = vmatmul.mubr.msk.f32.gmra.mrb[128].mxu0 %vm313_vm0, %v143_v11  ;;  %v295_v13 = vld [vmem:[%s6938_s0 + $0x8c8] sm:$0xff] }
 0x10d   :  { %3136 = vst.msk [vmem:[%s6940_s3 + $0x528] sm:$0xff] %vm313_vm0, %v2848_v14  ;;  %v2080_v22 = vadd.f32 %v4103_v20, %v5187_v28  ;;  %v2074_v24 = vpop.f32.mrb[23].mxu1  ;;  %4261 = vmatmul.mubr.msk.f32.gmra.mrb[128].mxu1 %vm313_vm0, %v287_v12  ;;  %2991 = vst.msk [vmem:[%s6940_s3 + $0xa0] sm:$0xff] %vm313_vm0, %v2703_v17  ;;  %v1355_v25 = vadd.f32 %v5187_v28, %v1354_v23  ;;  %4047 = vmatprep.mubr.msk.f32.mxu0 %vm313_vm0, %v144_v15  ;;  %v151_v12 = vld [vmem:[%s6938_s0 + $0x448] sm:$0xff]  ;;  %v296_v17 = vld [vmem:[%s6938_s0 + $0x8d0] sm:$0xff] }
 0x10e   :  { %3135 = vst.msk [vmem:[%s6940_s3 + $0x520] sm:$0xff] %vm313_vm0, %v2847_v18  ;;  %v2075_v26 = vadd.f32 %v5187_v28, %v2074_v24  ;;  %4263 = vmatprep.mubr.msk.f32.mxu1 %vm313_vm0, %v288_v16  ;;  %v2706_v30 = vmax.f32 %v1360_v21, 0.0  ;;  %v152_v16 = vld [vmem:[%s6938_s0 + $0x450] sm:$0xff] }
 0x10f   :  { %v2850_v31 = vmax.f32 %v2080_v22, 0.0  ;;  %v2705_v34 = vmax.f32 %v1355_v25, 0.0  ;;  %v3890_v36 = vpop.f32.mrb[24].mxu0 }
 0x110   :  { %v2849_v35 = vmax.f32 %v2075_v26, 0.0  ;;  %v4106_v37 = vpop.f32.mrb[24].mxu1  ;;  %2994 = vst.msk [vmem:[%s6940_s3 + $0xb8] sm:$0xff] %vm313_vm0, %v2706_v30  ;;  %v1370_v38 = vadd.f32 %v3890_v36, %v5187_v28  ;;  %v1364_v40 = vpop.f32.mrb[25].mxu0  ;;  %4048 = vmatmul.mubr.msk.f32.gmra.mrb[130].mxu0 %vm313_vm0, %v145_v27  ;;  %v297_v30 = vld [vmem:[%s6938_s0 + $0x8d8] sm:$0xff] }
 0x111   :  { %3138 = vst.msk [vmem:[%s6940_s3 + $0x538] sm:$0xff] %vm313_vm0, %v2850_v31  ;;  %v2090_v39 = vadd.f32 %v4106_v37, %v5187_v28  ;;  %v2084_v41 = vpop.f32.mrb[25].mxu1  ;;  %4264 = vmatmul.mubr.msk.f32.gmra.mrb[130].mxu1 %vm313_vm0, %v289_v29  ;;  %2993 = vst.msk [vmem:[%s6940_s3 + $0xb0] sm:$0xff] %vm313_vm0, %v2705_v34  ;;  %v1365_v42 = vadd.f32 %v5187_v28, %v1364_v40  ;;  %4050 = vmatprep.mubr.msk.f32.mxu0 %vm313_vm0, %v146_v32  ;;  %v153_v29 = vld [vmem:[%s6938_s0 + $0x458] sm:$0xff]  ;;  %v298_v34 = vld [vmem:[%s6938_s0 + $0x8e0] sm:$0xff] }
 0x112   :  { %3137 = vst.msk [vmem:[%s6940_s3 + $0x530] sm:$0xff] %vm313_vm0, %v2849_v35  ;;  %v2085_v43 = vadd.f32 %v5187_v28, %v2084_v41  ;;  %4266 = vmatprep.mubr.msk.f32.mxu1 %vm313_vm0, %v290_v33  ;;  %v2708_v46 = vmax.f32 %v1370_v38, 0.0  ;;  %v154_v33 = vld [vmem:[%s6938_s0 + $0x460] sm:$0xff] }
 0x113   :  { %v2852_v47 = vmax.f32 %v2090_v39, 0.0  ;;  %v2707_v50 = vmax.f32 %v1365_v42, 0.0  ;;  %v3893_v52 = vpop.f32.mrb[26].mxu0 }
 0x114   :  { %v2851_v51 = vmax.f32 %v2085_v43, 0.0  ;;  %v4109_v53 = vpop.f32.mrb[26].mxu1  ;;  %2996 = vst.msk [vmem:[%s6940_s3 + $0xc8] sm:$0xff] %vm313_vm0, %v2708_v46  ;;  %v1380_v54 = vadd.f32 %v3893_v52, %v5187_v28  ;;  %v1374_v56 = vpop.f32.mrb[27].mxu0  ;;  %4051 = vmatmul.mubr.msk.f32.gmra.mrb[132].mxu0 %vm313_vm0, %v147_v44  ;;  %v299_v46 = vld [vmem:[%s6938_s0 + $0x8e8] sm:$0xff] }
 0x115   :  { %3140 = vst.msk [vmem:[%s6940_s3 + $0x548] sm:$0xff] %vm313_vm0, %v2852_v47  ;;  %v2100_v55 = vadd.f32 %v4109_v53, %v5187_v28  ;;  %v2094_v57 = vpop.f32.mrb[27].mxu1  ;;  %4267 = vmatmul.mubr.msk.f32.gmra.mrb[132].mxu1 %vm313_vm0, %v291_v45  ;;  %2995 = vst.msk [vmem:[%s6940_s3 + $0xc0] sm:$0xff] %vm313_vm0, %v2707_v50  ;;  %v1375_v58 = vadd.f32 %v5187_v28, %v1374_v56  ;;  %4053 = vmatprep.mubr.msk.f32.mxu0 %vm313_vm0, %v148_v48  ;;  %v155_v45 = vld [vmem:[%s6938_s0 + $0x468] sm:$0xff]  ;;  %v300_v50 = vld [vmem:[%s6938_s0 + $0x8f0] sm:$0xff] }
 0x116   :  { %3139 = vst.msk [vmem:[%s6940_s3 + $0x540] sm:$0xff] %vm313_vm0, %v2851_v51  ;;  %v2095_v59 = vadd.f32 %v5187_v28, %v2094_v57  ;;  %4269 = vmatprep.mubr.msk.f32.mxu1 %vm313_vm0, %v292_v49  ;;  %v2710_v62 = vmax.f32 %v1380_v54, 0.0  ;;  %v156_v49 = vld [vmem:[%s6938_s0 + $0x470] sm:$0xff] }
 0x117   :  { %v2854_v63 = vmax.f32 %v2100_v55, 0.0  ;;  %v2709_v2 = vmax.f32 %v1375_v58, 0.0  ;;  %v3896_v4 = vpop.f32.mrb[28].mxu0 }
 0x118   :  { %v2853_v3 = vmax.f32 %v2095_v59, 0.0  ;;  %v4112_v5 = vpop.f32.mrb[28].mxu1  ;;  %2998 = vst.msk [vmem:[%s6940_s3 + $0xd8] sm:$0xff] %vm313_vm0, %v2710_v62  ;;  %v1390_v6 = vadd.f32 %v3896_v4, %v5187_v28  ;;  %v1384_v8 = vpop.f32.mrb[29].mxu0  ;;  %4054 = vmatmul.mubr.msk.f32.gmra.mrb[134].mxu0 %vm313_vm0, %v149_v60  ;;  %v301_v62 = vld [vmem:[%s6938_s0 + $0x8f8] sm:$0xff] }
 0x119   :  { %3142 = vst.msk [vmem:[%s6940_s3 + $0x558] sm:$0xff] %vm313_vm0, %v2854_v63  ;;  %v2110_v7 = vadd.f32 %v4112_v5, %v5187_v28  ;;  %v2104_v9 = vpop.f32.mrb[29].mxu1  ;;  %4270 = vmatmul.mubr.msk.f32.gmra.mrb[134].mxu1 %vm313_vm0, %v293_v61  ;;  %2997 = vst.msk [vmem:[%s6940_s3 + $0xd0] sm:$0xff] %vm313_vm0, %v2709_v2  ;;  %v1385_v10 = vadd.f32 %v5187_v28, %v1384_v8  ;;  %4056 = vmatprep.mubr.msk.f32.mxu0 %vm313_vm0, %v150_v0  ;;  %v157_v61 = vld [vmem:[%s6938_s0 + $0x478] sm:$0xff] }
 0x11a   :  { %3141 = vst.msk [vmem:[%s6940_s3 + $0x550] sm:$0xff] %vm313_vm0, %v2853_v3  ;;  %v2105_v11 = vadd.f32 %v5187_v28, %v2104_v9  ;;  %4272 = vmatprep.mubr.msk.f32.mxu1 %vm313_vm0, %v294_v1  ;;  %v2712_v14 = vmax.f32 %v1390_v6, 0.0 }
 0x11b   :  { %v2856_v15 = vmax.f32 %v2110_v7, 0.0  ;;  %v2711_v18 = vmax.f32 %v1385_v10, 0.0  ;;  %v3899_v20 = vpop.f32.mrb[30].mxu0 }
 0x11c   :  { %v2855_v19 = vmax.f32 %v2105_v11, 0.0  ;;  %v4115_v21 = vpop.f32.mrb[30].mxu1  ;;  %3000 = vst.msk [vmem:[%s6940_s3 + $0xe8] sm:$0xff] %vm313_vm0, %v2712_v14  ;;  %v1400_v22 = vadd.f32 %v3899_v20, %v5187_v28  ;;  %v1394_v24 = vpop.f32.mrb[31].mxu0  ;;  %4057 = vmatmul.mubr.msk.f32.gmra.mrb[136].mxu0 %vm313_vm0, %v151_v12 }
 0x11d   :  { %3144 = vst.msk [vmem:[%s6940_s3 + $0x568] sm:$0xff] %vm313_vm0, %v2856_v15  ;;  %v2120_v23 = vadd.f32 %v4115_v21, %v5187_v28  ;;  %v2114_v25 = vpop.f32.mrb[31].mxu1  ;;  %4273 = vmatmul.mubr.msk.f32.gmra.mrb[136].mxu1 %vm313_vm0, %v295_v13  ;;  %2999 = vst.msk [vmem:[%s6940_s3 + $0xe0] sm:$0xff] %vm313_vm0, %v2711_v18  ;;  %v1395_v26 = vadd.f32 %v5187_v28, %v1394_v24  ;;  %4059 = vmatprep.mubr.msk.f32.mxu0 %vm313_vm0, %v152_v16 }
 0x11e   :  { %3143 = vst.msk [vmem:[%s6940_s3 + $0x560] sm:$0xff] %vm313_vm0, %v2855_v19  ;;  %v2115_v27 = vadd.f32 %v5187_v28, %v2114_v25  ;;  %4275 = vmatprep.mubr.msk.f32.mxu1 %vm313_vm0, %v296_v17  ;;  %v2714_v31 = vmax.f32 %v1400_v22, 0.0 }
 0x11f   :  { %v2858_v32 = vmax.f32 %v2120_v23, 0.0  ;;  %v2713_v35 = vmax.f32 %v1395_v26, 0.0  ;;  %v3902_v37 = vpop.f32.mrb[32].mxu0 }
 0x120   :  { %v2857_v36 = vmax.f32 %v2115_v27, 0.0  ;;  %v4118_v38 = vpop.f32.mrb[32].mxu1  ;;  %3002 = vst.msk [vmem:[%s6940_s3 + $0xf8] sm:$0xff] %vm313_vm0, %v2714_v31  ;;  %v1410_v39 = vadd.f32 %v3902_v37, %v5187_v28  ;;  %v1404_v41 = vpop.f32.mrb[33].mxu0  ;;  %4060 = vmatmul.mubr.msk.f32.gmra.mrb[138].mxu0 %vm313_vm0, %v153_v29 }
 0x121   :  { %3146 = vst.msk [vmem:[%s6940_s3 + $0x578] sm:$0xff] %vm313_vm0, %v2858_v32  ;;  %v2130_v40 = vadd.f32 %v4118_v38, %v5187_v28  ;;  %v2124_v42 = vpop.f32.mrb[33].mxu1  ;;  %4276 = vmatmul.mubr.msk.f32.gmra.mrb[138].mxu1 %vm313_vm0, %v297_v30  ;;  %3001 = vst.msk [vmem:[%s6940_s3 + $0xf0] sm:$0xff] %vm313_vm0, %v2713_v35  ;;  %v1405_v43 = vadd.f32 %v5187_v28, %v1404_v41  ;;  %4062 = vmatprep.mubr.msk.f32.mxu0 %vm313_vm0, %v154_v33 }
 0x122   :  { %3145 = vst.msk [vmem:[%s6940_s3 + $0x570] sm:$0xff] %vm313_vm0, %v2857_v36  ;;  %v2125_v44 = vadd.f32 %v5187_v28, %v2124_v42  ;;  %4278 = vmatprep.mubr.msk.f32.mxu1 %vm313_vm0, %v298_v34  ;;  %v2716_v47 = vmax.f32 %v1410_v39, 0.0 }
 0x123   :  { %v2860_v48 = vmax.f32 %v2130_v40, 0.0  ;;  %v2715_v51 = vmax.f32 %v1405_v43, 0.0  ;;  %v3905_v53 = vpop.f32.mrb[34].mxu0 }
 0x124   :  { %v2859_v52 = vmax.f32 %v2125_v44, 0.0  ;;  %v4121_v54 = vpop.f32.mrb[34].mxu1  ;;  %3004 = vst.msk [vmem:[%s6940_s3 + $0x108] sm:$0xff] %vm313_vm0, %v2716_v47  ;;  %v1420_v55 = vadd.f32 %v3905_v53, %v5187_v28  ;;  %v1414_v57 = vpop.f32.mrb[35].mxu0  ;;  %4063 = vmatmul.mubr.msk.f32.gmra.mrb[140].mxu0 %vm313_vm0, %v155_v45 }
 0x125   :  { %3148 = vst.msk [vmem:[%s6940_s3 + $0x588] sm:$0xff] %vm313_vm0, %v2860_v48  ;;  %v2140_v56 = vadd.f32 %v4121_v54, %v5187_v28  ;;  %v2134_v58 = vpop.f32.mrb[35].mxu1  ;;  %4279 = vmatmul.mubr.msk.f32.gmra.mrb[140].mxu1 %vm313_vm0, %v299_v46  ;;  %3003 = vst.msk [vmem:[%s6940_s3 + $0x100] sm:$0xff] %vm313_vm0, %v2715_v51  ;;  %v1415_v59 = vadd.f32 %v5187_v28, %v1414_v57  ;;  %4065 = vmatprep.mubr.msk.f32.mxu0 %vm313_vm0, %v156_v49 }
 0x126   :  { %3147 = vst.msk [vmem:[%s6940_s3 + $0x580] sm:$0xff] %vm313_vm0, %v2859_v52  ;;  %v2135_v60 = vadd.f32 %v5187_v28, %v2134_v58  ;;  %4281 = vmatprep.mubr.msk.f32.mxu1 %vm313_vm0, %v300_v50  ;;  %v2718_v63 = vmax.f32 %v1420_v55, 0.0 }
 0x127   :  { %v2862_v0 = vmax.f32 %v2140_v56, 0.0  ;;  %v2717_v1 = vmax.f32 %v1415_v59, 0.0  ;;  %v3908_v3 = vpop.f32.mrb[36].mxu0 }
 0x128   :  { %v2861_v2 = vmax.f32 %v2135_v60, 0.0  ;;  %v4124_v4 = vpop.f32.mrb[36].mxu1  ;;  %3006 = vst.msk [vmem:[%s6940_s3 + $0x118] sm:$0xff] %vm313_vm0, %v2718_v63  ;;  %v1430_v5 = vadd.f32 %v3908_v3, %v5187_v28  ;;  %v1424_v7 = vpop.f32.mrb[37].mxu0  ;;  %4066 = vmatmul.mubr.msk.f32.gmra.mrb[142].mxu0 %vm313_vm0, %v157_v61 }
 0x129   :  { %3150 = vst.msk [vmem:[%s6940_s3 + $0x598] sm:$0xff] %vm313_vm0, %v2862_v0  ;;  %v2150_v6 = vadd.f32 %v4124_v4, %v5187_v28  ;;  %v2144_v8 = vpop.f32.mrb[37].mxu1  ;;  %4282 = vmatmul.mubr.msk.f32.gmra.mrb[142].mxu1 %vm313_vm0, %v301_v62  ;;  %3005 = vst.msk [vmem:[%s6940_s3 + $0x110] sm:$0xff] %vm313_vm0, %v2717_v1  ;;  %v1425_v9 = vadd.f32 %v5187_v28, %v1424_v7 }
 0x12a   :  { %3149 = vst.msk [vmem:[%s6940_s3 + $0x590] sm:$0xff] %vm313_vm0, %v2861_v2  ;;  %v2145_v10 = vadd.f32 %v5187_v28, %v2144_v8  ;;  %v2720_v11 = vmax.f32 %v1430_v5, 0.0 }
 0x12b   :  { %v2864_v12 = vmax.f32 %v2150_v6, 0.0  ;;  %v2719_v13 = vmax.f32 %v1425_v9, 0.0  ;;  %v3911_v15 = vpop.f32.mrb[38].mxu0 }
 0x12c   :  { %v2863_v14 = vmax.f32 %v2145_v10, 0.0  ;;  %v4127_v16 = vpop.f32.mrb[38].mxu1  ;;  %3008 = vst.msk [vmem:[%s6940_s3 + $0x128] sm:$0xff] %vm313_vm0, %v2720_v11  ;;  %v1440_v17 = vadd.f32 %v3911_v15, %v5187_v28  ;;  %v1434_v19 = vpop.f32.mrb[39].mxu0 }
 0x12d   :  { %3152 = vst.msk [vmem:[%s6940_s3 + $0x5a8] sm:$0xff] %vm313_vm0, %v2864_v12  ;;  %v2160_v18 = vadd.f32 %v4127_v16, %v5187_v28  ;;  %v2154_v20 = vpop.f32.mrb[39].mxu1  ;;  %3007 = vst.msk [vmem:[%s6940_s3 + $0x120] sm:$0xff] %vm313_vm0, %v2719_v13  ;;  %v1435_v21 = vadd.f32 %v5187_v28, %v1434_v19 }
 0x12e   :  { %3151 = vst.msk [vmem:[%s6940_s3 + $0x5a0] sm:$0xff] %vm313_vm0, %v2863_v14  ;;  %v2155_v22 = vadd.f32 %v5187_v28, %v2154_v20  ;;  %v2722_v23 = vmax.f32 %v1440_v17, 0.0 }
 0x12f   :  { %v2866_v24 = vmax.f32 %v2160_v18, 0.0  ;;  %v2721_v25 = vmax.f32 %v1435_v21, 0.0  ;;  %v3914_v27 = vpop.f32.mrb[40].mxu0 }
 0x130   :  { %v2865_v26 = vmax.f32 %v2155_v22, 0.0  ;;  %v4130_v29 = vpop.f32.mrb[40].mxu1  ;;  %3010 = vst.msk [vmem:[%s6940_s3 + $0x138] sm:$0xff] %vm313_vm0, %v2722_v23  ;;  %v1450_v30 = vadd.f32 %v3914_v27, %v5187_v28  ;;  %v1444_v32 = vpop.f32.mrb[41].mxu0 }
 0x131   :  { %3154 = vst.msk [vmem:[%s6940_s3 + $0x5b8] sm:$0xff] %vm313_vm0, %v2866_v24  ;;  %v2170_v31 = vadd.f32 %v4130_v29, %v5187_v28  ;;  %v2164_v33 = vpop.f32.mrb[41].mxu1  ;;  %3009 = vst.msk [vmem:[%s6940_s3 + $0x130] sm:$0xff] %vm313_vm0, %v2721_v25  ;;  %v1445_v34 = vadd.f32 %v5187_v28, %v1444_v32 }
 0x132   :  { %3153 = vst.msk [vmem:[%s6940_s3 + $0x5b0] sm:$0xff] %vm313_vm0, %v2865_v26  ;;  %v2165_v35 = vadd.f32 %v5187_v28, %v2164_v33  ;;  %v2724_v36 = vmax.f32 %v1450_v30, 0.0 }
 0x133   :  { %v2868_v37 = vmax.f32 %v2170_v31, 0.0  ;;  %v2723_v38 = vmax.f32 %v1445_v34, 0.0  ;;  %v3917_v40 = vpop.f32.mrb[42].mxu0 }
 0x134   :  { %v2867_v39 = vmax.f32 %v2165_v35, 0.0  ;;  %v4133_v41 = vpop.f32.mrb[42].mxu1  ;;  %3012 = vst.msk [vmem:[%s6940_s3 + $0x148] sm:$0xff] %vm313_vm0, %v2724_v36  ;;  %v1460_v42 = vadd.f32 %v3917_v40, %v5187_v28  ;;  %v1454_v44 = vpop.f32.mrb[43].mxu0 }
 0x135   :  { %3156 = vst.msk [vmem:[%s6940_s3 + $0x5c8] sm:$0xff] %vm313_vm0, %v2868_v37  ;;  %v2180_v43 = vadd.f32 %v4133_v41, %v5187_v28  ;;  %v2174_v45 = vpop.f32.mrb[43].mxu1  ;;  %3011 = vst.msk [vmem:[%s6940_s3 + $0x140] sm:$0xff] %vm313_vm0, %v2723_v38  ;;  %v1455_v46 = vadd.f32 %v5187_v28, %v1454_v44 }
 0x136   :  { %3155 = vst.msk [vmem:[%s6940_s3 + $0x5c0] sm:$0xff] %vm313_vm0, %v2867_v39  ;;  %v2175_v47 = vadd.f32 %v5187_v28, %v2174_v45  ;;  %v2726_v48 = vmax.f32 %v1460_v42, 0.0 }
 0x137   :  { %v2870_v49 = vmax.f32 %v2180_v43, 0.0  ;;  %v2725_v50 = vmax.f32 %v1455_v46, 0.0  ;;  %v3920_v52 = vpop.f32.mrb[44].mxu0 }
 0x138   :  { %v2869_v51 = vmax.f32 %v2175_v47, 0.0  ;;  %v4136_v53 = vpop.f32.mrb[44].mxu1  ;;  %3014 = vst.msk [vmem:[%s6940_s3 + $0x158] sm:$0xff] %vm313_vm0, %v2726_v48  ;;  %v1470_v54 = vadd.f32 %v3920_v52, %v5187_v28  ;;  %v1464_v56 = vpop.f32.mrb[45].mxu0 }
 0x139   :  { %3158 = vst.msk [vmem:[%s6940_s3 + $0x5d8] sm:$0xff] %vm313_vm0, %v2870_v49  ;;  %v2190_v55 = vadd.f32 %v4136_v53, %v5187_v28  ;;  %v2184_v57 = vpop.f32.mrb[45].mxu1  ;;  %3013 = vst.msk [vmem:[%s6940_s3 + $0x150] sm:$0xff] %vm313_vm0, %v2725_v50  ;;  %v1465_v58 = vadd.f32 %v5187_v28, %v1464_v56 }
 0x13a   :  { %3157 = vst.msk [vmem:[%s6940_s3 + $0x5d0] sm:$0xff] %vm313_vm0, %v2869_v51  ;;  %v2185_v59 = vadd.f32 %v5187_v28, %v2184_v57  ;;  %v2728_v60 = vmax.f32 %v1470_v54, 0.0  ;;  %v5942_v28 = vld [vmem:[%s6939_s2] ss:$0 sm:$0xff] }
 0x13b   :  { %v2872_v61 = vmax.f32 %v2190_v55, 0.0  ;;  %v2727_v62 = vmax.f32 %v1465_v58, 0.0  ;;  %v3923_v0 = vpop.f32.mrb[46].mxu0 }
 0x13c   :  { %v2871_v63 = vmax.f32 %v2185_v59, 0.0  ;;  %v4139_v1 = vpop.f32.mrb[46].mxu1  ;;  %3016 = vst.msk [vmem:[%s6940_s3 + $0x168] sm:$0xff] %vm313_vm0, %v2728_v60  ;;  %v1480_v2 = vadd.f32 %v5942_v28, %v3923_v0  ;;  %v1474_v4 = vpop.f32.mrb[47].mxu0 }
 0x13d   :  { %3160 = vst.msk [vmem:[%s6940_s3 + $0x5e8] sm:$0xff] %vm313_vm0, %v2872_v61  ;;  %v2200_v3 = vadd.f32 %v5942_v28, %v4139_v1  ;;  %v2194_v5 = vpop.f32.mrb[47].mxu1  ;;  %3015 = vst.msk [vmem:[%s6940_s3 + $0x160] sm:$0xff] %vm313_vm0, %v2727_v62  ;;  %v1475_v6 = vadd.f32 %v5942_v28, %v1474_v4 }
 0x13e   :  { %3159 = vst.msk [vmem:[%s6940_s3 + $0x5e0] sm:$0xff] %vm313_vm0, %v2871_v63  ;;  %v2195_v7 = vadd.f32 %v5942_v28, %v2194_v5  ;;  %v2730_v8 = vmax.f32 %v1480_v2, 0.0 }
 0x13f   :  { %v2874_v9 = vmax.f32 %v2200_v3, 0.0  ;;  %v2729_v10 = vmax.f32 %v1475_v6, 0.0  ;;  %v3926_v12 = vpop.f32.mrb[48].mxu0 }
 0x140   :  { %v2873_v11 = vmax.f32 %v2195_v7, 0.0  ;;  %v4142_v13 = vpop.f32.mrb[48].mxu1  ;;  %3018 = vst.msk [vmem:[%s6940_s3 + $0x178] sm:$0xff] %vm313_vm0, %v2730_v8  ;;  %v1490_v14 = vadd.f32 %v5942_v28, %v3926_v12  ;;  %v1484_v16 = vpop.f32.mrb[49].mxu0 }
 0x141   :  { %3162 = vst.msk [vmem:[%s6940_s3 + $0x5f8] sm:$0xff] %vm313_vm0, %v2874_v9  ;;  %v2210_v15 = vadd.f32 %v5942_v28, %v4142_v13  ;;  %v2204_v17 = vpop.f32.mrb[49].mxu1  ;;  %3017 = vst.msk [vmem:[%s6940_s3 + $0x170] sm:$0xff] %vm313_vm0, %v2729_v10  ;;  %v1485_v18 = vadd.f32 %v5942_v28, %v1484_v16 }
 0x142   :  { %3161 = vst.msk [vmem:[%s6940_s3 + $0x5f0] sm:$0xff] %vm313_vm0, %v2873_v11  ;;  %v2205_v19 = vadd.f32 %v5942_v28, %v2204_v17  ;;  %v2732_v20 = vmax.f32 %v1490_v14, 0.0 }
 0x143   :  { %v2876_v21 = vmax.f32 %v2210_v15, 0.0  ;;  %v2731_v22 = vmax.f32 %v1485_v18, 0.0  ;;  %v3929_v24 = vpop.f32.mrb[50].mxu0 }
 0x144   :  { %v2875_v23 = vmax.f32 %v2205_v19, 0.0  ;;  %v4145_v25 = vpop.f32.mrb[50].mxu1  ;;  %3020 = vst.msk [vmem:[%s6940_s3 + $0x188] sm:$0xff] %vm313_vm0, %v2732_v20  ;;  %v1500_v26 = vadd.f32 %v5942_v28, %v3929_v24  ;;  %v1494_v29 = vpop.f32.mrb[51].mxu0 }
 0x145   :  { %3164 = vst.msk [vmem:[%s6940_s3 + $0x608] sm:$0xff] %vm313_vm0, %v2876_v21  ;;  %v2220_v27 = vadd.f32 %v5942_v28, %v4145_v25  ;;  %v2214_v30 = vpop.f32.mrb[51].mxu1  ;;  %3019 = vst.msk [vmem:[%s6940_s3 + $0x180] sm:$0xff] %vm313_vm0, %v2731_v22  ;;  %v1495_v31 = vadd.f32 %v5942_v28, %v1494_v29 }
 0x146   :  { %3163 = vst.msk [vmem:[%s6940_s3 + $0x600] sm:$0xff] %vm313_vm0, %v2875_v23  ;;  %v2215_v32 = vadd.f32 %v5942_v28, %v2214_v30  ;;  %v2734_v33 = vmax.f32 %v1500_v26, 0.0 }
 0x147   :  { %v2878_v34 = vmax.f32 %v2220_v27, 0.0  ;;  %v2733_v35 = vmax.f32 %v1495_v31, 0.0  ;;  %v3932_v37 = vpop.f32.mrb[52].mxu0 }
 0x148   :  { %v2877_v36 = vmax.f32 %v2215_v32, 0.0  ;;  %v4148_v38 = vpop.f32.mrb[52].mxu1  ;;  %3022 = vst.msk [vmem:[%s6940_s3 + $0x198] sm:$0xff] %vm313_vm0, %v2734_v33  ;;  %v1510_v39 = vadd.f32 %v5942_v28, %v3932_v37  ;;  %v1504_v41 = vpop.f32.mrb[53].mxu0 }
 0x149   :  { %3166 = vst.msk [vmem:[%s6940_s3 + $0x618] sm:$0xff] %vm313_vm0, %v2878_v34  ;;  %v2230_v40 = vadd.f32 %v5942_v28, %v4148_v38  ;;  %v2224_v42 = vpop.f32.mrb[53].mxu1  ;;  %3021 = vst.msk [vmem:[%s6940_s3 + $0x190] sm:$0xff] %vm313_vm0, %v2733_v35  ;;  %v1505_v43 = vadd.f32 %v5942_v28, %v1504_v41 }
 0x14a   :  { %3165 = vst.msk [vmem:[%s6940_s3 + $0x610] sm:$0xff] %vm313_vm0, %v2877_v36  ;;  %v2225_v44 = vadd.f32 %v5942_v28, %v2224_v42  ;;  %v2736_v45 = vmax.f32 %v1510_v39, 0.0 }
 0x14b   :  { %v2880_v46 = vmax.f32 %v2230_v40, 0.0  ;;  %v2735_v47 = vmax.f32 %v1505_v43, 0.0  ;;  %v3935_v49 = vpop.f32.mrb[54].mxu0 }
 0x14c   :  { %v2879_v48 = vmax.f32 %v2225_v44, 0.0  ;;  %v4151_v50 = vpop.f32.mrb[54].mxu1  ;;  %3024 = vst.msk [vmem:[%s6940_s3 + $0x1a8] sm:$0xff] %vm313_vm0, %v2736_v45  ;;  %v1520_v51 = vadd.f32 %v5942_v28, %v3935_v49  ;;  %v1514_v53 = vpop.f32.mrb[55].mxu0 }
 0x14d   :  { %3168 = vst.msk [vmem:[%s6940_s3 + $0x628] sm:$0xff] %vm313_vm0, %v2880_v46  ;;  %v2240_v52 = vadd.f32 %v5942_v28, %v4151_v50  ;;  %v2234_v54 = vpop.f32.mrb[55].mxu1  ;;  %3023 = vst.msk [vmem:[%s6940_s3 + $0x1a0] sm:$0xff] %vm313_vm0, %v2735_v47  ;;  %v1515_v55 = vadd.f32 %v5942_v28, %v1514_v53 }
 0x14e   :  { %3167 = vst.msk [vmem:[%s6940_s3 + $0x620] sm:$0xff] %vm313_vm0, %v2879_v48  ;;  %v2235_v56 = vadd.f32 %v5942_v28, %v2234_v54  ;;  %v2738_v57 = vmax.f32 %v1520_v51, 0.0 }
 0x14f   :  { %v2882_v58 = vmax.f32 %v2240_v52, 0.0  ;;  %v2737_v59 = vmax.f32 %v1515_v55, 0.0  ;;  %v3938_v61 = vpop.f32.mrb[56].mxu0 }
 0x150   :  { %v2881_v60 = vmax.f32 %v2235_v56, 0.0  ;;  %v4154_v62 = vpop.f32.mrb[56].mxu1  ;;  %3026 = vst.msk [vmem:[%s6940_s3 + $0x1b8] sm:$0xff] %vm313_vm0, %v2738_v57  ;;  %v1530_v63 = vadd.f32 %v5942_v28, %v3938_v61  ;;  %v1524_v1 = vpop.f32.mrb[57].mxu0 }
 0x151   :  { %3170 = vst.msk [vmem:[%s6940_s3 + $0x638] sm:$0xff] %vm313_vm0, %v2882_v58  ;;  %v2250_v0 = vadd.f32 %v5942_v28, %v4154_v62  ;;  %v2244_v2 = vpop.f32.mrb[57].mxu1  ;;  %3025 = vst.msk [vmem:[%s6940_s3 + $0x1b0] sm:$0xff] %vm313_vm0, %v2737_v59  ;;  %v1525_v3 = vadd.f32 %v5942_v28, %v1524_v1 }
 0x152   :  { %3169 = vst.msk [vmem:[%s6940_s3 + $0x630] sm:$0xff] %vm313_vm0, %v2881_v60  ;;  %v2245_v4 = vadd.f32 %v5942_v28, %v2244_v2  ;;  %v2740_v5 = vmax.f32 %v1530_v63, 0.0 }
 0x153   :  { %v2884_v6 = vmax.f32 %v2250_v0, 0.0  ;;  %v2739_v7 = vmax.f32 %v1525_v3, 0.0  ;;  %v3941_v9 = vpop.f32.mrb[58].mxu0 }
 0x154   :  { %v2883_v8 = vmax.f32 %v2245_v4, 0.0  ;;  %v4157_v10 = vpop.f32.mrb[58].mxu1  ;;  %3028 = vst.msk [vmem:[%s6940_s3 + $0x1c8] sm:$0xff] %vm313_vm0, %v2740_v5  ;;  %v1540_v11 = vadd.f32 %v5942_v28, %v3941_v9  ;;  %v1534_v13 = vpop.f32.mrb[59].mxu0 }
 0x155   :  { %3172 = vst.msk [vmem:[%s6940_s3 + $0x648] sm:$0xff] %vm313_vm0, %v2884_v6  ;;  %v2260_v12 = vadd.f32 %v5942_v28, %v4157_v10  ;;  %v2254_v14 = vpop.f32.mrb[59].mxu1  ;;  %3027 = vst.msk [vmem:[%s6940_s3 + $0x1c0] sm:$0xff] %vm313_vm0, %v2739_v7  ;;  %v1535_v15 = vadd.f32 %v5942_v28, %v1534_v13 }
 0x156   :  { %3171 = vst.msk [vmem:[%s6940_s3 + $0x640] sm:$0xff] %vm313_vm0, %v2883_v8  ;;  %v2255_v16 = vadd.f32 %v5942_v28, %v2254_v14  ;;  %v2742_v17 = vmax.f32 %v1540_v11, 0.0 }
 0x157   :  { %v2886_v18 = vmax.f32 %v2260_v12, 0.0  ;;  %v2741_v19 = vmax.f32 %v1535_v15, 0.0  ;;  %v3944_v21 = vpop.f32.mrb[60].mxu0 }
 0x158   :  { %v2885_v20 = vmax.f32 %v2255_v16, 0.0  ;;  %v4160_v22 = vpop.f32.mrb[60].mxu1  ;;  %3030 = vst.msk [vmem:[%s6940_s3 + $0x1d8] sm:$0xff] %vm313_vm0, %v2742_v17  ;;  %v1550_v23 = vadd.f32 %v5942_v28, %v3944_v21  ;;  %v1544_v25 = vpop.f32.mrb[61].mxu0 }
 0x159   :  { %3174 = vst.msk [vmem:[%s6940_s3 + $0x658] sm:$0xff] %vm313_vm0, %v2886_v18  ;;  %v2270_v24 = vadd.f32 %v5942_v28, %v4160_v22  ;;  %v2264_v26 = vpop.f32.mrb[61].mxu1  ;;  %3029 = vst.msk [vmem:[%s6940_s3 + $0x1d0] sm:$0xff] %vm313_vm0, %v2741_v19  ;;  %v1545_v27 = vadd.f32 %v5942_v28, %v1544_v25 }
 0x15a   :  { %3173 = vst.msk [vmem:[%s6940_s3 + $0x650] sm:$0xff] %vm313_vm0, %v2885_v20  ;;  %v2265_v29 = vadd.f32 %v5942_v28, %v2264_v26  ;;  %v2744_v30 = vmax.f32 %v1550_v23, 0.0 }
 0x15b   :  { %v2888_v31 = vmax.f32 %v2270_v24, 0.0  ;;  %v2743_v32 = vmax.f32 %v1545_v27, 0.0  ;;  %v3947_v34 = vpop.f32.mrb[62].mxu0 }
 0x15c   :  { %v2887_v33 = vmax.f32 %v2265_v29, 0.0  ;;  %v4163_v35 = vpop.f32.mrb[62].mxu1  ;;  %3032 = vst.msk [vmem:[%s6940_s3 + $0x1e8] sm:$0xff] %vm313_vm0, %v2744_v30  ;;  %v1560_v36 = vadd.f32 %v5942_v28, %v3947_v34  ;;  %v1554_v38 = vpop.f32.mrb[63].mxu0 }
 0x15d   :  { %3176 = vst.msk [vmem:[%s6940_s3 + $0x668] sm:$0xff] %vm313_vm0, %v2888_v31  ;;  %v2280_v37 = vadd.f32 %v5942_v28, %v4163_v35  ;;  %v2274_v39 = vpop.f32.mrb[63].mxu1  ;;  %3031 = vst.msk [vmem:[%s6940_s3 + $0x1e0] sm:$0xff] %vm313_vm0, %v2743_v32  ;;  %v1555_v40 = vadd.f32 %v5942_v28, %v1554_v38 }
 0x15e   :  { %3175 = vst.msk [vmem:[%s6940_s3 + $0x660] sm:$0xff] %vm313_vm0, %v2887_v33  ;;  %v2275_v41 = vadd.f32 %v5942_v28, %v2274_v39  ;;  %v2746_v42 = vmax.f32 %v1560_v36, 0.0 }
 0x15f   :  { %v2890_v43 = vmax.f32 %v2280_v37, 0.0  ;;  %v2745_v44 = vmax.f32 %v1555_v40, 0.0  ;;  %v3950_v46 = vpop.f32.mrb[64].mxu0 }
 0x160   :  { %v2889_v45 = vmax.f32 %v2275_v41, 0.0  ;;  %v4166_v47 = vpop.f32.mrb[64].mxu1  ;;  %3034 = vst.msk [vmem:[%s6940_s3 + $0x1f8] sm:$0xff] %vm313_vm0, %v2746_v42  ;;  %v1570_v48 = vadd.f32 %v5942_v28, %v3950_v46  ;;  %v1564_v50 = vpop.f32.mrb[65].mxu0 }
 0x161   :  { %3178 = vst.msk [vmem:[%s6940_s3 + $0x678] sm:$0xff] %vm313_vm0, %v2890_v43  ;;  %v2290_v49 = vadd.f32 %v5942_v28, %v4166_v47  ;;  %v2284_v51 = vpop.f32.mrb[65].mxu1  ;;  %3033 = vst.msk [vmem:[%s6940_s3 + $0x1f0] sm:$0xff] %vm313_vm0, %v2745_v44  ;;  %v1565_v52 = vadd.f32 %v5942_v28, %v1564_v50 }
 0x162   :  { %3177 = vst.msk [vmem:[%s6940_s3 + $0x670] sm:$0xff] %vm313_vm0, %v2889_v45  ;;  %v2285_v53 = vadd.f32 %v5942_v28, %v2284_v51  ;;  %v2748_v54 = vmax.f32 %v1570_v48, 0.0 }
 0x163   :  { %v2892_v55 = vmax.f32 %v2290_v49, 0.0  ;;  %v2747_v56 = vmax.f32 %v1565_v52, 0.0  ;;  %v3953_v58 = vpop.f32.mrb[66].mxu0 }
 0x164   :  { %v2891_v57 = vmax.f32 %v2285_v53, 0.0  ;;  %v4169_v59 = vpop.f32.mrb[66].mxu1  ;;  %3036 = vst.msk [vmem:[%s6940_s3 + $0x208] sm:$0xff] %vm313_vm0, %v2748_v54  ;;  %v1580_v60 = vadd.f32 %v5942_v28, %v3953_v58  ;;  %v1574_v62 = vpop.f32.mrb[67].mxu0 }
 0x165   :  { %3180 = vst.msk [vmem:[%s6940_s3 + $0x688] sm:$0xff] %vm313_vm0, %v2892_v55  ;;  %v2300_v61 = vadd.f32 %v5942_v28, %v4169_v59  ;;  %v2294_v63 = vpop.f32.mrb[67].mxu1  ;;  %3035 = vst.msk [vmem:[%s6940_s3 + $0x200] sm:$0xff] %vm313_vm0, %v2747_v56  ;;  %v1575_v0 = vadd.f32 %v5942_v28, %v1574_v62 }
 0x166   :  { %3179 = vst.msk [vmem:[%s6940_s3 + $0x680] sm:$0xff] %vm313_vm0, %v2891_v57  ;;  %v2295_v1 = vadd.f32 %v5942_v28, %v2294_v63  ;;  %v2750_v2 = vmax.f32 %v1580_v60, 0.0 }
 0x167   :  { %v2894_v3 = vmax.f32 %v2300_v61, 0.0  ;;  %v2749_v4 = vmax.f32 %v1575_v0, 0.0  ;;  %v3956_v6 = vpop.f32.mrb[68].mxu0 }
 0x168   :  { %v2893_v5 = vmax.f32 %v2295_v1, 0.0  ;;  %v4172_v7 = vpop.f32.mrb[68].mxu1  ;;  %3038 = vst.msk [vmem:[%s6940_s3 + $0x218] sm:$0xff] %vm313_vm0, %v2750_v2  ;;  %v1590_v8 = vadd.f32 %v5942_v28, %v3956_v6  ;;  %v1584_v10 = vpop.f32.mrb[69].mxu0 }
 0x169   :  { %3182 = vst.msk [vmem:[%s6940_s3 + $0x698] sm:$0xff] %vm313_vm0, %v2894_v3  ;;  %v2310_v9 = vadd.f32 %v5942_v28, %v4172_v7  ;;  %v2304_v11 = vpop.f32.mrb[69].mxu1  ;;  %3037 = vst.msk [vmem:[%s6940_s3 + $0x210] sm:$0xff] %vm313_vm0, %v2749_v4  ;;  %v1585_v12 = vadd.f32 %v5942_v28, %v1584_v10 }
 0x16a   :  { %3181 = vst.msk [vmem:[%s6940_s3 + $0x690] sm:$0xff] %vm313_vm0, %v2893_v5  ;;  %v2305_v13 = vadd.f32 %v5942_v28, %v2304_v11  ;;  %v2752_v14 = vmax.f32 %v1590_v8, 0.0 }
 0x16b   :  { %v2896_v15 = vmax.f32 %v2310_v9, 0.0  ;;  %v2751_v16 = vmax.f32 %v1585_v12, 0.0  ;;  %v3959_v18 = vpop.f32.mrb[70].mxu0 }
 0x16c   :  { %v2895_v17 = vmax.f32 %v2305_v13, 0.0  ;;  %v4175_v19 = vpop.f32.mrb[70].mxu1  ;;  %3040 = vst.msk [vmem:[%s6940_s3 + $0x228] sm:$0xff] %vm313_vm0, %v2752_v14  ;;  %v1600_v20 = vadd.f32 %v5942_v28, %v3959_v18  ;;  %v1594_v22 = vpop.f32.mrb[71].mxu0 }
 0x16d   :  { %3184 = vst.msk [vmem:[%s6940_s3 + $0x6a8] sm:$0xff] %vm313_vm0, %v2896_v15  ;;  %v2320_v21 = vadd.f32 %v5942_v28, %v4175_v19  ;;  %v2314_v23 = vpop.f32.mrb[71].mxu1  ;;  %3039 = vst.msk [vmem:[%s6940_s3 + $0x220] sm:$0xff] %vm313_vm0, %v2751_v16  ;;  %v1595_v24 = vadd.f32 %v5942_v28, %v1594_v22 }
 0x16e   :  { %3183 = vst.msk [vmem:[%s6940_s3 + $0x6a0] sm:$0xff] %vm313_vm0, %v2895_v17  ;;  %v2315_v25 = vadd.f32 %v5942_v28, %v2314_v23  ;;  %v2754_v26 = vmax.f32 %v1600_v20, 0.0 }
 0x16f   :  { %v2898_v27 = vmax.f32 %v2320_v21, 0.0  ;;  %v2753_v29 = vmax.f32 %v1595_v24, 0.0  ;;  %v3962_v31 = vpop.f32.mrb[72].mxu0 }
 0x170   :  { %v2897_v30 = vmax.f32 %v2315_v25, 0.0  ;;  %v4178_v32 = vpop.f32.mrb[72].mxu1  ;;  %3042 = vst.msk [vmem:[%s6940_s3 + $0x238] sm:$0xff] %vm313_vm0, %v2754_v26  ;;  %v1610_v33 = vadd.f32 %v5942_v28, %v3962_v31  ;;  %v1604_v35 = vpop.f32.mrb[73].mxu0 }
 0x171   :  { %3186 = vst.msk [vmem:[%s6940_s3 + $0x6b8] sm:$0xff] %vm313_vm0, %v2898_v27  ;;  %v2330_v34 = vadd.f32 %v5942_v28, %v4178_v32  ;;  %v2324_v36 = vpop.f32.mrb[73].mxu1  ;;  %3041 = vst.msk [vmem:[%s6940_s3 + $0x230] sm:$0xff] %vm313_vm0, %v2753_v29  ;;  %v1605_v37 = vadd.f32 %v5942_v28, %v1604_v35 }
 0x172   :  { %3185 = vst.msk [vmem:[%s6940_s3 + $0x6b0] sm:$0xff] %vm313_vm0, %v2897_v30  ;;  %v2325_v38 = vadd.f32 %v5942_v28, %v2324_v36  ;;  %v2756_v39 = vmax.f32 %v1610_v33, 0.0 }
 0x173   :  { %v2900_v40 = vmax.f32 %v2330_v34, 0.0  ;;  %v2755_v41 = vmax.f32 %v1605_v37, 0.0  ;;  %v3965_v43 = vpop.f32.mrb[74].mxu0 }
 0x174   :  { %v2899_v42 = vmax.f32 %v2325_v38, 0.0  ;;  %v4181_v44 = vpop.f32.mrb[74].mxu1  ;;  %3044 = vst.msk [vmem:[%s6940_s3 + $0x248] sm:$0xff] %vm313_vm0, %v2756_v39  ;;  %v1620_v45 = vadd.f32 %v5942_v28, %v3965_v43  ;;  %v1614_v47 = vpop.f32.mrb[75].mxu0 }
 0x175   :  { %3188 = vst.msk [vmem:[%s6940_s3 + $0x6c8] sm:$0xff] %vm313_vm0, %v2900_v40  ;;  %v2340_v46 = vadd.f32 %v5942_v28, %v4181_v44  ;;  %v2334_v48 = vpop.f32.mrb[75].mxu1  ;;  %3043 = vst.msk [vmem:[%s6940_s3 + $0x240] sm:$0xff] %vm313_vm0, %v2755_v41  ;;  %v1615_v49 = vadd.f32 %v5942_v28, %v1614_v47 }
 0x176   :  { %3187 = vst.msk [vmem:[%s6940_s3 + $0x6c0] sm:$0xff] %vm313_vm0, %v2899_v42  ;;  %v2335_v50 = vadd.f32 %v5942_v28, %v2334_v48  ;;  %v2758_v51 = vmax.f32 %v1620_v45, 0.0 }
 0x177   :  { %v2902_v52 = vmax.f32 %v2340_v46, 0.0  ;;  %v2757_v53 = vmax.f32 %v1615_v49, 0.0  ;;  %v3968_v55 = vpop.f32.mrb[76].mxu0 }
 0x178   :  { %v2901_v54 = vmax.f32 %v2335_v50, 0.0  ;;  %v4184_v56 = vpop.f32.mrb[76].mxu1  ;;  %3046 = vst.msk [vmem:[%s6940_s3 + $0x258] sm:$0xff] %vm313_vm0, %v2758_v51  ;;  %v1630_v57 = vadd.f32 %v5942_v28, %v3968_v55  ;;  %v1624_v59 = vpop.f32.mrb[77].mxu0 }
 0x179   :  { %3190 = vst.msk [vmem:[%s6940_s3 + $0x6d8] sm:$0xff] %vm313_vm0, %v2902_v52  ;;  %v2350_v58 = vadd.f32 %v5942_v28, %v4184_v56  ;;  %v2344_v60 = vpop.f32.mrb[77].mxu1  ;;  %3045 = vst.msk [vmem:[%s6940_s3 + $0x250] sm:$0xff] %vm313_vm0, %v2757_v53  ;;  %v1625_v61 = vadd.f32 %v5942_v28, %v1624_v59 }
 0x17a   :  { %3189 = vst.msk [vmem:[%s6940_s3 + $0x6d0] sm:$0xff] %vm313_vm0, %v2901_v54  ;;  %v2345_v62 = vadd.f32 %v5942_v28, %v2344_v60  ;;  %v2760_v63 = vmax.f32 %v1630_v57, 0.0 }
 0x17b   :  { %v2904_v0 = vmax.f32 %v2350_v58, 0.0  ;;  %v2759_v1 = vmax.f32 %v1625_v61, 0.0  ;;  %v3971_v3 = vpop.f32.mrb[78].mxu0 }
 0x17c   :  { %v2903_v2 = vmax.f32 %v2345_v62, 0.0  ;;  %v4187_v4 = vpop.f32.mrb[78].mxu1  ;;  %3048 = vst.msk [vmem:[%s6940_s3 + $0x268] sm:$0xff] %vm313_vm0, %v2760_v63  ;;  %v1640_v5 = vadd.f32 %v5942_v28, %v3971_v3  ;;  %v1634_v7 = vpop.f32.mrb[79].mxu0 }
 0x17d   :  { %3192 = vst.msk [vmem:[%s6940_s3 + $0x6e8] sm:$0xff] %vm313_vm0, %v2904_v0  ;;  %v2360_v6 = vadd.f32 %v5942_v28, %v4187_v4  ;;  %v2354_v8 = vpop.f32.mrb[79].mxu1  ;;  %3047 = vst.msk [vmem:[%s6940_s3 + $0x260] sm:$0xff] %vm313_vm0, %v2759_v1  ;;  %v1635_v9 = vadd.f32 %v5942_v28, %v1634_v7 }
 0x17e   :  { %3191 = vst.msk [vmem:[%s6940_s3 + $0x6e0] sm:$0xff] %vm313_vm0, %v2903_v2  ;;  %v2355_v10 = vadd.f32 %v5942_v28, %v2354_v8  ;;  %v2762_v11 = vmax.f32 %v1640_v5, 0.0 }
 0x17f   :  { %v2906_v12 = vmax.f32 %v2360_v6, 0.0  ;;  %v2761_v13 = vmax.f32 %v1635_v9, 0.0  ;;  %v3974_v15 = vpop.f32.mrb[80].mxu0 }
 0x180   :  { %v2905_v14 = vmax.f32 %v2355_v10, 0.0  ;;  %v4190_v16 = vpop.f32.mrb[80].mxu1  ;;  %3050 = vst.msk [vmem:[%s6940_s3 + $0x278] sm:$0xff] %vm313_vm0, %v2762_v11  ;;  %v1650_v17 = vadd.f32 %v5942_v28, %v3974_v15  ;;  %v1644_v19 = vpop.f32.mrb[81].mxu0 }
 0x181   :  { %3194 = vst.msk [vmem:[%s6940_s3 + $0x6f8] sm:$0xff] %vm313_vm0, %v2906_v12  ;;  %v2370_v18 = vadd.f32 %v5942_v28, %v4190_v16  ;;  %v2364_v20 = vpop.f32.mrb[81].mxu1  ;;  %3049 = vst.msk [vmem:[%s6940_s3 + $0x270] sm:$0xff] %vm313_vm0, %v2761_v13  ;;  %v1645_v21 = vadd.f32 %v5942_v28, %v1644_v19 }
 0x182   :  { %3193 = vst.msk [vmem:[%s6940_s3 + $0x6f0] sm:$0xff] %vm313_vm0, %v2905_v14  ;;  %v2365_v22 = vadd.f32 %v5942_v28, %v2364_v20  ;;  %v2764_v23 = vmax.f32 %v1650_v17, 0.0 }
 0x183   :  { %v2908_v24 = vmax.f32 %v2370_v18, 0.0  ;;  %v2763_v25 = vmax.f32 %v1645_v21, 0.0  ;;  %v3977_v27 = vpop.f32.mrb[82].mxu0 }
 0x184   :  { %v2907_v26 = vmax.f32 %v2365_v22, 0.0  ;;  %v4193_v29 = vpop.f32.mrb[82].mxu1  ;;  %3052 = vst.msk [vmem:[%s6940_s3 + $0x288] sm:$0xff] %vm313_vm0, %v2764_v23  ;;  %v1660_v30 = vadd.f32 %v5942_v28, %v3977_v27  ;;  %v1654_v32 = vpop.f32.mrb[83].mxu0 }
 0x185   :  { %3196 = vst.msk [vmem:[%s6940_s3 + $0x708] sm:$0xff] %vm313_vm0, %v2908_v24  ;;  %v2380_v31 = vadd.f32 %v5942_v28, %v4193_v29  ;;  %v2374_v33 = vpop.f32.mrb[83].mxu1  ;;  %3051 = vst.msk [vmem:[%s6940_s3 + $0x280] sm:$0xff] %vm313_vm0, %v2763_v25  ;;  %v1655_v34 = vadd.f32 %v5942_v28, %v1654_v32 }
 0x186   :  { %3195 = vst.msk [vmem:[%s6940_s3 + $0x700] sm:$0xff] %vm313_vm0, %v2907_v26  ;;  %v2375_v35 = vadd.f32 %v5942_v28, %v2374_v33  ;;  %v2766_v36 = vmax.f32 %v1660_v30, 0.0 }
 0x187   :  { %v2910_v37 = vmax.f32 %v2380_v31, 0.0  ;;  %v2765_v38 = vmax.f32 %v1655_v34, 0.0  ;;  %v3980_v40 = vpop.f32.mrb[84].mxu0 }
 0x188   :  { %v2909_v39 = vmax.f32 %v2375_v35, 0.0  ;;  %v4196_v41 = vpop.f32.mrb[84].mxu1  ;;  %3054 = vst.msk [vmem:[%s6940_s3 + $0x298] sm:$0xff] %vm313_vm0, %v2766_v36  ;;  %v1670_v42 = vadd.f32 %v5942_v28, %v3980_v40  ;;  %v1664_v44 = vpop.f32.mrb[85].mxu0 }
 0x189   :  { %3198 = vst.msk [vmem:[%s6940_s3 + $0x718] sm:$0xff] %vm313_vm0, %v2910_v37  ;;  %v2390_v43 = vadd.f32 %v5942_v28, %v4196_v41  ;;  %v2384_v45 = vpop.f32.mrb[85].mxu1  ;;  %3053 = vst.msk [vmem:[%s6940_s3 + $0x290] sm:$0xff] %vm313_vm0, %v2765_v38  ;;  %v1665_v46 = vadd.f32 %v5942_v28, %v1664_v44 }
 0x18a   :  { %3197 = vst.msk [vmem:[%s6940_s3 + $0x710] sm:$0xff] %vm313_vm0, %v2909_v39  ;;  %v2385_v47 = vadd.f32 %v5942_v28, %v2384_v45  ;;  %v2768_v48 = vmax.f32 %v1670_v42, 0.0 }
 0x18b   :  { %v2912_v49 = vmax.f32 %v2390_v43, 0.0  ;;  %v2767_v50 = vmax.f32 %v1665_v46, 0.0  ;;  %v3983_v52 = vpop.f32.mrb[86].mxu0 }
 0x18c   :  { %v2911_v51 = vmax.f32 %v2385_v47, 0.0  ;;  %v4199_v53 = vpop.f32.mrb[86].mxu1  ;;  %3056 = vst.msk [vmem:[%s6940_s3 + $0x2a8] sm:$0xff] %vm313_vm0, %v2768_v48  ;;  %v1680_v54 = vadd.f32 %v5942_v28, %v3983_v52  ;;  %v1674_v56 = vpop.f32.mrb[87].mxu0 }
 0x18d   :  { %3200 = vst.msk [vmem:[%s6940_s3 + $0x728] sm:$0xff] %vm313_vm0, %v2912_v49  ;;  %v2400_v55 = vadd.f32 %v5942_v28, %v4199_v53  ;;  %v2394_v57 = vpop.f32.mrb[87].mxu1  ;;  %3055 = vst.msk [vmem:[%s6940_s3 + $0x2a0] sm:$0xff] %vm313_vm0, %v2767_v50  ;;  %v1675_v58 = vadd.f32 %v5942_v28, %v1674_v56 }
 0x18e   :  { %3199 = vst.msk [vmem:[%s6940_s3 + $0x720] sm:$0xff] %vm313_vm0, %v2911_v51  ;;  %v2395_v59 = vadd.f32 %v5942_v28, %v2394_v57  ;;  %v2770_v60 = vmax.f32 %v1680_v54, 0.0 }
 0x18f   :  { %v2914_v61 = vmax.f32 %v2400_v55, 0.0  ;;  %v2769_v62 = vmax.f32 %v1675_v58, 0.0  ;;  %v3986_v0 = vpop.f32.mrb[88].mxu0 }
 0x190   :  { %v2913_v63 = vmax.f32 %v2395_v59, 0.0  ;;  %v4202_v1 = vpop.f32.mrb[88].mxu1  ;;  %3058 = vst.msk [vmem:[%s6940_s3 + $0x2b8] sm:$0xff] %vm313_vm0, %v2770_v60  ;;  %v1690_v2 = vadd.f32 %v5942_v28, %v3986_v0  ;;  %v1684_v4 = vpop.f32.mrb[89].mxu0 }
 0x191   :  { %3202 = vst.msk [vmem:[%s6940_s3 + $0x738] sm:$0xff] %vm313_vm0, %v2914_v61  ;;  %v2410_v3 = vadd.f32 %v5942_v28, %v4202_v1  ;;  %v2404_v5 = vpop.f32.mrb[89].mxu1  ;;  %3057 = vst.msk [vmem:[%s6940_s3 + $0x2b0] sm:$0xff] %vm313_vm0, %v2769_v62  ;;  %v1685_v6 = vadd.f32 %v5942_v28, %v1684_v4 }
 0x192   :  { %3201 = vst.msk [vmem:[%s6940_s3 + $0x730] sm:$0xff] %vm313_vm0, %v2913_v63  ;;  %v2405_v7 = vadd.f32 %v5942_v28, %v2404_v5  ;;  %v2772_v8 = vmax.f32 %v1690_v2, 0.0 }
 0x193   :  { %v2916_v9 = vmax.f32 %v2410_v3, 0.0  ;;  %v2771_v10 = vmax.f32 %v1685_v6, 0.0  ;;  %v3989_v12 = vpop.f32.mrb[90].mxu0 }
 0x194   :  { %v2915_v11 = vmax.f32 %v2405_v7, 0.0  ;;  %v4205_v13 = vpop.f32.mrb[90].mxu1  ;;  %3060 = vst.msk [vmem:[%s6940_s3 + $0x2c8] sm:$0xff] %vm313_vm0, %v2772_v8  ;;  %v1700_v14 = vadd.f32 %v5942_v28, %v3989_v12  ;;  %v1694_v16 = vpop.f32.mrb[91].mxu0 }
 0x195   :  { %3204 = vst.msk [vmem:[%s6940_s3 + $0x748] sm:$0xff] %vm313_vm0, %v2916_v9  ;;  %v2420_v15 = vadd.f32 %v5942_v28, %v4205_v13  ;;  %v2414_v17 = vpop.f32.mrb[91].mxu1  ;;  %3059 = vst.msk [vmem:[%s6940_s3 + $0x2c0] sm:$0xff] %vm313_vm0, %v2771_v10  ;;  %v1695_v18 = vadd.f32 %v5942_v28, %v1694_v16 }
 0x196   :  { %3203 = vst.msk [vmem:[%s6940_s3 + $0x740] sm:$0xff] %vm313_vm0, %v2915_v11  ;;  %v2415_v19 = vadd.f32 %v5942_v28, %v2414_v17  ;;  %v2774_v20 = vmax.f32 %v1700_v14, 0.0 }
 0x197   :  { %v2918_v21 = vmax.f32 %v2420_v15, 0.0  ;;  %v2773_v22 = vmax.f32 %v1695_v18, 0.0  ;;  %v3992_v24 = vpop.f32.mrb[92].mxu0 }
 0x198   :  { %v2917_v23 = vmax.f32 %v2415_v19, 0.0  ;;  %v4208_v25 = vpop.f32.mrb[92].mxu1  ;;  %3062 = vst.msk [vmem:[%s6940_s3 + $0x2d8] sm:$0xff] %vm313_vm0, %v2774_v20  ;;  %v1710_v26 = vadd.f32 %v5942_v28, %v3992_v24  ;;  %v1704_v29 = vpop.f32.mrb[93].mxu0 }
 0x199   :  { %3206 = vst.msk [vmem:[%s6940_s3 + $0x758] sm:$0xff] %vm313_vm0, %v2918_v21  ;;  %v2430_v27 = vadd.f32 %v5942_v28, %v4208_v25  ;;  %v2424_v30 = vpop.f32.mrb[93].mxu1  ;;  %3061 = vst.msk [vmem:[%s6940_s3 + $0x2d0] sm:$0xff] %vm313_vm0, %v2773_v22  ;;  %v1705_v31 = vadd.f32 %v5942_v28, %v1704_v29 }
 0x19a   :  { %3205 = vst.msk [vmem:[%s6940_s3 + $0x750] sm:$0xff] %vm313_vm0, %v2917_v23  ;;  %v2425_v32 = vadd.f32 %v5942_v28, %v2424_v30  ;;  %v2776_v33 = vmax.f32 %v1710_v26, 0.0 }
 0x19b   :  { %v2920_v34 = vmax.f32 %v2430_v27, 0.0  ;;  %v2775_v35 = vmax.f32 %v1705_v31, 0.0  ;;  %v3995_v37 = vpop.f32.mrb[94].mxu0 }
 0x19c   :  { %v2919_v36 = vmax.f32 %v2425_v32, 0.0  ;;  %v4211_v38 = vpop.f32.mrb[94].mxu1  ;;  %3064 = vst.msk [vmem:[%s6940_s3 + $0x2e8] sm:$0xff] %vm313_vm0, %v2776_v33  ;;  %v1720_v39 = vadd.f32 %v5942_v28, %v3995_v37  ;;  %v1714_v41 = vpop.f32.mrb[95].mxu0 }
 0x19d   :  { %3208 = vst.msk [vmem:[%s6940_s3 + $0x768] sm:$0xff] %vm313_vm0, %v2920_v34  ;;  %v2440_v40 = vadd.f32 %v5942_v28, %v4211_v38  ;;  %v2434_v42 = vpop.f32.mrb[95].mxu1  ;;  %3063 = vst.msk [vmem:[%s6940_s3 + $0x2e0] sm:$0xff] %vm313_vm0, %v2775_v35  ;;  %v1715_v43 = vadd.f32 %v5942_v28, %v1714_v41 }
 0x19e   :  { %3207 = vst.msk [vmem:[%s6940_s3 + $0x760] sm:$0xff] %vm313_vm0, %v2919_v36  ;;  %v2435_v44 = vadd.f32 %v5942_v28, %v2434_v42  ;;  %v2778_v45 = vmax.f32 %v1720_v39, 0.0 }
 0x19f   :  { %v2922_v46 = vmax.f32 %v2440_v40, 0.0  ;;  %v2777_v47 = vmax.f32 %v1715_v43, 0.0  ;;  %v3998_v49 = vpop.f32.mrb[96].mxu0 }
 0x1a0   :  { %v2921_v48 = vmax.f32 %v2435_v44, 0.0  ;;  %v4214_v50 = vpop.f32.mrb[96].mxu1  ;;  %3066 = vst.msk [vmem:[%s6940_s3 + $0x2f8] sm:$0xff] %vm313_vm0, %v2778_v45  ;;  %v1730_v51 = vadd.f32 %v5942_v28, %v3998_v49  ;;  %v1724_v53 = vpop.f32.mrb[97].mxu0 }
 0x1a1   :  { %3210 = vst.msk [vmem:[%s6940_s3 + $0x778] sm:$0xff] %vm313_vm0, %v2922_v46  ;;  %v2450_v52 = vadd.f32 %v5942_v28, %v4214_v50  ;;  %v2444_v54 = vpop.f32.mrb[97].mxu1  ;;  %3065 = vst.msk [vmem:[%s6940_s3 + $0x2f0] sm:$0xff] %vm313_vm0, %v2777_v47  ;;  %v1725_v55 = vadd.f32 %v5942_v28, %v1724_v53 }
 0x1a2   :  { %3209 = vst.msk [vmem:[%s6940_s3 + $0x770] sm:$0xff] %vm313_vm0, %v2921_v48  ;;  %v2445_v56 = vadd.f32 %v5942_v28, %v2444_v54  ;;  %v2780_v57 = vmax.f32 %v1730_v51, 0.0 }
 0x1a3   :  { %v2924_v58 = vmax.f32 %v2450_v52, 0.0  ;;  %v2779_v59 = vmax.f32 %v1725_v55, 0.0  ;;  %v4001_v61 = vpop.f32.mrb[98].mxu0 }
 0x1a4   :  { %v2923_v60 = vmax.f32 %v2445_v56, 0.0  ;;  %v4217_v62 = vpop.f32.mrb[98].mxu1  ;;  %3068 = vst.msk [vmem:[%s6940_s3 + $0x308] sm:$0xff] %vm313_vm0, %v2780_v57  ;;  %v1740_v63 = vadd.f32 %v5942_v28, %v4001_v61  ;;  %v1734_v1 = vpop.f32.mrb[99].mxu0 }
 0x1a5   :  { %3212 = vst.msk [vmem:[%s6940_s3 + $0x788] sm:$0xff] %vm313_vm0, %v2924_v58  ;;  %v2460_v0 = vadd.f32 %v5942_v28, %v4217_v62  ;;  %v2454_v2 = vpop.f32.mrb[99].mxu1  ;;  %3067 = vst.msk [vmem:[%s6940_s3 + $0x300] sm:$0xff] %vm313_vm0, %v2779_v59  ;;  %v1735_v3 = vadd.f32 %v5942_v28, %v1734_v1 }
 0x1a6   :  { %3211 = vst.msk [vmem:[%s6940_s3 + $0x780] sm:$0xff] %vm313_vm0, %v2923_v60  ;;  %v2455_v4 = vadd.f32 %v5942_v28, %v2454_v2  ;;  %v2782_v5 = vmax.f32 %v1740_v63, 0.0 }
 0x1a7   :  { %v2926_v6 = vmax.f32 %v2460_v0, 0.0  ;;  %v2781_v7 = vmax.f32 %v1735_v3, 0.0  ;;  %v4004_v9 = vpop.f32.mrb[100].mxu0 }
 0x1a8   :  { %v2925_v8 = vmax.f32 %v2455_v4, 0.0  ;;  %v4220_v10 = vpop.f32.mrb[100].mxu1  ;;  %3070 = vst.msk [vmem:[%s6940_s3 + $0x318] sm:$0xff] %vm313_vm0, %v2782_v5  ;;  %v1750_v11 = vadd.f32 %v5942_v28, %v4004_v9  ;;  %v1744_v13 = vpop.f32.mrb[101].mxu0 }
 0x1a9   :  { %3214 = vst.msk [vmem:[%s6940_s3 + $0x798] sm:$0xff] %vm313_vm0, %v2926_v6  ;;  %v2470_v12 = vadd.f32 %v5942_v28, %v4220_v10  ;;  %v2464_v14 = vpop.f32.mrb[101].mxu1  ;;  %3069 = vst.msk [vmem:[%s6940_s3 + $0x310] sm:$0xff] %vm313_vm0, %v2781_v7  ;;  %v1745_v15 = vadd.f32 %v5942_v28, %v1744_v13 }
 0x1aa   :  { %3213 = vst.msk [vmem:[%s6940_s3 + $0x790] sm:$0xff] %vm313_vm0, %v2925_v8  ;;  %v2465_v16 = vadd.f32 %v5942_v28, %v2464_v14  ;;  %v2784_v17 = vmax.f32 %v1750_v11, 0.0 }
 0x1ab   :  { %v2928_v18 = vmax.f32 %v2470_v12, 0.0  ;;  %v2783_v19 = vmax.f32 %v1745_v15, 0.0  ;;  %v4007_v21 = vpop.f32.mrb[102].mxu0 }
 0x1ac   :  { %v2927_v20 = vmax.f32 %v2465_v16, 0.0  ;;  %v4223_v22 = vpop.f32.mrb[102].mxu1  ;;  %3072 = vst.msk [vmem:[%s6940_s3 + $0x328] sm:$0xff] %vm313_vm0, %v2784_v17  ;;  %v1760_v23 = vadd.f32 %v5942_v28, %v4007_v21  ;;  %v1754_v25 = vpop.f32.mrb[103].mxu0 }
 0x1ad   :  { %3216 = vst.msk [vmem:[%s6940_s3 + $0x7a8] sm:$0xff] %vm313_vm0, %v2928_v18  ;;  %v2480_v24 = vadd.f32 %v5942_v28, %v4223_v22  ;;  %v2474_v26 = vpop.f32.mrb[103].mxu1  ;;  %3071 = vst.msk [vmem:[%s6940_s3 + $0x320] sm:$0xff] %vm313_vm0, %v2783_v19  ;;  %v1755_v27 = vadd.f32 %v5942_v28, %v1754_v25 }
 0x1ae   :  { %3215 = vst.msk [vmem:[%s6940_s3 + $0x7a0] sm:$0xff] %vm313_vm0, %v2927_v20  ;;  %v2475_v29 = vadd.f32 %v5942_v28, %v2474_v26  ;;  %v2786_v30 = vmax.f32 %v1760_v23, 0.0 }
 0x1af   :  { %v2930_v31 = vmax.f32 %v2480_v24, 0.0  ;;  %v2785_v32 = vmax.f32 %v1755_v27, 0.0  ;;  %v4010_v34 = vpop.f32.mrb[104].mxu0 }
 0x1b0   :  { %v2929_v33 = vmax.f32 %v2475_v29, 0.0  ;;  %v4226_v35 = vpop.f32.mrb[104].mxu1  ;;  %3074 = vst.msk [vmem:[%s6940_s3 + $0x338] sm:$0xff] %vm313_vm0, %v2786_v30  ;;  %v1770_v36 = vadd.f32 %v5942_v28, %v4010_v34  ;;  %v1764_v38 = vpop.f32.mrb[105].mxu0 }
 0x1b1   :  { %3218 = vst.msk [vmem:[%s6940_s3 + $0x7b8] sm:$0xff] %vm313_vm0, %v2930_v31  ;;  %v2490_v37 = vadd.f32 %v5942_v28, %v4226_v35  ;;  %v2484_v39 = vpop.f32.mrb[105].mxu1  ;;  %3073 = vst.msk [vmem:[%s6940_s3 + $0x330] sm:$0xff] %vm313_vm0, %v2785_v32  ;;  %v1765_v40 = vadd.f32 %v5942_v28, %v1764_v38 }
 0x1b2   :  { %3217 = vst.msk [vmem:[%s6940_s3 + $0x7b0] sm:$0xff] %vm313_vm0, %v2929_v33  ;;  %v2485_v41 = vadd.f32 %v5942_v28, %v2484_v39  ;;  %v2788_v42 = vmax.f32 %v1770_v36, 0.0 }
 0x1b3   :  { %v2932_v43 = vmax.f32 %v2490_v37, 0.0  ;;  %v2787_v44 = vmax.f32 %v1765_v40, 0.0  ;;  %v4013_v46 = vpop.f32.mrb[106].mxu0 }
 0x1b4   :  { %v2931_v45 = vmax.f32 %v2485_v41, 0.0  ;;  %v4229_v47 = vpop.f32.mrb[106].mxu1  ;;  %3076 = vst.msk [vmem:[%s6940_s3 + $0x348] sm:$0xff] %vm313_vm0, %v2788_v42  ;;  %v1780_v48 = vadd.f32 %v5942_v28, %v4013_v46  ;;  %v1774_v50 = vpop.f32.mrb[107].mxu0 }
 0x1b5   :  { %3220 = vst.msk [vmem:[%s6940_s3 + $0x7c8] sm:$0xff] %vm313_vm0, %v2932_v43  ;;  %v2500_v49 = vadd.f32 %v5942_v28, %v4229_v47  ;;  %v2494_v51 = vpop.f32.mrb[107].mxu1  ;;  %3075 = vst.msk [vmem:[%s6940_s3 + $0x340] sm:$0xff] %vm313_vm0, %v2787_v44  ;;  %v1775_v52 = vadd.f32 %v5942_v28, %v1774_v50 }
 0x1b6   :  { %3219 = vst.msk [vmem:[%s6940_s3 + $0x7c0] sm:$0xff] %vm313_vm0, %v2931_v45  ;;  %v2495_v53 = vadd.f32 %v5942_v28, %v2494_v51  ;;  %v2790_v54 = vmax.f32 %v1780_v48, 0.0 }
 0x1b7   :  { %v2934_v55 = vmax.f32 %v2500_v49, 0.0  ;;  %v2789_v56 = vmax.f32 %v1775_v52, 0.0  ;;  %v4016_v58 = vpop.f32.mrb[108].mxu0 }
 0x1b8   :  { %v2933_v57 = vmax.f32 %v2495_v53, 0.0  ;;  %v4232_v59 = vpop.f32.mrb[108].mxu1  ;;  %3078 = vst.msk [vmem:[%s6940_s3 + $0x358] sm:$0xff] %vm313_vm0, %v2790_v54  ;;  %v1790_v60 = vadd.f32 %v5942_v28, %v4016_v58  ;;  %v1784_v62 = vpop.f32.mrb[109].mxu0 }
 0x1b9   :  { %3222 = vst.msk [vmem:[%s6940_s3 + $0x7d8] sm:$0xff] %vm313_vm0, %v2934_v55  ;;  %v2510_v61 = vadd.f32 %v5942_v28, %v4232_v59  ;;  %v2504_v63 = vpop.f32.mrb[109].mxu1  ;;  %3077 = vst.msk [vmem:[%s6940_s3 + $0x350] sm:$0xff] %vm313_vm0, %v2789_v56  ;;  %v1785_v0 = vadd.f32 %v5942_v28, %v1784_v62 }
 0x1ba   :  { %3221 = vst.msk [vmem:[%s6940_s3 + $0x7d0] sm:$0xff] %vm313_vm0, %v2933_v57  ;;  %v2505_v1 = vadd.f32 %v5942_v28, %v2504_v63  ;;  %v2792_v2 = vmax.f32 %v1790_v60, 0.0  ;;  %v6587_v28 = vld [vmem:[%s6939_s2] ss:$0 sm:$0xff] }
 0x1bb   :  { %v2936_v3 = vmax.f32 %v2510_v61, 0.0  ;;  %v2791_v4 = vmax.f32 %v1785_v0, 0.0  ;;  %v4019_v6 = vpop.f32.mrb[110].mxu0 }
 0x1bc   :  { %v2935_v5 = vmax.f32 %v2505_v1, 0.0  ;;  %v4235_v7 = vpop.f32.mrb[110].mxu1  ;;  %3080 = vst.msk [vmem:[%s6940_s3 + $0x368] sm:$0xff] %vm313_vm0, %v2792_v2  ;;  %v1800_v8 = vadd.f32 %v6587_v28, %v4019_v6  ;;  %v1794_v10 = vpop.f32.mrb[111].mxu0 }
 0x1bd   :  { %3224 = vst.msk [vmem:[%s6940_s3 + $0x7e8] sm:$0xff] %vm313_vm0, %v2936_v3  ;;  %v2520_v9 = vadd.f32 %v6587_v28, %v4235_v7  ;;  %v2514_v11 = vpop.f32.mrb[111].mxu1  ;;  %3079 = vst.msk [vmem:[%s6940_s3 + $0x360] sm:$0xff] %vm313_vm0, %v2791_v4  ;;  %v1795_v12 = vadd.f32 %v6587_v28, %v1794_v10 }
 0x1be   :  { %3223 = vst.msk [vmem:[%s6940_s3 + $0x7e0] sm:$0xff] %vm313_vm0, %v2935_v5  ;;  %v2515_v13 = vadd.f32 %v6587_v28, %v2514_v11  ;;  %v2794_v14 = vmax.f32 %v1800_v8, 0.0 }
 0x1bf   :  { %v2938_v15 = vmax.f32 %v2520_v9, 0.0  ;;  %v2793_v16 = vmax.f32 %v1795_v12, 0.0  ;;  %v4022_v18 = vpop.f32.mrb[112].mxu0 }
 0x1c0   :  { %v2937_v17 = vmax.f32 %v2515_v13, 0.0  ;;  %v4238_v19 = vpop.f32.mrb[112].mxu1  ;;  %3082 = vst.msk [vmem:[%s6940_s3 + $0x378] sm:$0xff] %vm313_vm0, %v2794_v14  ;;  %v1810_v20 = vadd.f32 %v6587_v28, %v4022_v18  ;;  %v1804_v22 = vpop.f32.mrb[113].mxu0 }
 0x1c1   :  { %3226 = vst.msk [vmem:[%s6940_s3 + $0x7f8] sm:$0xff] %vm313_vm0, %v2938_v15  ;;  %v2530_v21 = vadd.f32 %v6587_v28, %v4238_v19  ;;  %v2524_v23 = vpop.f32.mrb[113].mxu1  ;;  %3081 = vst.msk [vmem:[%s6940_s3 + $0x370] sm:$0xff] %vm313_vm0, %v2793_v16  ;;  %v1805_v24 = vadd.f32 %v6587_v28, %v1804_v22 }
 0x1c2   :  { %3225 = vst.msk [vmem:[%s6940_s3 + $0x7f0] sm:$0xff] %vm313_vm0, %v2937_v17  ;;  %v2525_v25 = vadd.f32 %v6587_v28, %v2524_v23  ;;  %v2796_v26 = vmax.f32 %v1810_v20, 0.0 }
 0x1c3   :  { %v2940_v27 = vmax.f32 %v2530_v21, 0.0  ;;  %v2795_v29 = vmax.f32 %v1805_v24, 0.0  ;;  %v4025_v31 = vpop.f32.mrb[114].mxu0 }
 0x1c4   :  { %v2939_v30 = vmax.f32 %v2525_v25, 0.0  ;;  %v4241_v32 = vpop.f32.mrb[114].mxu1  ;;  %3084 = vst.msk [vmem:[%s6940_s3 + $0x388] sm:$0xff] %vm313_vm0, %v2796_v26  ;;  %v1820_v33 = vadd.f32 %v6587_v28, %v4025_v31  ;;  %v1814_v35 = vpop.f32.mrb[115].mxu0 }
 0x1c5   :  { %3228 = vst.msk [vmem:[%s6940_s3 + $0x808] sm:$0xff] %vm313_vm0, %v2940_v27  ;;  %v2540_v34 = vadd.f32 %v6587_v28, %v4241_v32  ;;  %v2534_v36 = vpop.f32.mrb[115].mxu1  ;;  %3083 = vst.msk [vmem:[%s6940_s3 + $0x380] sm:$0xff] %vm313_vm0, %v2795_v29  ;;  %v1815_v37 = vadd.f32 %v6587_v28, %v1814_v35 }
 0x1c6   :  { %3227 = vst.msk [vmem:[%s6940_s3 + $0x800] sm:$0xff] %vm313_vm0, %v2939_v30  ;;  %v2535_v38 = vadd.f32 %v6587_v28, %v2534_v36  ;;  %v2798_v39 = vmax.f32 %v1820_v33, 0.0 }
 0x1c7   :  { %v2942_v40 = vmax.f32 %v2540_v34, 0.0  ;;  %v2797_v41 = vmax.f32 %v1815_v37, 0.0  ;;  %v4028_v43 = vpop.f32.mrb[116].mxu0 }
 0x1c8   :  { %v2941_v42 = vmax.f32 %v2535_v38, 0.0  ;;  %v4244_v44 = vpop.f32.mrb[116].mxu1  ;;  %3086 = vst.msk [vmem:[%s6940_s3 + $0x398] sm:$0xff] %vm313_vm0, %v2798_v39  ;;  %v1830_v45 = vadd.f32 %v6587_v28, %v4028_v43  ;;  %v1824_v47 = vpop.f32.mrb[117].mxu0 }
 0x1c9   :  { %3230 = vst.msk [vmem:[%s6940_s3 + $0x818] sm:$0xff] %vm313_vm0, %v2942_v40  ;;  %v2550_v46 = vadd.f32 %v6587_v28, %v4244_v44  ;;  %v2544_v48 = vpop.f32.mrb[117].mxu1  ;;  %3085 = vst.msk [vmem:[%s6940_s3 + $0x390] sm:$0xff] %vm313_vm0, %v2797_v41  ;;  %v1825_v49 = vadd.f32 %v6587_v28, %v1824_v47 }
 0x1ca   :  { %3229 = vst.msk [vmem:[%s6940_s3 + $0x810] sm:$0xff] %vm313_vm0, %v2941_v42  ;;  %v2545_v50 = vadd.f32 %v6587_v28, %v2544_v48  ;;  %v2800_v51 = vmax.f32 %v1830_v45, 0.0 }
 0x1cb   :  { %v2944_v52 = vmax.f32 %v2550_v46, 0.0  ;;  %v2799_v53 = vmax.f32 %v1825_v49, 0.0  ;;  %v4031_v55 = vpop.f32.mrb[118].mxu0 }
 0x1cc   :  { %v2943_v54 = vmax.f32 %v2545_v50, 0.0  ;;  %v4247_v56 = vpop.f32.mrb[118].mxu1  ;;  %3088 = vst.msk [vmem:[%s6940_s3 + $0x3a8] sm:$0xff] %vm313_vm0, %v2800_v51  ;;  %v1840_v57 = vadd.f32 %v6587_v28, %v4031_v55  ;;  %v1834_v59 = vpop.f32.mrb[119].mxu0 }
 0x1cd   :  { %3232 = vst.msk [vmem:[%s6940_s3 + $0x828] sm:$0xff] %vm313_vm0, %v2944_v52  ;;  %v2560_v58 = vadd.f32 %v6587_v28, %v4247_v56  ;;  %v2554_v60 = vpop.f32.mrb[119].mxu1  ;;  %3087 = vst.msk [vmem:[%s6940_s3 + $0x3a0] sm:$0xff] %vm313_vm0, %v2799_v53  ;;  %v1835_v61 = vadd.f32 %v6587_v28, %v1834_v59 }
 0x1ce   :  { %3231 = vst.msk [vmem:[%s6940_s3 + $0x820] sm:$0xff] %vm313_vm0, %v2943_v54  ;;  %v2555_v62 = vadd.f32 %v6587_v28, %v2554_v60  ;;  %v2802_v63 = vmax.f32 %v1840_v57, 0.0 }
 0x1cf   :  { %v2946_v0 = vmax.f32 %v2560_v58, 0.0  ;;  %v2801_v1 = vmax.f32 %v1835_v61, 0.0  ;;  %v4034_v3 = vpop.f32.mrb[120].mxu0 }
 0x1d0   :  { %v2945_v2 = vmax.f32 %v2555_v62, 0.0  ;;  %v4250_v4 = vpop.f32.mrb[120].mxu1  ;;  %3090 = vst.msk [vmem:[%s6940_s3 + $0x3b8] sm:$0xff] %vm313_vm0, %v2802_v63  ;;  %v1850_v5 = vadd.f32 %v6587_v28, %v4034_v3  ;;  %v1844_v7 = vpop.f32.mrb[121].mxu0 }
 0x1d1   :  { %3234 = vst.msk [vmem:[%s6940_s3 + $0x838] sm:$0xff] %vm313_vm0, %v2946_v0  ;;  %v2570_v6 = vadd.f32 %v6587_v28, %v4250_v4  ;;  %v2564_v8 = vpop.f32.mrb[121].mxu1  ;;  %3089 = vst.msk [vmem:[%s6940_s3 + $0x3b0] sm:$0xff] %vm313_vm0, %v2801_v1  ;;  %v1845_v9 = vadd.f32 %v6587_v28, %v1844_v7 }
 0x1d2   :  { %3233 = vst.msk [vmem:[%s6940_s3 + $0x830] sm:$0xff] %vm313_vm0, %v2945_v2  ;;  %v2565_v10 = vadd.f32 %v6587_v28, %v2564_v8  ;;  %v2804_v11 = vmax.f32 %v1850_v5, 0.0 }
 0x1d3   :  { %v2948_v12 = vmax.f32 %v2570_v6, 0.0  ;;  %v2803_v13 = vmax.f32 %v1845_v9, 0.0  ;;  %v4037_v15 = vpop.f32.mrb[122].mxu0 }
 0x1d4   :  { %v2947_v14 = vmax.f32 %v2565_v10, 0.0  ;;  %v4253_v16 = vpop.f32.mrb[122].mxu1  ;;  %3092 = vst.msk [vmem:[%s6940_s3 + $0x3c8] sm:$0xff] %vm313_vm0, %v2804_v11  ;;  %v1860_v17 = vadd.f32 %v6587_v28, %v4037_v15  ;;  %v1854_v19 = vpop.f32.mrb[123].mxu0 }
 0x1d5   :  { %3236 = vst.msk [vmem:[%s6940_s3 + $0x848] sm:$0xff] %vm313_vm0, %v2948_v12  ;;  %v2580_v18 = vadd.f32 %v6587_v28, %v4253_v16  ;;  %v2574_v20 = vpop.f32.mrb[123].mxu1  ;;  %3091 = vst.msk [vmem:[%s6940_s3 + $0x3c0] sm:$0xff] %vm313_vm0, %v2803_v13  ;;  %v1855_v21 = vadd.f32 %v6587_v28, %v1854_v19 }
 0x1d6   :  { %3235 = vst.msk [vmem:[%s6940_s3 + $0x840] sm:$0xff] %vm313_vm0, %v2947_v14  ;;  %v2575_v22 = vadd.f32 %v6587_v28, %v2574_v20  ;;  %v2806_v23 = vmax.f32 %v1860_v17, 0.0 }
 0x1d7   :  { %v2950_v24 = vmax.f32 %v2580_v18, 0.0  ;;  %v2805_v25 = vmax.f32 %v1855_v21, 0.0  ;;  %v4040_v27 = vpop.f32.mrb[124].mxu0 }
 0x1d8   :  { %v2949_v26 = vmax.f32 %v2575_v22, 0.0  ;;  %v4256_v29 = vpop.f32.mrb[124].mxu1  ;;  %3094 = vst.msk [vmem:[%s6940_s3 + $0x3d8] sm:$0xff] %vm313_vm0, %v2806_v23  ;;  %v1870_v30 = vadd.f32 %v6587_v28, %v4040_v27  ;;  %v1864_v32 = vpop.f32.mrb[125].mxu0 }
 0x1d9   :  { %3238 = vst.msk [vmem:[%s6940_s3 + $0x858] sm:$0xff] %vm313_vm0, %v2950_v24  ;;  %v2590_v31 = vadd.f32 %v6587_v28, %v4256_v29  ;;  %v2584_v33 = vpop.f32.mrb[125].mxu1  ;;  %3093 = vst.msk [vmem:[%s6940_s3 + $0x3d0] sm:$0xff] %vm313_vm0, %v2805_v25  ;;  %v1865_v34 = vadd.f32 %v6587_v28, %v1864_v32 }
 0x1da   :  { %3237 = vst.msk [vmem:[%s6940_s3 + $0x850] sm:$0xff] %vm313_vm0, %v2949_v26  ;;  %v2585_v35 = vadd.f32 %v6587_v28, %v2584_v33  ;;  %v2808_v36 = vmax.f32 %v1870_v30, 0.0 }
 0x1db   :  { %v2952_v37 = vmax.f32 %v2590_v31, 0.0  ;;  %v2807_v38 = vmax.f32 %v1865_v34, 0.0  ;;  %v4043_v40 = vpop.f32.mrb[126].mxu0 }
 0x1dc   :  { %v2951_v39 = vmax.f32 %v2585_v35, 0.0  ;;  %v4259_v41 = vpop.f32.mrb[126].mxu1  ;;  %3096 = vst.msk [vmem:[%s6940_s3 + $0x3e8] sm:$0xff] %vm313_vm0, %v2808_v36  ;;  %v1880_v42 = vadd.f32 %v6587_v28, %v4043_v40  ;;  %v1874_v44 = vpop.f32.mrb[127].mxu0 }
 0x1dd   :  { %3240 = vst.msk [vmem:[%s6940_s3 + $0x868] sm:$0xff] %vm313_vm0, %v2952_v37  ;;  %v2600_v43 = vadd.f32 %v6587_v28, %v4259_v41  ;;  %v2594_v45 = vpop.f32.mrb[127].mxu1  ;;  %3095 = vst.msk [vmem:[%s6940_s3 + $0x3e0] sm:$0xff] %vm313_vm0, %v2807_v38  ;;  %v1875_v46 = vadd.f32 %v6587_v28, %v1874_v44 }
 0x1de   :  { %3239 = vst.msk [vmem:[%s6940_s3 + $0x860] sm:$0xff] %vm313_vm0, %v2951_v39  ;;  %v2595_v47 = vadd.f32 %v6587_v28, %v2594_v45  ;;  %v2810_v48 = vmax.f32 %v1880_v42, 0.0 }
 0x1df   :  { %v2954_v49 = vmax.f32 %v2600_v43, 0.0  ;;  %v2809_v50 = vmax.f32 %v1875_v46, 0.0  ;;  %v4046_v52 = vpop.f32.mrb[128].mxu0 }
 0x1e0   :  { %v2953_v51 = vmax.f32 %v2595_v47, 0.0  ;;  %v4262_v53 = vpop.f32.mrb[128].mxu1  ;;  %3098 = vst.msk [vmem:[%s6940_s3 + $0x3f8] sm:$0xff] %vm313_vm0, %v2810_v48  ;;  %v1890_v54 = vadd.f32 %v6587_v28, %v4046_v52  ;;  %v1884_v56 = vpop.f32.mrb[129].mxu0 }
 0x1e1   :  { %3242 = vst.msk [vmem:[%s6940_s3 + $0x878] sm:$0xff] %vm313_vm0, %v2954_v49  ;;  %v2610_v55 = vadd.f32 %v6587_v28, %v4262_v53  ;;  %v2604_v57 = vpop.f32.mrb[129].mxu1  ;;  %3097 = vst.msk [vmem:[%s6940_s3 + $0x3f0] sm:$0xff] %vm313_vm0, %v2809_v50  ;;  %v1885_v58 = vadd.f32 %v6587_v28, %v1884_v56 }
 0x1e2   :  { %3241 = vst.msk [vmem:[%s6940_s3 + $0x870] sm:$0xff] %vm313_vm0, %v2953_v51  ;;  %v2605_v59 = vadd.f32 %v6587_v28, %v2604_v57  ;;  %v2812_v60 = vmax.f32 %v1890_v54, 0.0 }
 0x1e3   :  { %v2956_v61 = vmax.f32 %v2610_v55, 0.0  ;;  %v2811_v62 = vmax.f32 %v1885_v58, 0.0  ;;  %v4049_v0 = vpop.f32.mrb[130].mxu0 }
 0x1e4   :  { %v2955_v63 = vmax.f32 %v2605_v59, 0.0  ;;  %v4265_v1 = vpop.f32.mrb[130].mxu1  ;;  %3100 = vst.msk [vmem:[%s6940_s3 + $0x408] sm:$0xff] %vm313_vm0, %v2812_v60  ;;  %v1900_v2 = vadd.f32 %v6587_v28, %v4049_v0  ;;  %v1894_v4 = vpop.f32.mrb[131].mxu0 }
 0x1e5   :  { %3244 = vst.msk [vmem:[%s6940_s3 + $0x888] sm:$0xff] %vm313_vm0, %v2956_v61  ;;  %v2620_v3 = vadd.f32 %v6587_v28, %v4265_v1  ;;  %v2614_v5 = vpop.f32.mrb[131].mxu1  ;;  %3099 = vst.msk [vmem:[%s6940_s3 + $0x400] sm:$0xff] %vm313_vm0, %v2811_v62  ;;  %v1895_v6 = vadd.f32 %v6587_v28, %v1894_v4 }
 0x1e6   :  { %3243 = vst.msk [vmem:[%s6940_s3 + $0x880] sm:$0xff] %vm313_vm0, %v2955_v63  ;;  %v2615_v7 = vadd.f32 %v6587_v28, %v2614_v5  ;;  %v2814_v8 = vmax.f32 %v1900_v2, 0.0 }
 0x1e7   :  { %v2958_v9 = vmax.f32 %v2620_v3, 0.0  ;;  %v2813_v10 = vmax.f32 %v1895_v6, 0.0  ;;  %v4052_v12 = vpop.f32.mrb[132].mxu0 }
 0x1e8   :  { %v2957_v11 = vmax.f32 %v2615_v7, 0.0  ;;  %v4268_v13 = vpop.f32.mrb[132].mxu1  ;;  %3102 = vst.msk [vmem:[%s6940_s3 + $0x418] sm:$0xff] %vm313_vm0, %v2814_v8  ;;  %v1910_v14 = vadd.f32 %v6587_v28, %v4052_v12  ;;  %v1904_v16 = vpop.f32.mrb[133].mxu0 }
 0x1e9   :  { %3246 = vst.msk [vmem:[%s6940_s3 + $0x898] sm:$0xff] %vm313_vm0, %v2958_v9  ;;  %v2630_v15 = vadd.f32 %v6587_v28, %v4268_v13  ;;  %v2624_v17 = vpop.f32.mrb[133].mxu1  ;;  %3101 = vst.msk [vmem:[%s6940_s3 + $0x410] sm:$0xff] %vm313_vm0, %v2813_v10  ;;  %v1905_v18 = vadd.f32 %v6587_v28, %v1904_v16 }
 0x1ea   :  { %3245 = vst.msk [vmem:[%s6940_s3 + $0x890] sm:$0xff] %vm313_vm0, %v2957_v11  ;;  %v2625_v19 = vadd.f32 %v6587_v28, %v2624_v17  ;;  %v2816_v20 = vmax.f32 %v1910_v14, 0.0 }
 0x1eb   :  { %v2960_v21 = vmax.f32 %v2630_v15, 0.0  ;;  %v2815_v22 = vmax.f32 %v1905_v18, 0.0  ;;  %v4055_v24 = vpop.f32.mrb[134].mxu0 }
 0x1ec   :  { %v2959_v23 = vmax.f32 %v2625_v19, 0.0  ;;  %v4271_v25 = vpop.f32.mrb[134].mxu1  ;;  %3104 = vst.msk [vmem:[%s6940_s3 + $0x428] sm:$0xff] %vm313_vm0, %v2816_v20  ;;  %v1920_v26 = vadd.f32 %v6587_v28, %v4055_v24  ;;  %v1914_v29 = vpop.f32.mrb[135].mxu0 }
 0x1ed   :  { %3248 = vst.msk [vmem:[%s6940_s3 + $0x8a8] sm:$0xff] %vm313_vm0, %v2960_v21  ;;  %v2640_v27 = vadd.f32 %v6587_v28, %v4271_v25  ;;  %v2634_v30 = vpop.f32.mrb[135].mxu1  ;;  %3103 = vst.msk [vmem:[%s6940_s3 + $0x420] sm:$0xff] %vm313_vm0, %v2815_v22  ;;  %v1915_v31 = vadd.f32 %v6587_v28, %v1914_v29 }
 0x1ee   :  { %3247 = vst.msk [vmem:[%s6940_s3 + $0x8a0] sm:$0xff] %vm313_vm0, %v2959_v23  ;;  %v2635_v32 = vadd.f32 %v6587_v28, %v2634_v30  ;;  %v2818_v33 = vmax.f32 %v1920_v26, 0.0 }
 0x1ef   :  { %v2962_v34 = vmax.f32 %v2640_v27, 0.0  ;;  %v2817_v35 = vmax.f32 %v1915_v31, 0.0  ;;  %v4058_v37 = vpop.f32.mrb[136].mxu0 }
 0x1f0   :  { %v2961_v36 = vmax.f32 %v2635_v32, 0.0  ;;  %v4274_v38 = vpop.f32.mrb[136].mxu1  ;;  %3106 = vst.msk [vmem:[%s6940_s3 + $0x438] sm:$0xff] %vm313_vm0, %v2818_v33  ;;  %v1930_v39 = vadd.f32 %v6587_v28, %v4058_v37  ;;  %v1924_v41 = vpop.f32.mrb[137].mxu0 }
 0x1f1   :  { %3250 = vst.msk [vmem:[%s6940_s3 + $0x8b8] sm:$0xff] %vm313_vm0, %v2962_v34  ;;  %v2650_v40 = vadd.f32 %v6587_v28, %v4274_v38  ;;  %v2644_v42 = vpop.f32.mrb[137].mxu1  ;;  %3105 = vst.msk [vmem:[%s6940_s3 + $0x430] sm:$0xff] %vm313_vm0, %v2817_v35  ;;  %v1925_v43 = vadd.f32 %v6587_v28, %v1924_v41 }
 0x1f2   :  { %3249 = vst.msk [vmem:[%s6940_s3 + $0x8b0] sm:$0xff] %vm313_vm0, %v2961_v36  ;;  %v2645_v44 = vadd.f32 %v6587_v28, %v2644_v42  ;;  %v2820_v45 = vmax.f32 %v1930_v39, 0.0 }
 0x1f3   :  { %v2964_v46 = vmax.f32 %v2650_v40, 0.0  ;;  %v2819_v47 = vmax.f32 %v1925_v43, 0.0  ;;  %v4061_v49 = vpop.f32.mrb[138].mxu0 }
 0x1f4   :  { %v2963_v48 = vmax.f32 %v2645_v44, 0.0  ;;  %v4277_v50 = vpop.f32.mrb[138].mxu1  ;;  %3108 = vst.msk [vmem:[%s6940_s3 + $0x448] sm:$0xff] %vm313_vm0, %v2820_v45  ;;  %v1940_v51 = vadd.f32 %v6587_v28, %v4061_v49  ;;  %v1934_v53 = vpop.f32.mrb[139].mxu0 }
 0x1f5   :  { %3252 = vst.msk [vmem:[%s6940_s3 + $0x8c8] sm:$0xff] %vm313_vm0, %v2964_v46  ;;  %v2660_v52 = vadd.f32 %v6587_v28, %v4277_v50  ;;  %v2654_v54 = vpop.f32.mrb[139].mxu1  ;;  %3107 = vst.msk [vmem:[%s6940_s3 + $0x440] sm:$0xff] %vm313_vm0, %v2819_v47  ;;  %v1935_v55 = vadd.f32 %v6587_v28, %v1934_v53 }
 0x1f6   :  { %3251 = vst.msk [vmem:[%s6940_s3 + $0x8c0] sm:$0xff] %vm313_vm0, %v2963_v48  ;;  %v2655_v56 = vadd.f32 %v6587_v28, %v2654_v54  ;;  %v2822_v57 = vmax.f32 %v1940_v51, 0.0 }
 0x1f7   :  { %v2966_v58 = vmax.f32 %v2660_v52, 0.0  ;;  %v2821_v59 = vmax.f32 %v1935_v55, 0.0  ;;  %v4064_v61 = vpop.f32.mrb[140].mxu0 }
 0x1f8   :  { %v2965_v60 = vmax.f32 %v2655_v56, 0.0  ;;  %v4280_v62 = vpop.f32.mrb[140].mxu1  ;;  %3110 = vst.msk [vmem:[%s6940_s3 + $0x458] sm:$0xff] %vm313_vm0, %v2822_v57  ;;  %v1950_v63 = vadd.f32 %v6587_v28, %v4064_v61  ;;  %v1944_v1 = vpop.f32.mrb[141].mxu0 }
 0x1f9   :  { %3254 = vst.msk [vmem:[%s6940_s3 + $0x8d8] sm:$0xff] %vm313_vm0, %v2966_v58  ;;  %v2670_v0 = vadd.f32 %v6587_v28, %v4280_v62  ;;  %v2664_v2 = vpop.f32.mrb[141].mxu1  ;;  %3109 = vst.msk [vmem:[%s6940_s3 + $0x450] sm:$0xff] %vm313_vm0, %v2821_v59  ;;  %v1945_v3 = vadd.f32 %v6587_v28, %v1944_v1 }
 0x1fa   :  { %3253 = vst.msk [vmem:[%s6940_s3 + $0x8d0] sm:$0xff] %vm313_vm0, %v2965_v60  ;;  %v2665_v4 = vadd.f32 %v6587_v28, %v2664_v2  ;;  %v2824_v5 = vmax.f32 %v1950_v63, 0.0 }
 0x1fb   :  { %v2968_v6 = vmax.f32 %v2670_v0, 0.0  ;;  %v2823_v7 = vmax.f32 %v1945_v3, 0.0  ;;  %v4067_v9 = vpop.f32.mrb[142].mxu0 }
 0x1fc   :  { %v2967_v8 = vmax.f32 %v2665_v4, 0.0  ;;  %v4283_v10 = vpop.f32.mrb[142].mxu1  ;;  %3112 = vst.msk [vmem:[%s6940_s3 + $0x468] sm:$0xff] %vm313_vm0, %v2824_v5  ;;  %v1960_v11 = vadd.f32 %v6587_v28, %v4067_v9  ;;  %v1954_v13 = vpop.f32.mrb[143].mxu0 }
 0x1fd   :  { %3256 = vst.msk [vmem:[%s6940_s3 + $0x8e8] sm:$0xff] %vm313_vm0, %v2968_v6  ;;  %v2680_v12 = vadd.f32 %v6587_v28, %v4283_v10  ;;  %v2674_v14 = vpop.f32.mrb[143].mxu1  ;;  %3111 = vst.msk [vmem:[%s6940_s3 + $0x460] sm:$0xff] %vm313_vm0, %v2823_v7  ;;  %v1955_v15 = vadd.f32 %v6587_v28, %v1954_v13 }
 0x1fe   :  { %3255 = vst.msk [vmem:[%s6940_s3 + $0x8e0] sm:$0xff] %vm313_vm0, %v2967_v8  ;;  %v2675_v16 = vadd.f32 %v6587_v28, %v2674_v14  ;;  %v2826_v17 = vmax.f32 %v1960_v11, 0.0 }
 0x1ff   :  { %v2970_v18 = vmax.f32 %v2680_v12, 0.0  ;;  %v2825_v19 = vmax.f32 %v1955_v15, 0.0 }
 0x200   :  { %v2969_v20 = vmax.f32 %v2675_v16, 0.0  ;;  %3114 = vst.msk [vmem:[%s6940_s3 + $0x478] sm:$0xff] %vm313_vm0, %v2826_v17 }
 0x201   :  { %3258 = vst.msk [vmem:[%s6940_s3 + $0x8f8] sm:$0xff] %vm313_vm0, %v2970_v18  ;;  %3113 = vst.msk [vmem:[%s6940_s3 + $0x470] sm:$0xff] %vm313_vm0, %v2825_v19 }
 0x202   :  { %3257 = vst.msk [vmem:[%s6940_s3 + $0x8f0] sm:$0xff] %vm313_vm0, %v2969_v20 }

// kernel: _conv_stack_features.5
= control target key start
LH: loop header
LB: loop body
LE: loop exit
PB: predicated region body
PF: predicated region fallthrough
CT: control target
= control target key end

     0   :  { %v1842_v0 = vmov 0.0|0.0   ;;  %vm273_vm0 = vcmask 261120   ;;  %s3238_s1 = inlined_call_operand.vmem [shape: f32[288,32], index: 1, kind: input, shape index: {}]   ;;  %s3239_s0 = inlined_call_operand.vmem [shape: f32[576,288], index: 0, kind: input, shape index: {}]   ;;  %s3240_s2 = inlined_call_operand.vmem [shape: f32[1,32], index: 2, kind: input, shape index: {}]   ;;  %s3241_s3 = inlined_call_operand.vmem [shape: f32[576,32], index: 3, kind: output, shape index: {}]  }
   0x1   :  { %1753 = vmatprep.subr.bf16.mxu0 %v1842_v0  ;;  %1809 = vmatprep.subr.bf16.mxu1 %v1842_v0  ;;  %v230_v1 = vld [vmem:[%s3238_s1] sm:$0xff]  ;;  %v231_v2 = vld [vmem:[%s3238_s1 + $0x8] sm:$0xff]  ;;  %v232_v3 = vld [vmem:[%s3238_s1 + $0x10] sm:$0xff] }
   0x2   :  { %v1754_v4 = vpack.c.bf16 %v231_v2, %v230_v1  ;;  %v233_v5 = vld [vmem:[%s3238_s1 + $0x18] sm:$0xff]  ;;  %v234_v7 = vld [vmem:[%s3238_s1 + $0x20] sm:$0xff]  ;;  %v235_v8 = vld [vmem:[%s3238_s1 + $0x28] sm:$0xff] }
   0x3   :  { %v1757_v6 = vpack.c.bf16 %v233_v5, %v232_v3  ;;  %v1760_v9 = vpack.c.bf16 %v235_v8, %v234_v7  ;;  %v236_v10 = vld [vmem:[%s3238_s1 + $0x30] sm:$0xff]  ;;  %v237_v11 = vld [vmem:[%s3238_s1 + $0x38] sm:$0xff]  ;;  %v15_v12 = vld [vmem:[%s3239_s0 + $0x8] sm:$0xff] }
   0x4   :  { %1755 = vmatpush1.bf16.msra.mxu0 %v1754_v4  ;;  %1825 = vmatpush1.bf16.msra.mxu1 %v1754_v4  ;;  %v1763_v13 = vpack.c.bf16 %v237_v11, %v236_v10  ;;  %v177_v14 = vld [vmem:[%s3239_s0 + $0x518] sm:$0xff]  ;;  %v238_v15 = vld [vmem:[%s3238_s1 + $0x40] sm:$0xff]  ;;  %v239_v16 = vld [vmem:[%s3238_s1 + $0x48] sm:$0xff] }
   0x5   :  { %1756 = vmatprep.subr.bf16.mxu0 %v1842_v0  ;;  %1810 = vmatprep.subr.bf16.mxu1 %v1842_v0  ;;  %v1766_v17 = vpack.c.bf16 %v239_v16, %v238_v15  ;;  %v240_v18 = vld [vmem:[%s3238_s1 + $0x50] sm:$0xff]  ;;  %v241_v19 = vld [vmem:[%s3238_s1 + $0x58] sm:$0xff]  ;;  %v242_v21 = vld [vmem:[%s3238_s1 + $0x60] sm:$0xff] }
   0x6   :  { %554 = vmatprep.mubr.f32.mxu0 %v15_v12  ;;  %824 = vmatprep.mubr.f32.mxu1 %v177_v14  ;;  %v1769_v20 = vpack.c.bf16 %v241_v19, %v240_v18  ;;  %v243_v22 = vld [vmem:[%s3238_s1 + $0x68] sm:$0xff]  ;;  %v244_v24 = vld [vmem:[%s3238_s1 + $0x70] sm:$0xff]  ;;  %v245_v25 = vld [vmem:[%s3238_s1 + $0x78] sm:$0xff] }
   0x7   :  { %v1772_v23 = vpack.c.bf16 %v243_v22, %v242_v21  ;;  %v1775_v26 = vpack.c.bf16 %v245_v25, %v244_v24  ;;  %v246_v27 = vld [vmem:[%s3238_s1 + $0x80] sm:$0xff]  ;;  %v247_v28 = vld [vmem:[%s3238_s1 + $0x88] sm:$0xff]  ;;  %v248_v30 = vld [vmem:[%s3238_s1 + $0x90] sm:$0xff] }
   0x8   :  { %1758 = vmatpush1.bf16.msra.mxu0 %v1757_v6  ;;  %1826 = vmatpush1.bf16.msra.mxu1 %v1757_v6  ;;  %v1778_v29 = vpack.c.bf16 %v247_v28, %v246_v27  ;;  %v249_v31 = vld [vmem:[%s3238_s1 + $0x98] sm:$0xff]  ;;  %v250_v33 = vld [vmem:[%s3238_s1 + $0xa0] sm:$0xff]  ;;  %v251_v34 = vld [vmem:[%s3238_s1 + $0xa8] sm:$0xff] }
   0x9   :  { %1759 = vmatprep.subr.bf16.mxu0 %v1842_v0  ;;  %1811 = vmatprep.subr.bf16.mxu1 %v1842_v0  ;;  %v1781_v32 = vpack.c.bf16 %v249_v31, %v248_v30  ;;  %v1784_v35 = vpack.c.bf16 %v251_v34, %v250_v33  ;;  %v252_v36 = vld [vmem:[%s3238_s1 + $0xb0] sm:$0xff]  ;;  %v253_v37 = vld [vmem:[%s3238_s1 + $0xb8] sm:$0xff]  ;;  %v254_v39 = vld [vmem:[%s3238_s1 + $0xc0] sm:$0xff] }
   0xa   :  { %v1787_v38 = vpack.c.bf16 %v253_v37, %v252_v36  ;;  %v255_v40 = vld [vmem:[%s3238_s1 + $0xc8] sm:$0xff]  ;;  %v256_v42 = vld [vmem:[%s3238_s1 + $0xd0] sm:$0xff]  ;;  %v257_v43 = vld [vmem:[%s3238_s1 + $0xd8] sm:$0xff] }
   0xb   :  { %v1790_v41 = vpack.c.bf16 %v255_v40, %v254_v39  ;;  %v1793_v44 = vpack.c.bf16 %v257_v43, %v256_v42  ;;  %v258_v45 = vld [vmem:[%s3238_s1 + $0xe0] sm:$0xff]  ;;  %v259_v46 = vld [vmem:[%s3238_s1 + $0xe8] sm:$0xff]  ;;  %v260_v48 = vld [vmem:[%s3238_s1 + $0xf0] sm:$0xff] }
   0xc   :  { %1761 = vmatpush1.bf16.msra.mxu0 %v1760_v9  ;;  %1827 = vmatpush1.bf16.msra.mxu1 %v1760_v9  ;;  %v1796_v47 = vpack.c.bf16 %v259_v46, %v258_v45  ;;  %v261_v49 = vld [vmem:[%s3238_s1 + $0xf8] sm:$0xff]  ;;  %v262_v50 = vld [vmem:[%s3238_s1 + $0x100] sm:$0xff]  ;;  %v263_v51 = vld [vmem:[%s3238_s1 + $0x108] sm:$0xff] }
   0xd   :  { %1762 = vmatprep.subr.bf16.mxu0 %v1842_v0  ;;  %1812 = vmatprep.subr.bf16.mxu1 %v1842_v0  ;;  %v1799_v52 = vpack.c.bf16 %v261_v49, %v260_v48  ;;  %v1801_v53 = vpack.c.bf16 %v263_v51, %v262_v50  ;;  %v264_v54 = vld [vmem:[%s3238_s1 + $0x110] sm:$0xff]  ;;  %v265_v55 = vld [vmem:[%s3238_s1 + $0x118] sm:$0xff]  ;;  %v14_v56 = vld [vmem:[%s3239_s0] sm:$0xff] }
   0xe   :  { %v176_v57 = vld [vmem:[%s3239_s0 + $0x510] sm:$0xff]  ;;  %v18_v58 = vld [vmem:[%s3239_s0 + $0x20] sm:$0xff]  ;;  %v1805_v59 = vpack.c.bf16 %v265_v55, %v264_v54  ;;  %v17_v61 = vld [vmem:[%s3239_s0 + $0x18] sm:$0xff] }
   0xf   :  { %v180_v60 = vld [vmem:[%s3239_s0 + $0x530] sm:$0xff]  ;;  %v179_v62 = vld [vmem:[%s3239_s0 + $0x528] sm:$0xff]  ;;  %v21_v63 = vld [vmem:[%s3239_s0 + $0x38] sm:$0xff] }
  0x10   :  { %1764 = vmatpush1.bf16.msra.mxu0 %v1763_v13  ;;  %1828 = vmatpush1.bf16.msra.mxu1 %v1763_v13  ;;  %v20_v1 = vld [vmem:[%s3239_s0 + $0x30] sm:$0xff]  ;;  %v182_v2 = vld [vmem:[%s3239_s0 + $0x540] sm:$0xff]  ;;  %v23_v5 = vld [vmem:[%s3239_s0 + $0x48] sm:$0xff] }
  0x11   :  { %1765 = vmatprep.subr.bf16.mxu0 %v1842_v0  ;;  %1813 = vmatprep.subr.bf16.mxu1 %v1842_v0  ;;  %v24_v3 = vld [vmem:[%s3239_s0 + $0x50] sm:$0xff]  ;;  %v186_v4 = vld [vmem:[%s3239_s0 + $0x560] sm:$0xff]  ;;  %v185_v6 = vld [vmem:[%s3239_s0 + $0x558] sm:$0xff] }
  0x12   :  { %v27_v7 = vld [vmem:[%s3239_s0 + $0x68] sm:$0xff]  ;;  %v189_v8 = vld [vmem:[%s3239_s0 + $0x578] sm:$0xff]  ;;  %v26_v9 = vld [vmem:[%s3239_s0 + $0x60] sm:$0xff] }
  0x13   :  { %v188_v10 = vld [vmem:[%s3239_s0 + $0x570] sm:$0xff]  ;;  %v30_v11 = vld [vmem:[%s3239_s0 + $0x80] sm:$0xff]  ;;  %v29_v13 = vld [vmem:[%s3239_s0 + $0x78] sm:$0xff] }
  0x14   :  { %1767 = vmatpush1.bf16.msra.mxu0 %v1766_v17  ;;  %1829 = vmatpush1.bf16.msra.mxu1 %v1766_v17  ;;  %v192_v12 = vld [vmem:[%s3239_s0 + $0x590] sm:$0xff]  ;;  %v191_v14 = vld [vmem:[%s3239_s0 + $0x588] sm:$0xff]  ;;  %v33_v15 = vld [vmem:[%s3239_s0 + $0x98] sm:$0xff] }
  0x15   :  { %1768 = vmatprep.subr.bf16.mxu0 %v1842_v0  ;;  %1814 = vmatprep.subr.bf16.mxu1 %v1842_v0  ;;  %v195_v16 = vld [vmem:[%s3239_s0 + $0x5a8] sm:$0xff]  ;;  %v32_v17 = vld [vmem:[%s3239_s0 + $0x90] sm:$0xff]  ;;  %v194_v18 = vld [vmem:[%s3239_s0 + $0x5a0] sm:$0xff] }
  0x16   :  { %v36_v19 = vld [vmem:[%s3239_s0 + $0xb0] sm:$0xff]  ;;  %v35_v21 = vld [vmem:[%s3239_s0 + $0xa8] sm:$0xff]  ;;  %v197_v22 = vld [vmem:[%s3239_s0 + $0x5b8] sm:$0xff] }
  0x17   :  { %v201_v24 = vld [vmem:[%s3239_s0 + $0x5d8] sm:$0xff]  ;;  %v38_v25 = vld [vmem:[%s3239_s0 + $0xc0] sm:$0xff]  ;;  %v204_v28 = vld [vmem:[%s3239_s0 + $0x5f0] sm:$0xff] }
  0x18   :  { %1770 = vmatpush1.bf16.msra.mxu0 %v1769_v20  ;;  %1830 = vmatpush1.bf16.msra.mxu1 %v1769_v20  ;;  %v198_v20 = vld [vmem:[%s3239_s0 + $0x5c0] sm:$0xff]  ;;  %v203_v30 = vld [vmem:[%s3239_s0 + $0x5e8] sm:$0xff]  ;;  %v45_v31 = vld [vmem:[%s3239_s0 + $0xf8] sm:$0xff] }
  0x19   :  { %1771 = vmatprep.subr.bf16.mxu0 %v1842_v0  ;;  %1815 = vmatprep.subr.bf16.mxu1 %v1842_v0  ;;  %v42_v27 = vld [vmem:[%s3239_s0 + $0xe0] sm:$0xff]  ;;  %v44_v33 = vld [vmem:[%s3239_s0 + $0xf0] sm:$0xff]  ;;  %v47_v37 = vld [vmem:[%s3239_s0 + $0x108] sm:$0xff] }
  0x1a   :  { %v206_v34 = vld [vmem:[%s3239_s0 + $0x600] sm:$0xff]  ;;  %v51_v39 = vld [vmem:[%s3239_s0 + $0x128] sm:$0xff]  ;;  %v213_v40 = vld [vmem:[%s3239_s0 + $0x638] sm:$0xff] }
  0x1b   :  { %v210_v36 = vld [vmem:[%s3239_s0 + $0x620] sm:$0xff]  ;;  %v212_v42 = vld [vmem:[%s3239_s0 + $0x630] sm:$0xff]  ;;  %v53_v45 = vld [vmem:[%s3239_s0 + $0x138] sm:$0xff] }
  0x1c   :  { %1773 = vmatpush1.bf16.msra.mxu0 %v1772_v23  ;;  %1831 = vmatpush1.bf16.msra.mxu1 %v1772_v23  ;;  %v39_v23 = vld [vmem:[%s3239_s0 + $0xc8] sm:$0xff]  ;;  %v54_v43 = vld [vmem:[%s3239_s0 + $0x140] sm:$0xff]  ;;  %v56_v49 = vld [vmem:[%s3239_s0 + $0x150] sm:$0xff] }
  0x1d   :  { %1774 = vmatprep.subr.bf16.mxu0 %v1842_v0  ;;  %1816 = vmatprep.subr.bf16.mxu1 %v1842_v0  ;;  %v215_v46 = vld [vmem:[%s3239_s0 + $0x648] sm:$0xff]  ;;  %v218_v50 = vld [vmem:[%s3239_s0 + $0x660] sm:$0xff]  ;;  %v60_v51 = vld [vmem:[%s3239_s0 + $0x170] sm:$0xff] }
  0x1e   :  { %v219_v48 = vld [vmem:[%s3239_s0 + $0x668] sm:$0xff]  ;;  %v221_v54 = vld [vmem:[%s3239_s0 + $0x678] sm:$0xff] }
  0x1f   :  { %v63_v55 = vld [vmem:[%s3239_s0 + $0x188] sm:$0xff] }
  0x20   :  { %1776 = vmatpush1.bf16.msra.mxu0 %v1775_v26  ;;  %1832 = vmatpush1.bf16.msra.mxu1 %v1775_v26  ;;  %v200_v26 = vld [vmem:[%s3239_s0 + $0x5d0] sm:$0xff] }
  0x21   :  { %1777 = vmatprep.subr.bf16.mxu0 %v1842_v0  ;;  %1817 = vmatprep.subr.bf16.mxu1 %v1842_v0 }
  0x24   :  { %1779 = vmatpush1.bf16.msra.mxu0 %v1778_v29  ;;  %1833 = vmatpush1.bf16.msra.mxu1 %v1778_v29  ;;  %v41_v29 = vld [vmem:[%s3239_s0 + $0xd8] sm:$0xff] }
  0x25   :  { %1780 = vmatprep.subr.bf16.mxu0 %v1842_v0  ;;  %1818 = vmatprep.subr.bf16.mxu1 %v1842_v0 }
  0x28   :  { %1782 = vmatpush1.bf16.msra.mxu0 %v1781_v32  ;;  %1834 = vmatpush1.bf16.msra.mxu1 %v1781_v32  ;;  %v207_v32 = vld [vmem:[%s3239_s0 + $0x608] sm:$0xff] }
  0x29   :  { %1783 = vmatprep.subr.bf16.mxu0 %v1842_v0  ;;  %1819 = vmatprep.subr.bf16.mxu1 %v1842_v0 }
  0x2c   :  { %1785 = vmatpush1.bf16.msra.mxu0 %v1784_v35  ;;  %1835 = vmatpush1.bf16.msra.mxu1 %v1784_v35  ;;  %v48_v35 = vld [vmem:[%s3239_s0 + $0x110] sm:$0xff] }
  0x2d   :  { %1786 = vmatprep.subr.bf16.mxu0 %v1842_v0  ;;  %1820 = vmatprep.subr.bf16.mxu1 %v1842_v0 }
  0x30   :  { %1788 = vmatpush1.bf16.msra.mxu0 %v1787_v38  ;;  %1836 = vmatpush1.bf16.msra.mxu1 %v1787_v38  ;;  %v209_v38 = vld [vmem:[%s3239_s0 + $0x618] sm:$0xff] }
  0x31   :  { %1789 = vmatprep.subr.bf16.mxu0 %v1842_v0  ;;  %1821 = vmatprep.subr.bf16.mxu1 %v1842_v0 }
  0x34   :  { %1791 = vmatpush1.bf16.msra.mxu0 %v1790_v41  ;;  %1837 = vmatpush1.bf16.msra.mxu1 %v1790_v41  ;;  %v50_v41 = vld [vmem:[%s3239_s0 + $0x120] sm:$0xff] }
  0x35   :  { %1792 = vmatprep.subr.bf16.mxu0 %v1842_v0  ;;  %1822 = vmatprep.subr.bf16.mxu1 %v1842_v0 }
  0x38   :  { %1794 = vmatpush1.bf16.msra.mxu0 %v1793_v44  ;;  %1838 = vmatpush1.bf16.msra.mxu1 %v1793_v44  ;;  %v216_v44 = vld [vmem:[%s3239_s0 + $0x650] sm:$0xff] }
  0x39   :  { %1795 = vmatprep.subr.bf16.mxu0 %v1842_v0  ;;  %1823 = vmatprep.subr.bf16.mxu1 %v1842_v0 }
  0x3c   :  { %1797 = vmatpush1.bf16.msra.mxu0 %v1796_v47  ;;  %1839 = vmatpush1.bf16.msra.mxu1 %v1796_v47  ;;  %v57_v47 = vld [vmem:[%s3239_s0 + $0x158] sm:$0xff] }
  0x3d   :  { %1798 = vmatprep.subr.bf16.mxu0 %v1842_v0  ;;  %1824 = vmatprep.subr.bf16.mxu1 %v1842_v0  ;;  %v183_v0 = vld [vmem:[%s3239_s0 + $0x548] sm:$0xff] }
  0x40   :  { %1800 = vmatpush1.bf16.msra.mxu0 %v1799_v52  ;;  %1840 = vmatpush1.bf16.msra.mxu1 %v1799_v52  ;;  %v222_v52 = vld [vmem:[%s3239_s0 + $0x680] sm:$0xff] }
  0x41   :  { %1802 = vmatprep.subr.bf16.mxu1 %v1801_v53 }
  0x43   :  { %555 = vmatmul.mubr.f32.vlgmr.msra.gmra.mrb[0].mxu0 %v14_v56  ;;  %825 = vmatmul.mubr.f32.vlgmr.msra.gmra.mrb[0].mxu1 %v176_v57  ;;  %v225_v56 = vld [vmem:[%s3239_s0 + $0x698] sm:$0xff]  ;;  %v62_v57 = vld [vmem:[%s3239_s0 + $0x180] sm:$0xff] }
  0x44   :  { %1804 = vmatpush3.bf16.msra.mxu1 %v1801_v53  ;;  %559 = vmatprep.mubr.f32.mxu0 %v18_v58  ;;  %v59_v53 = vld [vmem:[%s3239_s0 + $0x168] sm:$0xff]  ;;  %v224_v58 = vld [vmem:[%s3239_s0 + $0x690] sm:$0xff] }
  0x45   :  { %829 = vmatprep.mubr.f32.mxu1 %v180_v60  ;;  %1806 = vmatprep.subr.bf16.mxu1 %v1805_v59  ;;  %v228_v60 = vld [vmem:[%s3239_s0 + $0x6b0] sm:$0xff] }
  0x47   :  { %560 = vmatmul.mubr.f32.gmra.mrb[2].mxu0 %v17_v61  ;;  %830 = vmatmul.mubr.f32.gmra.mrb[2].mxu1 %v179_v62  ;;  %v65_v61 = vld [vmem:[%s3239_s0 + $0x198] sm:$0xff]  ;;  %v227_v62 = vld [vmem:[%s3239_s0 + $0x6a8] sm:$0xff] }
  0x48   :  { %564 = vmatprep.mubr.f32.mxu0 %v21_v63  ;;  %834 = vmatprep.mubr.f32.mxu1 %v183_v0  ;;  %v69_v63 = vld [vmem:[%s3239_s0 + $0x1b8] sm:$0xff]  ;;  %v16_v0 = vld [vmem:[%s3239_s0 + $0x10] sm:$0xff] }
  0x49   :  { %1808 = vmatpush3.bf16.msra.mxu1 %v1805_v59  ;;  %v66_v59 = vld [vmem:[%s3239_s0 + $0x1a0] sm:$0xff] }
  0x4b   :  { %565 = vmatmul.mubr.f32.gmra.mrb[4].mxu0 %v20_v1  ;;  %835 = vmatmul.mubr.f32.gmra.mrb[4].mxu1 %v182_v2  ;;  %v68_v1 = vld [vmem:[%s3239_s0 + $0x1b0] sm:$0xff]  ;;  %v19_v2 = vld [vmem:[%s3239_s0 + $0x28] sm:$0xff] }
  0x4c   :  { %569 = vmatprep.mubr.f32.mxu0 %v24_v3  ;;  %839 = vmatprep.mubr.f32.mxu1 %v186_v4  ;;  %v72_v3 = vld [vmem:[%s3239_s0 + $0x1d0] sm:$0xff]  ;;  %v22_v4 = vld [vmem:[%s3239_s0 + $0x40] sm:$0xff] }
  0x4f   :  { %570 = vmatmul.mubr.f32.gmra.mrb[6].mxu0 %v23_v5  ;;  %840 = vmatmul.mubr.f32.gmra.mrb[6].mxu1 %v185_v6  ;;  %v71_v5 = vld [vmem:[%s3239_s0 + $0x1c8] sm:$0xff]  ;;  %v25_v6 = vld [vmem:[%s3239_s0 + $0x58] sm:$0xff] }
  0x50   :  { %574 = vmatprep.mubr.f32.mxu0 %v27_v7  ;;  %844 = vmatprep.mubr.f32.mxu1 %v189_v8  ;;  %v75_v7 = vld [vmem:[%s3239_s0 + $0x1e8] sm:$0xff]  ;;  %v28_v8 = vld [vmem:[%s3239_s0 + $0x70] sm:$0xff] }
  0x53   :  { %575 = vmatmul.mubr.f32.gmra.mrb[8].mxu0 %v26_v9  ;;  %845 = vmatmul.mubr.f32.gmra.mrb[8].mxu1 %v188_v10  ;;  %v74_v9 = vld [vmem:[%s3239_s0 + $0x1e0] sm:$0xff]  ;;  %v31_v10 = vld [vmem:[%s3239_s0 + $0x88] sm:$0xff] }
  0x54   :  { %579 = vmatprep.mubr.f32.mxu0 %v30_v11  ;;  %849 = vmatprep.mubr.f32.mxu1 %v192_v12  ;;  %v78_v11 = vld [vmem:[%s3239_s0 + $0x200] sm:$0xff] }
  0x55   :  { %v34_v12 = vld [vmem:[%s3239_s0 + $0xa0] sm:$0xff] }
  0x57   :  { %580 = vmatmul.mubr.f32.gmra.mrb[10].mxu0 %v29_v13  ;;  %850 = vmatmul.mubr.f32.gmra.mrb[10].mxu1 %v191_v14  ;;  %v77_v13 = vld [vmem:[%s3239_s0 + $0x1f8] sm:$0xff] }
  0x58   :  { %584 = vmatprep.mubr.f32.mxu0 %v33_v15  ;;  %854 = vmatprep.mubr.f32.mxu1 %v195_v16  ;;  %v37_v14 = vld [vmem:[%s3239_s0 + $0xb8] sm:$0xff]  ;;  %v40_v16 = vld [vmem:[%s3239_s0 + $0xd0] sm:$0xff] }
  0x59   :  { %v81_v15 = vld [vmem:[%s3239_s0 + $0x218] sm:$0xff] }
  0x5b   :  { %585 = vmatmul.mubr.f32.gmra.mrb[12].mxu0 %v32_v17  ;;  %855 = vmatmul.mubr.f32.gmra.mrb[12].mxu1 %v194_v18  ;;  %v80_v17 = vld [vmem:[%s3239_s0 + $0x210] sm:$0xff]  ;;  %v43_v18 = vld [vmem:[%s3239_s0 + $0xe8] sm:$0xff] }
  0x5c   :  { %589 = vmatprep.mubr.f32.mxu0 %v36_v19  ;;  %859 = vmatprep.mubr.f32.mxu1 %v198_v20  ;;  %v84_v19 = vld [vmem:[%s3239_s0 + $0x230] sm:$0xff]  ;;  %v46_v20 = vld [vmem:[%s3239_s0 + $0x100] sm:$0xff] }
  0x5f   :  { %590 = vmatmul.mubr.f32.gmra.mrb[14].mxu0 %v35_v21  ;;  %860 = vmatmul.mubr.f32.gmra.mrb[14].mxu1 %v197_v22  ;;  %v83_v21 = vld [vmem:[%s3239_s0 + $0x228] sm:$0xff]  ;;  %v49_v22 = vld [vmem:[%s3239_s0 + $0x118] sm:$0xff] }
  0x60   :  { %594 = vmatprep.mubr.f32.mxu0 %v39_v23  ;;  %864 = vmatprep.mubr.f32.mxu1 %v201_v24  ;;  %v87_v23 = vld [vmem:[%s3239_s0 + $0x248] sm:$0xff]  ;;  %v52_v24 = vld [vmem:[%s3239_s0 + $0x130] sm:$0xff] }
  0x63   :  { %595 = vmatmul.mubr.f32.gmra.mrb[16].mxu0 %v38_v25  ;;  %865 = vmatmul.mubr.f32.gmra.mrb[16].mxu1 %v200_v26  ;;  %v86_v25 = vld [vmem:[%s3239_s0 + $0x240] sm:$0xff]  ;;  %v55_v26 = vld [vmem:[%s3239_s0 + $0x148] sm:$0xff] }
  0x64   :  { %599 = vmatprep.mubr.f32.mxu0 %v42_v27  ;;  %869 = vmatprep.mubr.f32.mxu1 %v204_v28  ;;  %v90_v27 = vld [vmem:[%s3239_s0 + $0x260] sm:$0xff] }
  0x65   :  { %v58_v28 = vld [vmem:[%s3239_s0 + $0x160] sm:$0xff] }
  0x67   :  { %600 = vmatmul.mubr.f32.gmra.mrb[18].mxu0 %v41_v29  ;;  %870 = vmatmul.mubr.f32.gmra.mrb[18].mxu1 %v203_v30  ;;  %v89_v29 = vld [vmem:[%s3239_s0 + $0x258] sm:$0xff] }
  0x68   :  { %604 = vmatprep.mubr.f32.mxu0 %v45_v31  ;;  %874 = vmatprep.mubr.f32.mxu1 %v207_v32  ;;  %v61_v30 = vld [vmem:[%s3239_s0 + $0x178] sm:$0xff]  ;;  %v64_v32 = vld [vmem:[%s3239_s0 + $0x190] sm:$0xff] }
  0x69   :  { %v93_v31 = vld [vmem:[%s3239_s0 + $0x278] sm:$0xff] }
  0x6b   :  { %605 = vmatmul.mubr.f32.gmra.mrb[20].mxu0 %v44_v33  ;;  %875 = vmatmul.mubr.f32.gmra.mrb[20].mxu1 %v206_v34  ;;  %v92_v33 = vld [vmem:[%s3239_s0 + $0x270] sm:$0xff]  ;;  %v67_v34 = vld [vmem:[%s3239_s0 + $0x1a8] sm:$0xff] }
  0x6c   :  { %609 = vmatprep.mubr.f32.mxu0 %v48_v35  ;;  %879 = vmatprep.mubr.f32.mxu1 %v210_v36  ;;  %v96_v35 = vld [vmem:[%s3239_s0 + $0x290] sm:$0xff]  ;;  %v70_v36 = vld [vmem:[%s3239_s0 + $0x1c0] sm:$0xff] }
  0x6f   :  { %610 = vmatmul.mubr.f32.gmra.mrb[22].mxu0 %v47_v37  ;;  %880 = vmatmul.mubr.f32.gmra.mrb[22].mxu1 %v209_v38  ;;  %v95_v37 = vld [vmem:[%s3239_s0 + $0x288] sm:$0xff]  ;;  %v73_v38 = vld [vmem:[%s3239_s0 + $0x1d8] sm:$0xff] }
  0x70   :  { %614 = vmatprep.mubr.f32.mxu0 %v51_v39  ;;  %884 = vmatprep.mubr.f32.mxu1 %v213_v40  ;;  %v99_v39 = vld [vmem:[%s3239_s0 + $0x2a8] sm:$0xff]  ;;  %v76_v40 = vld [vmem:[%s3239_s0 + $0x1f0] sm:$0xff] }
  0x73   :  { %615 = vmatmul.mubr.f32.gmra.mrb[24].mxu0 %v50_v41  ;;  %885 = vmatmul.mubr.f32.gmra.mrb[24].mxu1 %v212_v42  ;;  %v98_v41 = vld [vmem:[%s3239_s0 + $0x2a0] sm:$0xff]  ;;  %v79_v42 = vld [vmem:[%s3239_s0 + $0x208] sm:$0xff] }
  0x74   :  { %619 = vmatprep.mubr.f32.mxu0 %v54_v43  ;;  %889 = vmatprep.mubr.f32.mxu1 %v216_v44  ;;  %v102_v43 = vld [vmem:[%s3239_s0 + $0x2c0] sm:$0xff] }
  0x75   :  { %v82_v44 = vld [vmem:[%s3239_s0 + $0x220] sm:$0xff] }
  0x77   :  { %620 = vmatmul.mubr.f32.gmra.mrb[26].mxu0 %v53_v45  ;;  %890 = vmatmul.mubr.f32.gmra.mrb[26].mxu1 %v215_v46  ;;  %v101_v45 = vld [vmem:[%s3239_s0 + $0x2b8] sm:$0xff] }
  0x78   :  { %624 = vmatprep.mubr.f32.mxu0 %v57_v47  ;;  %894 = vmatprep.mubr.f32.mxu1 %v219_v48  ;;  %v85_v46 = vld [vmem:[%s3239_s0 + $0x238] sm:$0xff]  ;;  %v88_v48 = vld [vmem:[%s3239_s0 + $0x250] sm:$0xff] }
  0x79   :  { %v105_v47 = vld [vmem:[%s3239_s0 + $0x2d8] sm:$0xff] }
  0x7b   :  { %625 = vmatmul.mubr.f32.gmra.mrb[28].mxu0 %v56_v49  ;;  %895 = vmatmul.mubr.f32.gmra.mrb[28].mxu1 %v218_v50  ;;  %v104_v49 = vld [vmem:[%s3239_s0 + $0x2d0] sm:$0xff]  ;;  %v91_v50 = vld [vmem:[%s3239_s0 + $0x268] sm:$0xff] }
  0x7c   :  { %629 = vmatprep.mubr.f32.mxu0 %v60_v51  ;;  %899 = vmatprep.mubr.f32.mxu1 %v222_v52  ;;  %v108_v51 = vld [vmem:[%s3239_s0 + $0x2f0] sm:$0xff]  ;;  %v94_v52 = vld [vmem:[%s3239_s0 + $0x280] sm:$0xff] }
  0x7f   :  { %630 = vmatmul.mubr.f32.gmra.mrb[30].mxu0 %v59_v53  ;;  %900 = vmatmul.mubr.f32.gmra.mrb[30].mxu1 %v221_v54  ;;  %v107_v53 = vld [vmem:[%s3239_s0 + $0x2e8] sm:$0xff]  ;;  %v97_v54 = vld [vmem:[%s3239_s0 + $0x298] sm:$0xff] }
  0x80   :  { %634 = vmatprep.mubr.f32.mxu0 %v63_v55  ;;  %904 = vmatprep.mubr.f32.mxu1 %v225_v56  ;;  %v111_v55 = vld [vmem:[%s3239_s0 + $0x308] sm:$0xff]  ;;  %v100_v56 = vld [vmem:[%s3239_s0 + $0x2b0] sm:$0xff] }
  0x83   :  { %635 = vmatmul.mubr.f32.gmra.mrb[32].mxu0 %v62_v57  ;;  %905 = vmatmul.mubr.f32.gmra.mrb[32].mxu1 %v224_v58  ;;  %v110_v57 = vld [vmem:[%s3239_s0 + $0x300] sm:$0xff]  ;;  %v103_v58 = vld [vmem:[%s3239_s0 + $0x2c8] sm:$0xff] }
  0x84   :  { %639 = vmatprep.mubr.f32.mxu0 %v66_v59  ;;  %909 = vmatprep.mubr.f32.mxu1 %v228_v60  ;;  %v114_v59 = vld [vmem:[%s3239_s0 + $0x320] sm:$0xff] }
  0x85   :  { %v106_v60 = vld [vmem:[%s3239_s0 + $0x2e0] sm:$0xff] }
  0x87   :  { %640 = vmatmul.mubr.f32.gmra.mrb[34].mxu0 %v65_v61  ;;  %910 = vmatmul.mubr.f32.gmra.mrb[34].mxu1 %v227_v62  ;;  %v113_v61 = vld [vmem:[%s3239_s0 + $0x318] sm:$0xff] }
  0x88   :  { %644 = vmatprep.mubr.f32.mxu0 %v69_v63  ;;  %1645 = vmatprep.mubr.msk.f32.mxu1 %vm273_vm0, %v16_v0  ;;  %v109_v62 = vld [vmem:[%s3239_s0 + $0x2f8] sm:$0xff]  ;;  %v112_v0 = vld [vmem:[%s3239_s0 + $0x310] sm:$0xff] }
  0x89   :  { %v117_v63 = vld [vmem:[%s3239_s0 + $0x338] sm:$0xff] }
  0x8b   :  { %645 = vmatmul.mubr.f32.gmra.mrb[36].mxu0 %v68_v1  ;;  %1646 = vmatmul.mubr.msk.f32.vlgmr.msra.gmra.mrb[36].mxu1 %vm273_vm0, %v19_v2  ;;  %v116_v1 = vld [vmem:[%s3239_s0 + $0x330] sm:$0xff]  ;;  %v115_v2 = vld [vmem:[%s3239_s0 + $0x328] sm:$0xff] }
  0x8c   :  { %649 = vmatprep.mubr.f32.mxu0 %v72_v3  ;;  %1648 = vmatprep.mubr.msk.f32.mxu1 %vm273_vm0, %v22_v4  ;;  %v120_v3 = vld [vmem:[%s3239_s0 + $0x350] sm:$0xff]  ;;  %v118_v4 = vld [vmem:[%s3239_s0 + $0x340] sm:$0xff] }
  0x8f   :  { %650 = vmatmul.mubr.f32.gmra.mrb[38].mxu0 %v71_v5  ;;  %1649 = vmatmul.mubr.msk.f32.gmra.mrb[38].mxu1 %vm273_vm0, %v25_v6  ;;  %v119_v5 = vld [vmem:[%s3239_s0 + $0x348] sm:$0xff]  ;;  %v121_v6 = vld [vmem:[%s3239_s0 + $0x358] sm:$0xff] }
  0x90   :  { %654 = vmatprep.mubr.f32.mxu0 %v75_v7  ;;  %1651 = vmatprep.mubr.msk.f32.mxu1 %vm273_vm0, %v28_v8  ;;  %v123_v7 = vld [vmem:[%s3239_s0 + $0x368] sm:$0xff]  ;;  %v124_v8 = vld [vmem:[%s3239_s0 + $0x370] sm:$0xff] }
  0x93   :  { %655 = vmatmul.mubr.f32.gmra.mrb[40].mxu0 %v74_v9  ;;  %1652 = vmatmul.mubr.msk.f32.gmra.mrb[40].mxu1 %vm273_vm0, %v31_v10  ;;  %v122_v9 = vld [vmem:[%s3239_s0 + $0x360] sm:$0xff]  ;;  %v127_v10 = vld [vmem:[%s3239_s0 + $0x388] sm:$0xff] }
  0x94   :  { %659 = vmatprep.mubr.f32.mxu0 %v78_v11  ;;  %1654 = vmatprep.mubr.msk.f32.mxu1 %vm273_vm0, %v34_v12  ;;  %v126_v11 = vld [vmem:[%s3239_s0 + $0x380] sm:$0xff] }
  0x95   :  { %v130_v12 = vld [vmem:[%s3239_s0 + $0x3a0] sm:$0xff] }
  0x97   :  { %660 = vmatmul.mubr.f32.gmra.mrb[42].mxu0 %v77_v13  ;;  %1655 = vmatmul.mubr.msk.f32.gmra.mrb[42].mxu1 %vm273_vm0, %v37_v14  ;;  %v125_v13 = vld [vmem:[%s3239_s0 + $0x378] sm:$0xff] }
  0x98   :  { %664 = vmatprep.mubr.f32.mxu0 %v81_v15  ;;  %1657 = vmatprep.mubr.msk.f32.mxu1 %vm273_vm0, %v40_v16  ;;  %v133_v14 = vld [vmem:[%s3239_s0 + $0x3b8] sm:$0xff]  ;;  %v136_v16 = vld [vmem:[%s3239_s0 + $0x3d0] sm:$0xff] }
  0x99   :  { %v129_v15 = vld [vmem:[%s3239_s0 + $0x398] sm:$0xff] }
  0x9b   :  { %665 = vmatmul.mubr.f32.gmra.mrb[44].mxu0 %v80_v17  ;;  %1658 = vmatmul.mubr.msk.f32.gmra.mrb[44].mxu1 %vm273_vm0, %v43_v18  ;;  %v128_v17 = vld [vmem:[%s3239_s0 + $0x390] sm:$0xff]  ;;  %v139_v18 = vld [vmem:[%s3239_s0 + $0x3e8] sm:$0xff] }
  0x9c   :  { %669 = vmatprep.mubr.f32.mxu0 %v84_v19  ;;  %1660 = vmatprep.mubr.msk.f32.mxu1 %vm273_vm0, %v46_v20  ;;  %v132_v19 = vld [vmem:[%s3239_s0 + $0x3b0] sm:$0xff]  ;;  %v142_v20 = vld [vmem:[%s3239_s0 + $0x400] sm:$0xff] }
  0x9f   :  { %670 = vmatmul.mubr.f32.gmra.mrb[46].mxu0 %v83_v21  ;;  %1661 = vmatmul.mubr.msk.f32.gmra.mrb[46].mxu1 %vm273_vm0, %v49_v22  ;;  %v131_v21 = vld [vmem:[%s3239_s0 + $0x3a8] sm:$0xff]  ;;  %v145_v22 = vld [vmem:[%s3239_s0 + $0x418] sm:$0xff] }
  0xa0   :  { %674 = vmatprep.mubr.f32.mxu0 %v87_v23  ;;  %1663 = vmatprep.mubr.msk.f32.mxu1 %vm273_vm0, %v52_v24  ;;  %v135_v23 = vld [vmem:[%s3239_s0 + $0x3c8] sm:$0xff]  ;;  %v148_v24 = vld [vmem:[%s3239_s0 + $0x430] sm:$0xff] }
  0xa3   :  { %675 = vmatmul.mubr.f32.gmra.mrb[48].mxu0 %v86_v25  ;;  %1664 = vmatmul.mubr.msk.f32.gmra.mrb[48].mxu1 %vm273_vm0, %v55_v26  ;;  %v134_v25 = vld [vmem:[%s3239_s0 + $0x3c0] sm:$0xff]  ;;  %v151_v26 = vld [vmem:[%s3239_s0 + $0x448] sm:$0xff] }
  0xa4   :  { %679 = vmatprep.mubr.f32.mxu0 %v90_v27  ;;  %1666 = vmatprep.mubr.msk.f32.mxu1 %vm273_vm0, %v58_v28  ;;  %v138_v27 = vld [vmem:[%s3239_s0 + $0x3e0] sm:$0xff] }
  0xa5   :  { %v154_v28 = vld [vmem:[%s3239_s0 + $0x460] sm:$0xff] }
  0xa7   :  { %680 = vmatmul.mubr.f32.gmra.mrb[50].mxu0 %v89_v29  ;;  %1667 = vmatmul.mubr.msk.f32.gmra.mrb[50].mxu1 %vm273_vm0, %v61_v30  ;;  %v137_v29 = vld [vmem:[%s3239_s0 + $0x3d8] sm:$0xff] }
  0xa8   :  { %684 = vmatprep.mubr.f32.mxu0 %v93_v31  ;;  %1669 = vmatprep.mubr.msk.f32.mxu1 %vm273_vm0, %v64_v32  ;;  %v157_v30 = vld [vmem:[%s3239_s0 + $0x478] sm:$0xff]  ;;  %v160_v32 = vld [vmem:[%s3239_s0 + $0x490] sm:$0xff] }
  0xa9   :  { %v141_v31 = vld [vmem:[%s3239_s0 + $0x3f8] sm:$0xff] }
  0xab   :  { %685 = vmatmul.mubr.f32.gmra.mrb[52].mxu0 %v92_v33  ;;  %1670 = vmatmul.mubr.msk.f32.gmra.mrb[52].mxu1 %vm273_vm0, %v67_v34  ;;  %v140_v33 = vld [vmem:[%s3239_s0 + $0x3f0] sm:$0xff]  ;;  %v163_v34 = vld [vmem:[%s3239_s0 + $0x4a8] sm:$0xff] }
  0xac   :  { %689 = vmatprep.mubr.f32.mxu0 %v96_v35  ;;  %1672 = vmatprep.mubr.msk.f32.mxu1 %vm273_vm0, %v70_v36  ;;  %v144_v35 = vld [vmem:[%s3239_s0 + $0x410] sm:$0xff]  ;;  %v166_v36 = vld [vmem:[%s3239_s0 + $0x4c0] sm:$0xff] }
  0xaf   :  { %690 = vmatmul.mubr.f32.gmra.mrb[54].mxu0 %v95_v37  ;;  %1673 = vmatmul.mubr.msk.f32.gmra.mrb[54].mxu1 %vm273_vm0, %v73_v38  ;;  %v143_v37 = vld [vmem:[%s3239_s0 + $0x408] sm:$0xff]  ;;  %v169_v38 = vld [vmem:[%s3239_s0 + $0x4d8] sm:$0xff] }
  0xb0   :  { %694 = vmatprep.mubr.f32.mxu0 %v99_v39  ;;  %1675 = vmatprep.mubr.msk.f32.mxu1 %vm273_vm0, %v76_v40  ;;  %v147_v39 = vld [vmem:[%s3239_s0 + $0x428] sm:$0xff]  ;;  %v172_v40 = vld [vmem:[%s3239_s0 + $0x4f0] sm:$0xff] }
  0xb3   :  { %695 = vmatmul.mubr.f32.gmra.mrb[56].mxu0 %v98_v41  ;;  %1676 = vmatmul.mubr.msk.f32.gmra.mrb[56].mxu1 %vm273_vm0, %v79_v42  ;;  %v146_v41 = vld [vmem:[%s3239_s0 + $0x420] sm:$0xff]  ;;  %v175_v42 = vld [vmem:[%s3239_s0 + $0x508] sm:$0xff] }
  0xb4   :  { %699 = vmatprep.mubr.f32.mxu0 %v102_v43  ;;  %1678 = vmatprep.mubr.msk.f32.mxu1 %vm273_vm0, %v82_v44  ;;  %v150_v43 = vld [vmem:[%s3239_s0 + $0x440] sm:$0xff] }
  0xb5   :  { %v178_v44 = vld [vmem:[%s3239_s0 + $0x520] sm:$0xff] }
  0xb7   :  { %700 = vmatmul.mubr.f32.gmra.mrb[58].mxu0 %v101_v45  ;;  %1679 = vmatmul.mubr.msk.f32.gmra.mrb[58].mxu1 %vm273_vm0, %v85_v46  ;;  %v149_v45 = vld [vmem:[%s3239_s0 + $0x438] sm:$0xff] }
  0xb8   :  { %704 = vmatprep.mubr.f32.mxu0 %v105_v47  ;;  %1681 = vmatprep.mubr.msk.f32.mxu1 %vm273_vm0, %v88_v48  ;;  %v181_v46 = vld [vmem:[%s3239_s0 + $0x538] sm:$0xff]  ;;  %v184_v48 = vld [vmem:[%s3239_s0 + $0x550] sm:$0xff] }
  0xb9   :  { %v153_v47 = vld [vmem:[%s3239_s0 + $0x458] sm:$0xff] }
  0xbb   :  { %705 = vmatmul.mubr.f32.gmra.mrb[60].mxu0 %v104_v49  ;;  %1682 = vmatmul.mubr.msk.f32.gmra.mrb[60].mxu1 %vm273_vm0, %v91_v50  ;;  %v152_v49 = vld [vmem:[%s3239_s0 + $0x450] sm:$0xff]  ;;  %v187_v50 = vld [vmem:[%s3239_s0 + $0x568] sm:$0xff] }
  0xbc   :  { %709 = vmatprep.mubr.f32.mxu0 %v108_v51  ;;  %1684 = vmatprep.mubr.msk.f32.mxu1 %vm273_vm0, %v94_v52  ;;  %v156_v51 = vld [vmem:[%s3239_s0 + $0x470] sm:$0xff]  ;;  %v190_v52 = vld [vmem:[%s3239_s0 + $0x580] sm:$0xff] }
  0xbf   :  { %710 = vmatmul.mubr.f32.gmra.mrb[62].mxu0 %v107_v53  ;;  %1685 = vmatmul.mubr.msk.f32.gmra.mrb[62].mxu1 %vm273_vm0, %v97_v54  ;;  %v155_v53 = vld [vmem:[%s3239_s0 + $0x468] sm:$0xff]  ;;  %v193_v54 = vld [vmem:[%s3239_s0 + $0x598] sm:$0xff] }
  0xc0   :  { %714 = vmatprep.mubr.f32.mxu0 %v111_v55  ;;  %1687 = vmatprep.mubr.msk.f32.mxu1 %vm273_vm0, %v100_v56  ;;  %v159_v55 = vld [vmem:[%s3239_s0 + $0x488] sm:$0xff]  ;;  %v196_v56 = vld [vmem:[%s3239_s0 + $0x5b0] sm:$0xff] }
  0xc3   :  { %715 = vmatmul.mubr.f32.gmra.mrb[64].mxu0 %v110_v57  ;;  %1688 = vmatmul.mubr.msk.f32.gmra.mrb[64].mxu1 %vm273_vm0, %v103_v58  ;;  %v158_v57 = vld [vmem:[%s3239_s0 + $0x480] sm:$0xff]  ;;  %v199_v58 = vld [vmem:[%s3239_s0 + $0x5c8] sm:$0xff] }
  0xc4   :  { %719 = vmatprep.mubr.f32.mxu0 %v114_v59  ;;  %1690 = vmatprep.mubr.msk.f32.mxu1 %vm273_vm0, %v106_v60  ;;  %v162_v59 = vld [vmem:[%s3239_s0 + $0x4a0] sm:$0xff] }
  0xc5   :  { %v202_v60 = vld [vmem:[%s3239_s0 + $0x5e0] sm:$0xff] }
  0xc7   :  { %720 = vmatmul.mubr.f32.gmra.mrb[66].mxu0 %v113_v61  ;;  %1691 = vmatmul.mubr.msk.f32.gmra.mrb[66].mxu1 %vm273_vm0, %v109_v62  ;;  %v161_v61 = vld [vmem:[%s3239_s0 + $0x498] sm:$0xff] }
  0xc8   :  { %724 = vmatprep.mubr.f32.mxu0 %v117_v63  ;;  %1693 = vmatprep.mubr.msk.f32.mxu1 %vm273_vm0, %v112_v0  ;;  %v205_v62 = vld [vmem:[%s3239_s0 + $0x5f8] sm:$0xff]  ;;  %v208_v0 = vld [vmem:[%s3239_s0 + $0x610] sm:$0xff] }
  0xc9   :  { %v165_v63 = vld [vmem:[%s3239_s0 + $0x4b8] sm:$0xff] }
  0xcb   :  { %725 = vmatmul.mubr.f32.gmra.mrb[68].mxu0 %v116_v1  ;;  %1694 = vmatmul.mubr.msk.f32.gmra.mrb[68].mxu1 %vm273_vm0, %v115_v2  ;;  %v164_v1 = vld [vmem:[%s3239_s0 + $0x4b0] sm:$0xff]  ;;  %v211_v2 = vld [vmem:[%s3239_s0 + $0x628] sm:$0xff] }
  0xcc   :  { %729 = vmatprep.mubr.f32.mxu0 %v120_v3  ;;  %1696 = vmatprep.mubr.msk.f32.mxu1 %vm273_vm0, %v118_v4  ;;  %v168_v3 = vld [vmem:[%s3239_s0 + $0x4d0] sm:$0xff]  ;;  %v214_v4 = vld [vmem:[%s3239_s0 + $0x640] sm:$0xff] }
  0xcf   :  { %730 = vmatmul.mubr.f32.gmra.mrb[70].mxu0 %v119_v5  ;;  %1697 = vmatmul.mubr.msk.f32.gmra.mrb[70].mxu1 %vm273_vm0, %v121_v6  ;;  %v167_v5 = vld [vmem:[%s3239_s0 + $0x4c8] sm:$0xff]  ;;  %v217_v6 = vld [vmem:[%s3239_s0 + $0x658] sm:$0xff] }
  0xd0   :  { %734 = vmatprep.mubr.f32.mxu0 %v123_v7  ;;  %1699 = vmatprep.mubr.msk.f32.mxu1 %vm273_vm0, %v124_v8  ;;  %v171_v7 = vld [vmem:[%s3239_s0 + $0x4e8] sm:$0xff]  ;;  %v220_v8 = vld [vmem:[%s3239_s0 + $0x670] sm:$0xff] }
  0xd3   :  { %735 = vmatmul.mubr.f32.gmra.mrb[72].mxu0 %v122_v9  ;;  %1700 = vmatmul.mubr.msk.f32.gmra.mrb[72].mxu1 %vm273_vm0, %v127_v10  ;;  %v170_v9 = vld [vmem:[%s3239_s0 + $0x4e0] sm:$0xff]  ;;  %v223_v10 = vld [vmem:[%s3239_s0 + $0x688] sm:$0xff] }
  0xd4   :  { %739 = vmatprep.mubr.f32.mxu0 %v126_v11  ;;  %1702 = vmatprep.mubr.msk.f32.mxu1 %vm273_vm0, %v130_v12  ;;  %v174_v11 = vld [vmem:[%s3239_s0 + $0x500] sm:$0xff] }
  0xd5   :  { %v226_v12 = vld [vmem:[%s3239_s0 + $0x6a0] sm:$0xff] }
  0xd7   :  { %740 = vmatmul.mubr.f32.gmra.mrb[74].mxu0 %v125_v13  ;;  %1703 = vmatmul.mubr.msk.f32.gmra.mrb[74].mxu1 %vm273_vm0, %v133_v14  ;;  %v173_v13 = vld [vmem:[%s3239_s0 + $0x4f8] sm:$0xff] }
  0xd8   :  { %744 = vmatprep.mubr.f32.mxu0 %v129_v15  ;;  %1705 = vmatprep.mubr.msk.f32.mxu1 %vm273_vm0, %v136_v16  ;;  %v229_v14 = vld [vmem:[%s3239_s0 + $0x6b8] sm:$0xff] }
  0xdb   :  { %745 = vmatmul.mubr.f32.gmra.mrb[76].mxu0 %v128_v17  ;;  %1706 = vmatmul.mubr.msk.f32.gmra.mrb[76].mxu1 %vm273_vm0, %v139_v18 }
  0xdc   :  { %749 = vmatprep.mubr.f32.mxu0 %v132_v19  ;;  %1708 = vmatprep.mubr.msk.f32.mxu1 %vm273_vm0, %v142_v20 }
  0xdf   :  { %750 = vmatmul.mubr.f32.gmra.mrb[78].mxu0 %v131_v21  ;;  %1709 = vmatmul.mubr.msk.f32.gmra.mrb[78].mxu1 %vm273_vm0, %v145_v22 }
  0xe0   :  { %754 = vmatprep.mubr.f32.mxu0 %v135_v23  ;;  %1711 = vmatprep.mubr.msk.f32.mxu1 %vm273_vm0, %v148_v24 }
  0xe3   :  { %755 = vmatmul.mubr.f32.gmra.mrb[80].mxu0 %v134_v25  ;;  %1712 = vmatmul.mubr.msk.f32.gmra.mrb[80].mxu1 %vm273_vm0, %v151_v26 }
  0xe4   :  { %759 = vmatprep.mubr.f32.mxu0 %v138_v27  ;;  %1714 = vmatprep.mubr.msk.f32.mxu1 %vm273_vm0, %v154_v28 }
  0xe7   :  { %760 = vmatmul.mubr.f32.gmra.mrb[82].mxu0 %v137_v29  ;;  %1715 = vmatmul.mubr.msk.f32.gmra.mrb[82].mxu1 %vm273_vm0, %v157_v30 }
  0xe8   :  { %764 = vmatprep.mubr.f32.mxu0 %v141_v31  ;;  %1717 = vmatprep.mubr.msk.f32.mxu1 %vm273_vm0, %v160_v32 }
  0xeb   :  { %765 = vmatmul.mubr.f32.gmra.mrb[84].mxu0 %v140_v33  ;;  %1718 = vmatmul.mubr.msk.f32.gmra.mrb[84].mxu1 %vm273_vm0, %v163_v34 }
  0xec   :  { %769 = vmatprep.mubr.f32.mxu0 %v144_v35  ;;  %1720 = vmatprep.mubr.msk.f32.mxu1 %vm273_vm0, %v166_v36 }
  0xef   :  { %770 = vmatmul.mubr.f32.gmra.mrb[86].mxu0 %v143_v37  ;;  %1721 = vmatmul.mubr.msk.f32.gmra.mrb[86].mxu1 %vm273_vm0, %v169_v38 }
  0xf0   :  { %774 = vmatprep.mubr.f32.mxu0 %v147_v39  ;;  %1723 = vmatprep.mubr.msk.f32.mxu1 %vm273_vm0, %v172_v40 }
  0xf3   :  { %775 = vmatmul.mubr.f32.gmra.mrb[88].mxu0 %v146_v41  ;;  %1724 = vmatmul.mubr.msk.f32.gmra.mrb[88].mxu1 %vm273_vm0, %v175_v42 }
  0xf4   :  { %779 = vmatprep.mubr.f32.mxu0 %v150_v43  ;;  %1726 = vmatprep.mubr.msk.f32.mxu1 %vm273_vm0, %v178_v44 }
  0xf7   :  { %780 = vmatmul.mubr.f32.gmra.mrb[90].mxu0 %v149_v45  ;;  %1727 = vmatmul.mubr.msk.f32.gmra.mrb[90].mxu1 %vm273_vm0, %v181_v46 }
  0xf8   :  { %784 = vmatprep.mubr.f32.mxu0 %v153_v47  ;;  %1729 = vmatprep.mubr.msk.f32.mxu1 %vm273_vm0, %v184_v48 }
  0xfb   :  { %785 = vmatmul.mubr.f32.gmra.mrb[92].mxu0 %v152_v49  ;;  %1730 = vmatmul.mubr.msk.f32.gmra.mrb[92].mxu1 %vm273_vm0, %v187_v50 }
  0xfc   :  { %789 = vmatprep.mubr.f32.mxu0 %v156_v51  ;;  %1732 = vmatprep.mubr.msk.f32.mxu1 %vm273_vm0, %v190_v52 }
  0xff   :  { %790 = vmatmul.mubr.f32.gmra.mrb[94].mxu0 %v155_v53  ;;  %1733 = vmatmul.mubr.msk.f32.gmra.mrb[94].mxu1 %vm273_vm0, %v193_v54 }
 0x100   :  { %794 = vmatprep.mubr.f32.mxu0 %v159_v55  ;;  %1735 = vmatprep.mubr.msk.f32.mxu1 %vm273_vm0, %v196_v56 }
 0x103   :  { %795 = vmatmul.mubr.f32.gmra.mrb[96].mxu0 %v158_v57  ;;  %1736 = vmatmul.mubr.msk.f32.gmra.mrb[96].mxu1 %vm273_vm0, %v199_v58 }
 0x104   :  { %799 = vmatprep.mubr.f32.mxu0 %v162_v59  ;;  %1738 = vmatprep.mubr.msk.f32.mxu1 %vm273_vm0, %v202_v60 }
 0x107   :  { %800 = vmatmul.mubr.f32.gmra.mrb[98].mxu0 %v161_v61  ;;  %1739 = vmatmul.mubr.msk.f32.gmra.mrb[98].mxu1 %vm273_vm0, %v205_v62 }
 0x108   :  { %804 = vmatprep.mubr.f32.mxu0 %v165_v63  ;;  %1741 = vmatprep.mubr.msk.f32.mxu1 %vm273_vm0, %v208_v0 }
 0x10b   :  { %805 = vmatmul.mubr.f32.gmra.mrb[100].mxu0 %v164_v1  ;;  %1742 = vmatmul.mubr.msk.f32.gmra.mrb[100].mxu1 %vm273_vm0, %v211_v2 }
 0x10c   :  { %809 = vmatprep.mubr.f32.mxu0 %v168_v3  ;;  %1744 = vmatprep.mubr.msk.f32.mxu1 %vm273_vm0, %v214_v4 }
 0x10f   :  { %810 = vmatmul.mubr.f32.gmra.mrb[102].mxu0 %v167_v5  ;;  %1745 = vmatmul.mubr.msk.f32.gmra.mrb[102].mxu1 %vm273_vm0, %v217_v6 }
 0x110   :  { %814 = vmatprep.mubr.f32.mxu0 %v171_v7  ;;  %1747 = vmatprep.mubr.msk.f32.mxu1 %vm273_vm0, %v220_v8 }
 0x113   :  { %815 = vmatmul.mubr.f32.gmra.mrb[104].mxu0 %v170_v9  ;;  %1748 = vmatmul.mubr.msk.f32.gmra.mrb[104].mxu1 %vm273_vm0, %v223_v10 }
 0x114   :  { %819 = vmatprep.mubr.f32.mxu0 %v174_v11  ;;  %1750 = vmatprep.mubr.msk.f32.mxu1 %vm273_vm0, %v226_v12 }
 0x116   :  { %v2722_v15 = vpop.f32.mrb[0].mxu0  ;;  %v2724_v16 = vpop.f32.mrb[0].mxu1 }
 0x117   :  { %v558_v17 = vpop.f32.mrb[1].mxu0  ;;  %820 = vmatmul.mubr.f32.gmra.mrb[106].mxu0 %v173_v13  ;;  %v828_v18 = vpop.f32.mrb[1].mxu1  ;;  %1751 = vmatmul.mubr.msk.f32.gmra.mrb[106].mxu1 %vm273_vm0, %v229_v14 }
 0x11a   :  { %v2727_v19 = vpop.f32.mrb[2].mxu0  ;;  %v2729_v20 = vpop.f32.mrb[2].mxu1 }
 0x11b   :  { %v563_v21 = vpop.f32.mrb[3].mxu0  ;;  %v833_v22 = vpop.f32.mrb[3].mxu1 }
 0x11e   :  { %v2731_v23 = vpop.f32.mrb[4].mxu0  ;;  %v2733_v24 = vpop.f32.mrb[4].mxu1 }
 0x11f   :  { %v568_v25 = vpop.f32.mrb[5].mxu0  ;;  %v838_v26 = vpop.f32.mrb[5].mxu1 }
 0x122   :  { %v2735_v27 = vpop.f32.mrb[6].mxu0  ;;  %v2737_v28 = vpop.f32.mrb[6].mxu1 }
 0x123   :  { %v573_v29 = vpop.f32.mrb[7].mxu0  ;;  %v843_v30 = vpop.f32.mrb[7].mxu1 }
 0x124   :  { %v2798_v29 = vld [vmem:[%s3240_s2] ss:$0 sm:$0xff] }
 0x126   :  { %v2739_v31 = vpop.f32.mrb[8].mxu0  ;;  %v2741_v32 = vpop.f32.mrb[8].mxu1 }
 0x127   :  { %v578_v33 = vpop.f32.mrb[9].mxu0  ;;  %v848_v34 = vpop.f32.mrb[9].mxu1 }
 0x128   :  { %v562_v34 = vadd.f32 %v2798_v29, %v2727_v19 }
 0x12a   :  { %v2743_v35 = vpop.f32.mrb[10].mxu0  ;;  %v2745_v36 = vpop.f32.mrb[10].mxu1 }
 0x12b   :  { %v583_v37 = vpop.f32.mrb[11].mxu0  ;;  %v853_v38 = vpop.f32.mrb[11].mxu1 }
 0x12c   :  { %v557_v37 = vadd.f32 %v2798_v29, %v2722_v15 }
 0x12e   :  { %v2747_v39 = vpop.f32.mrb[12].mxu0  ;;  %v2749_v40 = vpop.f32.mrb[12].mxu1 }
 0x12f   :  { %v588_v41 = vpop.f32.mrb[13].mxu0  ;;  %v858_v42 = vpop.f32.mrb[13].mxu1 }
 0x132   :  { %v2751_v43 = vpop.f32.mrb[14].mxu0  ;;  %v2753_v44 = vpop.f32.mrb[14].mxu1 }
 0x133   :  { %v593_v45 = vpop.f32.mrb[15].mxu0  ;;  %v863_v46 = vpop.f32.mrb[15].mxu1 }
 0x136   :  { %v2755_v47 = vpop.f32.mrb[16].mxu0  ;;  %v2757_v48 = vpop.f32.mrb[16].mxu1 }
 0x137   :  { %v598_v49 = vpop.f32.mrb[17].mxu0  ;;  %v868_v50 = vpop.f32.mrb[17].mxu1 }
 0x138   :  { %v572_v50 = vadd.f32 %v2798_v29, %v2735_v27 }
 0x13a   :  { %v2759_v51 = vpop.f32.mrb[18].mxu0  ;;  %v2761_v52 = vpop.f32.mrb[18].mxu1 }
 0x13b   :  { %v603_v53 = vpop.f32.mrb[19].mxu0  ;;  %v873_v54 = vpop.f32.mrb[19].mxu1 }
 0x13c   :  { %v567_v54 = vadd.f32 %v2798_v29, %v2731_v23  ;;  %v582_v23 = vadd.f32 %v2798_v29, %v2743_v35 }
 0x13e   :  { %v2763_v55 = vpop.f32.mrb[20].mxu0  ;;  %v2765_v56 = vpop.f32.mrb[20].mxu1 }
 0x13f   :  { %v608_v57 = vpop.f32.mrb[21].mxu0  ;;  %v878_v58 = vpop.f32.mrb[21].mxu1 }
 0x142   :  { %v2767_v59 = vpop.f32.mrb[22].mxu0  ;;  %v2769_v60 = vpop.f32.mrb[22].mxu1 }
 0x143   :  { %v613_v61 = vpop.f32.mrb[23].mxu0  ;;  %v883_v62 = vpop.f32.mrb[23].mxu1 }
 0x146   :  { %v2771_v63 = vpop.f32.mrb[24].mxu0  ;;  %v2773_v0 = vpop.f32.mrb[24].mxu1 }
 0x147   :  { %v618_v1 = vpop.f32.mrb[25].mxu0  ;;  %v888_v2 = vpop.f32.mrb[25].mxu1 }
 0x148   :  { %v577_v2 = vadd.f32 %v2798_v29, %v2739_v31  ;;  %v592_v31 = vadd.f32 %v2798_v29, %v2751_v43 }
 0x14a   :  { %v2775_v3 = vpop.f32.mrb[26].mxu0  ;;  %v2777_v4 = vpop.f32.mrb[26].mxu1 }
 0x14b   :  { %v623_v5 = vpop.f32.mrb[27].mxu0  ;;  %v893_v6 = vpop.f32.mrb[27].mxu1 }
 0x14e   :  { %v2779_v7 = vpop.f32.mrb[28].mxu0  ;;  %v2781_v8 = vpop.f32.mrb[28].mxu1 }
 0x14f   :  { %v628_v9 = vpop.f32.mrb[29].mxu0  ;;  %v898_v10 = vpop.f32.mrb[29].mxu1 }
 0x152   :  { %v2783_v11 = vpop.f32.mrb[30].mxu0  ;;  %v2785_v12 = vpop.f32.mrb[30].mxu1 }
 0x153   :  { %v633_v13 = vpop.f32.mrb[31].mxu0  ;;  %v903_v14 = vpop.f32.mrb[31].mxu1 }
 0x156   :  { %v2787_v17 = vpop.f32.mrb[32].mxu0  ;;  %v2789_v18 = vpop.f32.mrb[32].mxu1 }
 0x157   :  { %v638_v21 = vpop.f32.mrb[33].mxu0  ;;  %v908_v22 = vpop.f32.mrb[33].mxu1 }
 0x158   :  { %v587_v22 = vadd.f32 %v2798_v29, %v2747_v39  ;;  %v602_v39 = vadd.f32 %v2798_v29, %v2759_v51 }
 0x15a   :  { %v2791_v25 = vpop.f32.mrb[34].mxu0  ;;  %v2793_v26 = vpop.f32.mrb[34].mxu1 }
 0x15b   :  { %v643_v30 = vpop.f32.mrb[35].mxu0  ;;  %v913_v33 = vpop.f32.mrb[35].mxu1 }
 0x15e   :  { %v2804_v38 = vpop.f32.mrb[36].mxu0  ;;  %v1647_v41 = vpop.f32.mrb[36].mxu1 }
 0x15f   :  { %v987_v42 = vadd.f32 %v1647_v41, %v562_v34  ;;  %v648_v45 = vpop.f32.mrb[37].mxu0  ;;  %v981_v46 = vpop.f32.mrb[37].mxu1 }
 0x160   :  { %v982_v49 = vadd.f32 %v981_v46, %v557_v37  ;;  %v597_v46 = vadd.f32 %v2798_v29, %v2755_v47  ;;  %v612_v47 = vadd.f32 %v2798_v29, %v2767_v59 }
 0x161   :  { %v1341_v53 = vmax.f32 %v987_v42, 0.0 }
 0x162   :  { %v1340_v57 = vmax.f32 %v982_v49, 0.0  ;;  %v2810_v58 = vpop.f32.mrb[38].mxu0  ;;  %v1650_v19 = vpop.f32.mrb[38].mxu1 }
 0x163   :  { %1413 = vst.msk [vmem:[%s3241_s3 + $0x8] sm:$0xff] %vm273_vm0, %v1341_v53  ;;  %v997_v15 = vadd.f32 %v1650_v19, %v572_v50  ;;  %v653_v61 = vpop.f32.mrb[39].mxu0  ;;  %v991_v62 = vpop.f32.mrb[39].mxu1 }
 0x164   :  { %1412 = vst.msk [vmem:[%s3241_s3] sm:$0xff] %vm273_vm0, %v1340_v57  ;;  %v992_v27 = vadd.f32 %v991_v62, %v567_v54  ;;  %v607_v61 = vadd.f32 %v2798_v29, %v2763_v55  ;;  %v622_v55 = vadd.f32 %v2798_v29, %v2775_v3 }
 0x165   :  { %v1343_v1 = vmax.f32 %v997_v15, 0.0 }
 0x166   :  { %v1342_v5 = vmax.f32 %v992_v27, 0.0  ;;  %v2824_v6 = vpop.f32.mrb[40].mxu0  ;;  %v1653_v9 = vpop.f32.mrb[40].mxu1 }
 0x167   :  { %1415 = vst.msk [vmem:[%s3241_s3 + $0x18] sm:$0xff] %vm273_vm0, %v1343_v1  ;;  %v1007_v10 = vadd.f32 %v1653_v9, %v582_v23  ;;  %v658_v13 = vpop.f32.mrb[41].mxu0  ;;  %v1001_v14 = vpop.f32.mrb[41].mxu1 }
 0x168   :  { %1414 = vst.msk [vmem:[%s3241_s3 + $0x10] sm:$0xff] %vm273_vm0, %v1342_v5  ;;  %v1002_v35 = vadd.f32 %v1001_v14, %v577_v2 }
 0x169   :  { %v1345_v21 = vmax.f32 %v1007_v10, 0.0  ;;  %v617_v10 = vadd.f32 %v2798_v29, %v2771_v63  ;;  %v632_v63 = vadd.f32 %v2798_v29, %v2783_v11 }
 0x16a   :  { %v1344_v30 = vmax.f32 %v1002_v35, 0.0  ;;  %v2838_v33 = vpop.f32.mrb[42].mxu0  ;;  %v1656_v34 = vpop.f32.mrb[42].mxu1 }
 0x16b   :  { %1417 = vst.msk [vmem:[%s3241_s3 + $0x28] sm:$0xff] %vm273_vm0, %v1345_v21  ;;  %v1017_v37 = vadd.f32 %v1656_v34, %v592_v31  ;;  %v663_v41 = vpop.f32.mrb[43].mxu0  ;;  %v1011_v42 = vpop.f32.mrb[43].mxu1  ;;  %v627_v34 = vadd.f32 %v2798_v29, %v2779_v7  ;;  %v642_v7 = vadd.f32 %v2798_v29, %v2791_v25 }
 0x16c   :  { %1416 = vst.msk [vmem:[%s3241_s3 + $0x20] sm:$0xff] %vm273_vm0, %v1344_v30  ;;  %v1012_v43 = vadd.f32 %v1011_v42, %v587_v22 }
 0x16d   :  { %v1347_v45 = vmax.f32 %v1017_v37, 0.0 }
 0x16e   :  { %v1346_v49 = vmax.f32 %v1012_v43, 0.0  ;;  %v2852_v50 = vpop.f32.mrb[44].mxu0  ;;  %v1659_v53 = vpop.f32.mrb[44].mxu1 }
 0x16f   :  { %1419 = vst.msk [vmem:[%s3241_s3 + $0x38] sm:$0xff] %vm273_vm0, %v1347_v45  ;;  %v1027_v54 = vadd.f32 %v1659_v53, %v602_v39  ;;  %v668_v57 = vpop.f32.mrb[45].mxu0  ;;  %v1021_v19 = vpop.f32.mrb[45].mxu1 }
 0x170   :  { %1418 = vst.msk [vmem:[%s3241_s3 + $0x30] sm:$0xff] %vm273_vm0, %v1346_v49  ;;  %v1022_v51 = vadd.f32 %v1021_v19, %v597_v46  ;;  %v637_v49 = vadd.f32 %v2798_v29, %v2787_v17  ;;  %v652_v17 = vadd.f32 %v2798_v29, %v2810_v58 }
 0x171   :  { %v1349_v15 = vmax.f32 %v1027_v54, 0.0 }
 0x172   :  { %v1348_v62 = vmax.f32 %v1022_v51, 0.0  ;;  %v2866_v27 = vpop.f32.mrb[46].mxu0  ;;  %v1662_v23 = vpop.f32.mrb[46].mxu1 }
 0x173   :  { %1421 = vst.msk [vmem:[%s3241_s3 + $0x48] sm:$0xff] %vm273_vm0, %v1349_v15  ;;  %v1037_v1 = vadd.f32 %v1662_v23, %v612_v47  ;;  %v673_v2 = vpop.f32.mrb[47].mxu0  ;;  %v1031_v5 = vpop.f32.mrb[47].mxu1 }
 0x174   :  { %1420 = vst.msk [vmem:[%s3241_s3 + $0x40] sm:$0xff] %vm273_vm0, %v1348_v62  ;;  %v1032_v59 = vadd.f32 %v1031_v5, %v607_v61  ;;  %v647_v61 = vadd.f32 %v2798_v29, %v2804_v38  ;;  %v662_v38 = vadd.f32 %v2798_v29, %v2838_v33 }
 0x175   :  { %v1351_v9 = vmax.f32 %v1037_v1, 0.0 }
 0x176   :  { %v1350_v13 = vmax.f32 %v1032_v59, 0.0  ;;  %v2880_v14 = vpop.f32.mrb[48].mxu0  ;;  %v1665_v35 = vpop.f32.mrb[48].mxu1 }
 0x177   :  { %1423 = vst.msk [vmem:[%s3241_s3 + $0x58] sm:$0xff] %vm273_vm0, %v1351_v9  ;;  %v1047_v31 = vadd.f32 %v1665_v35, %v622_v55  ;;  %v678_v21 = vpop.f32.mrb[49].mxu0  ;;  %v1041_v22 = vpop.f32.mrb[49].mxu1  ;;  %v657_v9 = vadd.f32 %v2798_v29, %v2824_v6  ;;  %v672_v6 = vadd.f32 %v2798_v29, %v2866_v27 }
 0x178   :  { %1422 = vst.msk [vmem:[%s3241_s3 + $0x50] sm:$0xff] %vm273_vm0, %v1350_v13  ;;  %v1042_v3 = vadd.f32 %v1041_v22, %v617_v10 }
 0x179   :  { %v1353_v30 = vmax.f32 %v1047_v31, 0.0 }
 0x17a   :  { %v1352_v37 = vmax.f32 %v1042_v3, 0.0  ;;  %v681_v41 = vpop.f32.mrb[50].mxu0  ;;  %v1668_v42 = vpop.f32.mrb[50].mxu1 }
 0x17b   :  { %1425 = vst.msk [vmem:[%s3241_s3 + $0x68] sm:$0xff] %vm273_vm0, %v1353_v30  ;;  %v1057_v43 = vadd.f32 %v1668_v42, %v632_v63  ;;  %v683_v39 = vpop.f32.mrb[51].mxu0  ;;  %v1051_v45 = vpop.f32.mrb[51].mxu1  ;;  %v667_v63 = vadd.f32 %v2798_v29, %v2852_v50 }
 0x17c   :  { %1424 = vst.msk [vmem:[%s3241_s3 + $0x60] sm:$0xff] %vm273_vm0, %v1352_v37  ;;  %v1052_v11 = vadd.f32 %v1051_v45, %v627_v34  ;;  %v682_v45 = vadd.f32 %v2798_v29, %v681_v41 }
 0x17d   :  { %v1355_v46 = vmax.f32 %v1057_v43, 0.0 }
 0x17e   :  { %v1354_v53 = vmax.f32 %v1052_v11, 0.0  ;;  %v686_v54 = vpop.f32.mrb[52].mxu0  ;;  %v1671_v57 = vpop.f32.mrb[52].mxu1  ;;  %v677_v11 = vadd.f32 %v2798_v29, %v2880_v14 }
 0x17f   :  { %1427 = vst.msk [vmem:[%s3241_s3 + $0x78] sm:$0xff] %vm273_vm0, %v1355_v46  ;;  %v1067_v19 = vadd.f32 %v1671_v57, %v642_v7  ;;  %v688_v51 = vpop.f32.mrb[53].mxu0  ;;  %v1061_v47 = vpop.f32.mrb[53].mxu1 }
 0x180   :  { %1426 = vst.msk [vmem:[%s3241_s3 + $0x70] sm:$0xff] %vm273_vm0, %v1354_v53  ;;  %v1062_v25 = vadd.f32 %v1061_v47, %v637_v49  ;;  %v687_v47 = vadd.f32 %v2798_v29, %v686_v54 }
 0x181   :  { %v1357_v15 = vmax.f32 %v1067_v19, 0.0 }
 0x182   :  { %v1356_v62 = vmax.f32 %v1062_v25, 0.0  ;;  %v691_v23 = vpop.f32.mrb[54].mxu0  ;;  %v1674_v1 = vpop.f32.mrb[54].mxu1 }
 0x183   :  { %1429 = vst.msk [vmem:[%s3241_s3 + $0x88] sm:$0xff] %vm273_vm0, %v1357_v15  ;;  %v1077_v2 = vadd.f32 %v1674_v1, %v652_v17  ;;  %v693_v5 = vpop.f32.mrb[55].mxu0  ;;  %v1071_v59 = vpop.f32.mrb[55].mxu1  ;;  %v692_v51 = vadd.f32 %v2798_v29, %v691_v23 }
 0x184   :  { %1428 = vst.msk [vmem:[%s3241_s3 + $0x80] sm:$0xff] %vm273_vm0, %v1356_v62  ;;  %v1072_v58 = vadd.f32 %v1071_v59, %v647_v61 }
 0x185   :  { %v1359_v55 = vmax.f32 %v1077_v2, 0.0 }
 0x186   :  { %v1358_v10 = vmax.f32 %v1072_v58, 0.0  ;;  %v696_v13 = vpop.f32.mrb[56].mxu0  ;;  %v1677_v35 = vpop.f32.mrb[56].mxu1 }
 0x187   :  { %1431 = vst.msk [vmem:[%s3241_s3 + $0x98] sm:$0xff] %vm273_vm0, %v1359_v55  ;;  %v1087_v31 = vadd.f32 %v1677_v35, %v662_v38  ;;  %v698_v21 = vpop.f32.mrb[57].mxu0  ;;  %v1081_v22 = vpop.f32.mrb[57].mxu1  ;;  %v697_v5 = vadd.f32 %v2798_v29, %v696_v13 }
 0x188   :  { %1430 = vst.msk [vmem:[%s3241_s3 + $0x90] sm:$0xff] %vm273_vm0, %v1358_v10  ;;  %v1082_v33 = vadd.f32 %v1081_v22, %v657_v9 }
 0x189   :  { %v1361_v3 = vmax.f32 %v1087_v31, 0.0 }
 0x18a   :  { %v1360_v30 = vmax.f32 %v1082_v33, 0.0  ;;  %v701_v34 = vpop.f32.mrb[58].mxu0  ;;  %v1680_v37 = vpop.f32.mrb[58].mxu1 }
 0x18b   :  { %1433 = vst.msk [vmem:[%s3241_s3 + $0xa8] sm:$0xff] %vm273_vm0, %v1361_v3  ;;  %v1097_v42 = vadd.f32 %v1680_v37, %v672_v6  ;;  %v703_v43 = vpop.f32.mrb[59].mxu0  ;;  %v1091_v39 = vpop.f32.mrb[59].mxu1  ;;  %v702_v2 = vadd.f32 %v2798_v29, %v701_v34 }
 0x18c   :  { %1432 = vst.msk [vmem:[%s3241_s3 + $0xa0] sm:$0xff] %vm273_vm0, %v1360_v30  ;;  %v1092_v27 = vadd.f32 %v1091_v39, %v667_v63 }
 0x18d   :  { %v1363_v50 = vmax.f32 %v1097_v42, 0.0 }
 0x18e   :  { %v1362_v7 = vmax.f32 %v1092_v27, 0.0  ;;  %v706_v46 = vpop.f32.mrb[60].mxu0  ;;  %v1683_v49 = vpop.f32.mrb[60].mxu1 }
 0x18f   :  { %1435 = vst.msk [vmem:[%s3241_s3 + $0xb8] sm:$0xff] %vm273_vm0, %v1363_v50  ;;  %v1107_v53 = vadd.f32 %v1683_v49, %v682_v45  ;;  %v708_v57 = vpop.f32.mrb[61].mxu0  ;;  %v1101_v19 = vpop.f32.mrb[61].mxu1  ;;  %v707_v21 = vadd.f32 %v2798_v29, %v706_v46 }
 0x190   :  { %1434 = vst.msk [vmem:[%s3241_s3 + $0xb0] sm:$0xff] %vm273_vm0, %v1362_v7  ;;  %v1102_v41 = vadd.f32 %v1101_v19, %v677_v11 }
 0x191   :  { %v1365_v14 = vmax.f32 %v1107_v53, 0.0 }
 0x192   :  { %v1364_v25 = vmax.f32 %v1102_v41, 0.0  ;;  %v711_v17 = vpop.f32.mrb[62].mxu0  ;;  %v1686_v15 = vpop.f32.mrb[62].mxu1 }
 0x193   :  { %1437 = vst.msk [vmem:[%s3241_s3 + $0xc8] sm:$0xff] %vm273_vm0, %v1365_v14  ;;  %v1117_v61 = vadd.f32 %v1686_v15, %v692_v51  ;;  %v713_v62 = vpop.f32.mrb[63].mxu0  ;;  %v1111_v1 = vpop.f32.mrb[63].mxu1  ;;  %v712_v31 = vadd.f32 %v2798_v29, %v711_v17 }
 0x194   :  { %1436 = vst.msk [vmem:[%s3241_s3 + $0xc0] sm:$0xff] %vm273_vm0, %v1364_v25  ;;  %v1112_v23 = vadd.f32 %v1111_v1, %v687_v47 }
 0x195   :  { %v1367_v54 = vmax.f32 %v1117_v61, 0.0 }
 0x196   :  { %v1366_v59 = vmax.f32 %v1112_v23, 0.0  ;;  %v716_v58 = vpop.f32.mrb[64].mxu0  ;;  %v1689_v38 = vpop.f32.mrb[64].mxu1 }
 0x197   :  { %1439 = vst.msk [vmem:[%s3241_s3 + $0xd8] sm:$0xff] %vm273_vm0, %v1367_v54  ;;  %v1127_v55 = vadd.f32 %v1689_v38, %v702_v2  ;;  %v718_v9 = vpop.f32.mrb[65].mxu0  ;;  %v1121_v10 = vpop.f32.mrb[65].mxu1  ;;  %v717_v43 = vadd.f32 %v2798_v29, %v716_v58 }
 0x198   :  { %1438 = vst.msk [vmem:[%s3241_s3 + $0xd0] sm:$0xff] %vm273_vm0, %v1366_v59  ;;  %v1122_v35 = vadd.f32 %v1121_v10, %v697_v5 }
 0x199   :  { %v1369_v13 = vmax.f32 %v1127_v55, 0.0 }
 0x19a   :  { %v1368_v22 = vmax.f32 %v1122_v35, 0.0  ;;  %v721_v33 = vpop.f32.mrb[66].mxu0  ;;  %v1692_v6 = vpop.f32.mrb[66].mxu1 }
 0x19b   :  { %1441 = vst.msk [vmem:[%s3241_s3 + $0xe8] sm:$0xff] %vm273_vm0, %v1369_v13  ;;  %v1137_v3 = vadd.f32 %v1692_v6, %v712_v31  ;;  %v723_v63 = vpop.f32.mrb[67].mxu0  ;;  %v1131_v30 = vpop.f32.mrb[67].mxu1  ;;  %v722_v37 = vadd.f32 %v2798_v29, %v721_v33 }
 0x19c   :  { %1440 = vst.msk [vmem:[%s3241_s3 + $0xe0] sm:$0xff] %vm273_vm0, %v1368_v22  ;;  %v1132_v34 = vadd.f32 %v1131_v30, %v707_v21 }
 0x19d   :  { %v1371_v42 = vmax.f32 %v1137_v3, 0.0 }
 0x19e   :  { %v1370_v39 = vmax.f32 %v1132_v34, 0.0  ;;  %v726_v27 = vpop.f32.mrb[68].mxu0  ;;  %v1695_v45 = vpop.f32.mrb[68].mxu1 }
 0x19f   :  { %1443 = vst.msk [vmem:[%s3241_s3 + $0xf8] sm:$0xff] %vm273_vm0, %v1371_v42  ;;  %v1147_v50 = vadd.f32 %v1695_v45, %v722_v37  ;;  %v728_v11 = vpop.f32.mrb[69].mxu0  ;;  %v1141_v7 = vpop.f32.mrb[69].mxu1  ;;  %v727_v53 = vadd.f32 %v2798_v29, %v726_v27 }
 0x1a0   :  { %1442 = vst.msk [vmem:[%s3241_s3 + $0xf0] sm:$0xff] %vm273_vm0, %v1370_v39  ;;  %v1142_v46 = vadd.f32 %v1141_v7, %v717_v43 }
 0x1a1   :  { %v1373_v49 = vmax.f32 %v1147_v50, 0.0 }
 0x1a2   :  { %v1372_v57 = vmax.f32 %v1142_v46, 0.0  ;;  %v731_v19 = vpop.f32.mrb[70].mxu0  ;;  %v1698_v41 = vpop.f32.mrb[70].mxu1 }
 0x1a3   :  { %1445 = vst.msk [vmem:[%s3241_s3 + $0x108] sm:$0xff] %vm273_vm0, %v1373_v49  ;;  %v732_v51 = vadd.f32 %v2798_v29, %v731_v19  ;;  %v733_v14 = vpop.f32.mrb[71].mxu0  ;;  %v1151_v47 = vpop.f32.mrb[71].mxu1 }
 0x1a4   :  { %1444 = vst.msk [vmem:[%s3241_s3 + $0x100] sm:$0xff] %vm273_vm0, %v1372_v57  ;;  %v1152_v25 = vadd.f32 %v1151_v47, %v727_v53 }
 0x1a5   :  { %v1157_v17 = vadd.f32 %v1698_v41, %v732_v51 }
 0x1a6   :  { %v1374_v15 = vmax.f32 %v1152_v25, 0.0  ;;  %v736_v61 = vpop.f32.mrb[72].mxu0  ;;  %v1701_v62 = vpop.f32.mrb[72].mxu1 }
 0x1a7   :  { %v1375_v1 = vmax.f32 %v1157_v17, 0.0  ;;  %v737_v23 = vadd.f32 %v2798_v29, %v736_v61  ;;  %v738_v2 = vpop.f32.mrb[73].mxu0  ;;  %v1161_v54 = vpop.f32.mrb[73].mxu1 }
 0x1a8   :  { %1446 = vst.msk [vmem:[%s3241_s3 + $0x110] sm:$0xff] %vm273_vm0, %v1374_v15 }
 0x1a9   :  { %1447 = vst.msk [vmem:[%s3241_s3 + $0x118] sm:$0xff] %vm273_vm0, %v1375_v1  ;;  %v1162_v5 = vadd.f32 %v1161_v54, %v737_v23 }
 0x1aa   :  { %v741_v59 = vpop.f32.mrb[74].mxu0  ;;  %v1704_v58 = vpop.f32.mrb[74].mxu1 }
 0x1ab   :  { %v1376_v38 = vmax.f32 %v1162_v5, 0.0  ;;  %v742_v55 = vadd.f32 %v2798_v29, %v741_v59  ;;  %v743_v9 = vpop.f32.mrb[75].mxu0  ;;  %v1171_v10 = vpop.f32.mrb[75].mxu1 }
 0x1ad   :  { %1448 = vst.msk [vmem:[%s3241_s3 + $0x120] sm:$0xff] %vm273_vm0, %v1376_v38  ;;  %v1167_v35 = vadd.f32 %v1701_v62, %v742_v55 }
 0x1ae   :  { %v746_v31 = vpop.f32.mrb[76].mxu0  ;;  %v1707_v13 = vpop.f32.mrb[76].mxu1 }
 0x1af   :  { %v1377_v21 = vmax.f32 %v1167_v35, 0.0  ;;  %v747_v22 = vadd.f32 %v2798_v29, %v746_v31  ;;  %v748_v33 = vpop.f32.mrb[77].mxu0  ;;  %v1181_v6 = vpop.f32.mrb[77].mxu1 }
 0x1b1   :  { %1449 = vst.msk [vmem:[%s3241_s3 + $0x128] sm:$0xff] %vm273_vm0, %v1377_v21  ;;  %v1172_v3 = vadd.f32 %v1171_v10, %v747_v22  ;;  %v832_v22 = vadd.f32 %v2798_v29, %v2729_v20  ;;  %v842_v20 = vadd.f32 %v2798_v29, %v2737_v28 }
 0x1b2   :  { %v751_v63 = vpop.f32.mrb[78].mxu0  ;;  %v1710_v30 = vpop.f32.mrb[78].mxu1 }
 0x1b3   :  { %v1378_v34 = vmax.f32 %v1172_v3, 0.0  ;;  %v752_v37 = vadd.f32 %v2798_v29, %v751_v63  ;;  %v753_v42 = vpop.f32.mrb[79].mxu0  ;;  %v1191_v43 = vpop.f32.mrb[79].mxu1 }
 0x1b5   :  { %1450 = vst.msk [vmem:[%s3241_s3 + $0x130] sm:$0xff] %vm273_vm0, %v1378_v34  ;;  %v1177_v39 = vadd.f32 %v1704_v58, %v752_v37 }
 0x1b6   :  { %v756_v27 = vpop.f32.mrb[80].mxu0  ;;  %v1713_v45 = vpop.f32.mrb[80].mxu1 }
 0x1b7   :  { %v1379_v50 = vmax.f32 %v1177_v39, 0.0  ;;  %v757_v11 = vadd.f32 %v2798_v29, %v756_v27  ;;  %v758_v7 = vpop.f32.mrb[81].mxu0  ;;  %v1201_v46 = vpop.f32.mrb[81].mxu1 }
 0x1b9   :  { %1451 = vst.msk [vmem:[%s3241_s3 + $0x138] sm:$0xff] %vm273_vm0, %v1379_v50  ;;  %v1182_v49 = vadd.f32 %v1181_v6, %v757_v11  ;;  %v827_v6 = vadd.f32 %v2798_v29, %v2724_v16  ;;  %v837_v16 = vadd.f32 %v2798_v29, %v2733_v24 }
 0x1ba   :  { %v761_v53 = vpop.f32.mrb[82].mxu0  ;;  %v3040_v57 = vpop.f32.mrb[82].mxu1 }
 0x1bb   :  { %v1380_v19 = vmax.f32 %v1182_v49, 0.0  ;;  %v762_v41 = vadd.f32 %v2798_v29, %v761_v53  ;;  %v763_v51 = vpop.f32.mrb[83].mxu0  ;;  %v1211_v14 = vpop.f32.mrb[83].mxu1 }
 0x1bd   :  { %1452 = vst.msk [vmem:[%s3241_s3 + $0x140] sm:$0xff] %vm273_vm0, %v1380_v19  ;;  %v1187_v47 = vadd.f32 %v1707_v13, %v762_v41 }
 0x1be   :  { %v766_v25 = vpop.f32.mrb[84].mxu0  ;;  %v3047_v17 = vpop.f32.mrb[84].mxu1 }
 0x1bf   :  { %v1381_v15 = vmax.f32 %v1187_v47, 0.0  ;;  %v767_v61 = vadd.f32 %v2798_v29, %v766_v25  ;;  %v768_v62 = vpop.f32.mrb[85].mxu0  ;;  %v3050_v1 = vpop.f32.mrb[85].mxu1  ;;  %v847_v25 = vadd.f32 %v2798_v29, %v2741_v32 }
 0x1c1   :  { %1453 = vst.msk [vmem:[%s3241_s3 + $0x148] sm:$0xff] %vm273_vm0, %v1381_v15  ;;  %v1192_v23 = vadd.f32 %v1191_v43, %v767_v61 }
 0x1c2   :  { %v771_v2 = vpop.f32.mrb[86].mxu0  ;;  %v3056_v54 = vpop.f32.mrb[86].mxu1 }
 0x1c3   :  { %v1382_v5 = vmax.f32 %v1192_v23, 0.0  ;;  %v772_v59 = vadd.f32 %v2798_v29, %v771_v2  ;;  %v773_v58 = vpop.f32.mrb[87].mxu0  ;;  %v3059_v38 = vpop.f32.mrb[87].mxu1 }
 0x1c5   :  { %1454 = vst.msk [vmem:[%s3241_s3 + $0x150] sm:$0xff] %vm273_vm0, %v1382_v5  ;;  %v1197_v55 = vadd.f32 %v1710_v30, %v772_v59 }
 0x1c6   :  { %v776_v9 = vpop.f32.mrb[88].mxu0  ;;  %v3065_v10 = vpop.f32.mrb[88].mxu1 }
 0x1c7   :  { %v1383_v35 = vmax.f32 %v1197_v55, 0.0  ;;  %v777_v31 = vadd.f32 %v2798_v29, %v776_v9  ;;  %v778_v13 = vpop.f32.mrb[89].mxu0  ;;  %v3068_v21 = vpop.f32.mrb[89].mxu1  ;;  %v857_v9 = vadd.f32 %v2798_v29, %v2749_v40 }
 0x1c9   :  { %1455 = vst.msk [vmem:[%s3241_s3 + $0x158] sm:$0xff] %vm273_vm0, %v1383_v35  ;;  %v1202_v33 = vadd.f32 %v1201_v46, %v777_v31 }
 0x1ca   :  { %v781_v3 = vpop.f32.mrb[90].mxu0  ;;  %v1728_v63 = vpop.f32.mrb[90].mxu1 }
 0x1cb   :  { %v1384_v30 = vmax.f32 %v1202_v33, 0.0  ;;  %v782_v34 = vadd.f32 %v2798_v29, %v781_v3  ;;  %v1257_v37 = vadd.f32 %v1728_v63, %v832_v22  ;;  %v783_v42 = vpop.f32.mrb[91].mxu0  ;;  %v1251_v43 = vpop.f32.mrb[91].mxu1 }
 0x1cc   :  { %v1252_v39 = vadd.f32 %v1251_v43, %v827_v6 }
 0x1cd   :  { %1456 = vst.msk [vmem:[%s3241_s3 + $0x160] sm:$0xff] %vm273_vm0, %v1384_v30  ;;  %v1207_v27 = vadd.f32 %v1713_v45, %v782_v34  ;;  %v1395_v50 = vmax.f32 %v1257_v37, 0.0  ;;  %v852_v45 = vadd.f32 %v2798_v29, %v2745_v36  ;;  %v867_v34 = vadd.f32 %v2798_v29, %v2757_v48 }
 0x1ce   :  { %v1394_v11 = vmax.f32 %v1252_v39, 0.0  ;;  %v786_v7 = vpop.f32.mrb[92].mxu0  ;;  %v1731_v46 = vpop.f32.mrb[92].mxu1 }
 0x1cf   :  { %v1385_v49 = vmax.f32 %v1207_v27, 0.0  ;;  %1467 = vst.msk [vmem:[%s3241_s3 + $0x1b8] sm:$0xff] %vm273_vm0, %v1395_v50  ;;  %v787_v28 = vadd.f32 %v2798_v29, %v786_v7  ;;  %v1267_v53 = vadd.f32 %v1731_v46, %v842_v20  ;;  %v788_v19 = vpop.f32.mrb[93].mxu0  ;;  %v1261_v41 = vpop.f32.mrb[93].mxu1  ;;  %v877_v7 = vadd.f32 %v2798_v29, %v2765_v56 }
 0x1d0   :  { %1466 = vst.msk [vmem:[%s3241_s3 + $0x1b0] sm:$0xff] %vm273_vm0, %v1394_v11  ;;  %v1262_v24 = vadd.f32 %v1261_v41, %v837_v16 }
 0x1d1   :  { %1457 = vst.msk [vmem:[%s3241_s3 + $0x168] sm:$0xff] %vm273_vm0, %v1385_v49  ;;  %v1212_v51 = vadd.f32 %v1211_v14, %v787_v28  ;;  %v1397_v47 = vmax.f32 %v1267_v53, 0.0  ;;  %v862_v14 = vadd.f32 %v2798_v29, %v2753_v44 }
 0x1d2   :  { %v1396_v15 = vmax.f32 %v1262_v24, 0.0  ;;  %v791_v61 = vpop.f32.mrb[94].mxu0  ;;  %v1734_v62 = vpop.f32.mrb[94].mxu1 }
 0x1d3   :  { %v1386_v23 = vmax.f32 %v1212_v51, 0.0  ;;  %1469 = vst.msk [vmem:[%s3241_s3 + $0x1c8] sm:$0xff] %vm273_vm0, %v1397_v47  ;;  %v792_v36 = vadd.f32 %v2798_v29, %v791_v61  ;;  %v1277_v2 = vadd.f32 %v1734_v62, %v852_v45  ;;  %v793_v5 = vpop.f32.mrb[95].mxu0  ;;  %v1271_v59 = vpop.f32.mrb[95].mxu1  ;;  %v887_v47 = vadd.f32 %v2798_v29, %v2773_v0 }
 0x1d4   :  { %1468 = vst.msk [vmem:[%s3241_s3 + $0x1c0] sm:$0xff] %vm273_vm0, %v1396_v15  ;;  %v1272_v32 = vadd.f32 %v1271_v59, %v847_v25 }
 0x1d5   :  { %1458 = vst.msk [vmem:[%s3241_s3 + $0x170] sm:$0xff] %vm273_vm0, %v1386_v23  ;;  %v1217_v58 = vadd.f32 %v3040_v57, %v792_v36  ;;  %v1399_v55 = vmax.f32 %v1277_v2, 0.0  ;;  %v872_v57 = vadd.f32 %v2798_v29, %v2761_v52 }
 0x1d6   :  { %v1398_v35 = vmax.f32 %v1272_v32, 0.0  ;;  %v796_v31 = vpop.f32.mrb[96].mxu0  ;;  %v1737_v13 = vpop.f32.mrb[96].mxu1  ;;  %v897_v32 = vadd.f32 %v2798_v29, %v2781_v8 }
 0x1d7   :  { %v1387_v22 = vmax.f32 %v1217_v58, 0.0  ;;  %1471 = vst.msk [vmem:[%s3241_s3 + $0x1d8] sm:$0xff] %vm273_vm0, %v1399_v55  ;;  %v797_v44 = vadd.f32 %v2798_v29, %v796_v31  ;;  %v1287_v33 = vadd.f32 %v1737_v13, %v862_v14  ;;  %v798_v6 = vpop.f32.mrb[97].mxu0  ;;  %v1281_v3 = vpop.f32.mrb[97].mxu1 }
 0x1d8   :  { %1470 = vst.msk [vmem:[%s3241_s3 + $0x1d0] sm:$0xff] %vm273_vm0, %v1398_v35  ;;  %v1282_v40 = vadd.f32 %v1281_v3, %v857_v9 }
 0x1d9   :  { %1459 = vst.msk [vmem:[%s3241_s3 + $0x178] sm:$0xff] %vm273_vm0, %v1387_v22  ;;  %v1222_v63 = vadd.f32 %v3050_v1, %v797_v44  ;;  %v1401_v30 = vmax.f32 %v1287_v33, 0.0  ;;  %v882_v1 = vadd.f32 %v2798_v29, %v2769_v60  ;;  %v907_v33 = vadd.f32 %v2798_v29, %v2789_v18 }
 0x1da   :  { %v1400_v37 = vmax.f32 %v1282_v40, 0.0  ;;  %v801_v42 = vpop.f32.mrb[98].mxu0  ;;  %v1740_v43 = vpop.f32.mrb[98].mxu1 }
 0x1db   :  { %v1388_v39 = vmax.f32 %v1222_v63, 0.0  ;;  %1473 = vst.msk [vmem:[%s3241_s3 + $0x1e8] sm:$0xff] %vm273_vm0, %v1401_v30  ;;  %v802_v52 = vadd.f32 %v2798_v29, %v801_v42  ;;  %v1297_v20 = vadd.f32 %v1740_v43, %v872_v57  ;;  %v803_v27 = vpop.f32.mrb[99].mxu0  ;;  %v1291_v50 = vpop.f32.mrb[99].mxu1 }
 0x1dc   :  { %1472 = vst.msk [vmem:[%s3241_s3 + $0x1e0] sm:$0xff] %vm273_vm0, %v1400_v37  ;;  %v1292_v48 = vadd.f32 %v1291_v50, %v867_v34 }
 0x1dd   :  { %1460 = vst.msk [vmem:[%s3241_s3 + $0x180] sm:$0xff] %vm273_vm0, %v1388_v39  ;;  %v1227_v16 = vadd.f32 %v3047_v17, %v802_v52  ;;  %v1403_v11 = vmax.f32 %v1297_v20, 0.0  ;;  %v892_v17 = vadd.f32 %v2798_v29, %v2777_v4 }
 0x1de   :  { %v1402_v46 = vmax.f32 %v1292_v48, 0.0  ;;  %v806_v49 = vpop.f32.mrb[100].mxu0  ;;  %v1743_v28 = vpop.f32.mrb[100].mxu1 }
 0x1df   :  { %v1389_v53 = vmax.f32 %v1227_v16, 0.0  ;;  %1475 = vst.msk [vmem:[%s3241_s3 + $0x1f8] sm:$0xff] %vm273_vm0, %v1403_v11  ;;  %v807_v60 = vadd.f32 %v2798_v29, %v806_v49  ;;  %v1307_v19 = vadd.f32 %v1743_v28, %v882_v1  ;;  %v808_v41 = vpop.f32.mrb[101].mxu0  ;;  %v1301_v24 = vpop.f32.mrb[101].mxu1 }
 0x1e0   :  { %1474 = vst.msk [vmem:[%s3241_s3 + $0x1f0] sm:$0xff] %vm273_vm0, %v1402_v46  ;;  %v1302_v56 = vadd.f32 %v1301_v24, %v877_v7 }
 0x1e1   :  { %1461 = vst.msk [vmem:[%s3241_s3 + $0x188] sm:$0xff] %vm273_vm0, %v1389_v53  ;;  %v1232_v45 = vadd.f32 %v3059_v38, %v807_v60  ;;  %v1405_v51 = vmax.f32 %v1307_v19, 0.0  ;;  %v902_v38 = vadd.f32 %v2798_v29, %v2785_v12 }
 0x1e2   :  { %v1404_v25 = vmax.f32 %v1302_v56, 0.0  ;;  %v811_v15 = vpop.f32.mrb[102].mxu0  ;;  %v1746_v61 = vpop.f32.mrb[102].mxu1 }
 0x1e3   :  { %v1390_v62 = vmax.f32 %v1232_v45, 0.0  ;;  %1477 = vst.msk [vmem:[%s3241_s3 + $0x208] sm:$0xff] %vm273_vm0, %v1405_v51  ;;  %v812_v4 = vadd.f32 %v2798_v29, %v811_v15  ;;  %v1317_v23 = vadd.f32 %v1746_v61, %v892_v17  ;;  %v813_v36 = vpop.f32.mrb[103].mxu0  ;;  %v1311_v2 = vpop.f32.mrb[103].mxu1 }
 0x1e4   :  { %1476 = vst.msk [vmem:[%s3241_s3 + $0x200] sm:$0xff] %vm273_vm0, %v1404_v25  ;;  %v1312_v0 = vadd.f32 %v1311_v2, %v887_v47 }
 0x1e5   :  { %1462 = vst.msk [vmem:[%s3241_s3 + $0x190] sm:$0xff] %vm273_vm0, %v1390_v62  ;;  %v1237_v5 = vadd.f32 %v3056_v54, %v812_v4  ;;  %v1407_v59 = vmax.f32 %v1317_v23, 0.0  ;;  %v912_v54 = vadd.f32 %v2798_v29, %v2793_v26 }
 0x1e6   :  { %v1406_v14 = vmax.f32 %v1312_v0, 0.0  ;;  %v816_v58 = vpop.f32.mrb[104].mxu0  ;;  %v1749_v55 = vpop.f32.mrb[104].mxu1 }
 0x1e7   :  { %v1391_v9 = vmax.f32 %v1237_v5, 0.0  ;;  %1479 = vst.msk [vmem:[%s3241_s3 + $0x218] sm:$0xff] %vm273_vm0, %v1407_v59  ;;  %v817_v12 = vadd.f32 %v2798_v29, %v816_v58  ;;  %v1327_v35 = vadd.f32 %v1749_v55, %v902_v38  ;;  %v818_v31 = vpop.f32.mrb[105].mxu0  ;;  %v1321_v13 = vpop.f32.mrb[105].mxu1 }
 0x1e8   :  { %1478 = vst.msk [vmem:[%s3241_s3 + $0x210] sm:$0xff] %vm273_vm0, %v1406_v14  ;;  %v1322_v8 = vadd.f32 %v1321_v13, %v897_v32 }
 0x1e9   :  { %1463 = vst.msk [vmem:[%s3241_s3 + $0x198] sm:$0xff] %vm273_vm0, %v1391_v9  ;;  %v1242_v22 = vadd.f32 %v3068_v21, %v817_v12  ;;  %v1409_v44 = vmax.f32 %v1327_v35, 0.0 }
 0x1ea   :  { %v1408_v6 = vmax.f32 %v1322_v8, 0.0  ;;  %v821_v3 = vpop.f32.mrb[106].mxu0  ;;  %v1752_v40 = vpop.f32.mrb[106].mxu1 }
 0x1eb   :  { %v1392_v57 = vmax.f32 %v1242_v22, 0.0  ;;  %1481 = vst.msk [vmem:[%s3241_s3 + $0x228] sm:$0xff] %vm273_vm0, %v1409_v44  ;;  %v822_v26 = vadd.f32 %v2798_v29, %v821_v3  ;;  %v1337_v63 = vadd.f32 %v1752_v40, %v912_v54  ;;  %v823_v30 = vpop.f32.mrb[107].mxu0  ;;  %v1331_v34 = vpop.f32.mrb[107].mxu1 }
 0x1ec   :  { %1480 = vst.msk [vmem:[%s3241_s3 + $0x220] sm:$0xff] %vm273_vm0, %v1408_v6  ;;  %v1332_v18 = vadd.f32 %v1331_v34, %v907_v33 }
 0x1ed   :  { %1464 = vst.msk [vmem:[%s3241_s3 + $0x1a0] sm:$0xff] %vm273_vm0, %v1392_v57  ;;  %v1247_v21 = vadd.f32 %v3065_v10, %v822_v26  ;;  %v1411_v37 = vmax.f32 %v1337_v63, 0.0 }
 0x1ee   :  { %v1410_v42 = vmax.f32 %v1332_v18, 0.0 }
 0x1ef   :  { %v1393_v43 = vmax.f32 %v1247_v21, 0.0  ;;  %1483 = vst.msk [vmem:[%s3241_s3 + $0x238] sm:$0xff] %vm273_vm0, %v1411_v37 }
 0x1f0   :  { %1482 = vst.msk [vmem:[%s3241_s3 + $0x230] sm:$0xff] %vm273_vm0, %v1410_v42 }
 0x1f1   :  { %1465 = vst.msk [vmem:[%s3241_s3 + $0x1a8] sm:$0xff] %vm273_vm0, %v1393_v43 }

// kernel: _conv_stack_features.6
= control target key start
LH: loop header
LB: loop body
LE: loop exit
PB: predicated region body
PF: predicated region fallthrough
CT: control target
= control target key end

     0   :  { %v681_v0 = vmov 0.0|0.0   ;;  %vm111_vm0 = vcmask 261120   ;;  %s1129_s1 = inlined_call_operand.vmem [shape: f32[288,32], index: 1, kind: input, shape index: {}]   ;;  %s1130_s0 = inlined_call_operand.vmem [shape: f32[144,288], index: 0, kind: input, shape index: {}]   ;;  %s1131_s2 = inlined_call_operand.vmem [shape: f32[1,32], index: 2, kind: input, shape index: {}]   ;;  %s1132_s3 = inlined_call_operand.vmem [shape: f32[144,32], index: 3, kind: output, shape index: {}]  }
   0x1   :  { %592 = vmatprep.subr.bf16.mxu0 %v681_v0  ;;  %648 = vmatprep.subr.bf16.mxu1 %v681_v0  ;;  %v68_v1 = vld [vmem:[%s1129_s1] sm:$0xff]  ;;  %v69_v2 = vld [vmem:[%s1129_s1 + $0x8] sm:$0xff]  ;;  %v70_v3 = vld [vmem:[%s1129_s1 + $0x10] sm:$0xff] }
   0x2   :  { %v593_v4 = vpack.c.bf16 %v69_v2, %v68_v1  ;;  %v71_v5 = vld [vmem:[%s1129_s1 + $0x18] sm:$0xff]  ;;  %v72_v7 = vld [vmem:[%s1129_s1 + $0x20] sm:$0xff]  ;;  %v73_v8 = vld [vmem:[%s1129_s1 + $0x28] sm:$0xff] }
   0x3   :  { %v596_v6 = vpack.c.bf16 %v71_v5, %v70_v3  ;;  %v599_v9 = vpack.c.bf16 %v73_v8, %v72_v7  ;;  %v74_v10 = vld [vmem:[%s1129_s1 + $0x30] sm:$0xff]  ;;  %v75_v11 = vld [vmem:[%s1129_s1 + $0x38] sm:$0xff]  ;;  %v15_v12 = vld [vmem:[%s1130_s0 + $0x8] sm:$0xff] }
   0x4   :  { %594 = vmatpush1.bf16.msra.mxu0 %v593_v4  ;;  %664 = vmatpush1.bf16.msra.mxu1 %v593_v4  ;;  %v602_v13 = vpack.c.bf16 %v75_v11, %v74_v10  ;;  %v57_v14 = vld [vmem:[%s1130_s0 + $0x158] sm:$0xff]  ;;  %v76_v15 = vld [vmem:[%s1129_s1 + $0x40] sm:$0xff]  ;;  %v77_v16 = vld [vmem:[%s1129_s1 + $0x48] sm:$0xff] }
   0x5   :  { %595 = vmatprep.subr.bf16.mxu0 %v681_v0  ;;  %649 = vmatprep.subr.bf16.mxu1 %v681_v0  ;;  %v605_v17 = vpack.c.bf16 %v77_v16, %v76_v15  ;;  %v78_v18 = vld [vmem:[%s1129_s1 + $0x50] sm:$0xff]  ;;  %v79_v19 = vld [vmem:[%s1129_s1 + $0x58] sm:$0xff]  ;;  %v80_v21 = vld [vmem:[%s1129_s1 + $0x60] sm:$0xff] }
   0x6   :  { %230 = vmatprep.mubr.f32.mxu0 %v15_v12  ;;  %300 = vmatprep.mubr.f32.mxu1 %v57_v14  ;;  %v608_v20 = vpack.c.bf16 %v79_v19, %v78_v18  ;;  %v81_v22 = vld [vmem:[%s1129_s1 + $0x68] sm:$0xff]  ;;  %v82_v24 = vld [vmem:[%s1129_s1 + $0x70] sm:$0xff]  ;;  %v83_v25 = vld [vmem:[%s1129_s1 + $0x78] sm:$0xff] }
   0x7   :  { %v611_v23 = vpack.c.bf16 %v81_v22, %v80_v21  ;;  %v614_v26 = vpack.c.bf16 %v83_v25, %v82_v24  ;;  %v84_v27 = vld [vmem:[%s1129_s1 + $0x80] sm:$0xff]  ;;  %v85_v28 = vld [vmem:[%s1129_s1 + $0x88] sm:$0xff]  ;;  %v86_v30 = vld [vmem:[%s1129_s1 + $0x90] sm:$0xff] }
   0x8   :  { %597 = vmatpush1.bf16.msra.mxu0 %v596_v6  ;;  %665 = vmatpush1.bf16.msra.mxu1 %v596_v6  ;;  %v617_v29 = vpack.c.bf16 %v85_v28, %v84_v27  ;;  %v87_v31 = vld [vmem:[%s1129_s1 + $0x98] sm:$0xff]  ;;  %v88_v33 = vld [vmem:[%s1129_s1 + $0xa0] sm:$0xff]  ;;  %v89_v34 = vld [vmem:[%s1129_s1 + $0xa8] sm:$0xff] }
   0x9   :  { %598 = vmatprep.subr.bf16.mxu0 %v681_v0  ;;  %650 = vmatprep.subr.bf16.mxu1 %v681_v0  ;;  %v620_v32 = vpack.c.bf16 %v87_v31, %v86_v30  ;;  %v623_v35 = vpack.c.bf16 %v89_v34, %v88_v33  ;;  %v90_v36 = vld [vmem:[%s1129_s1 + $0xb0] sm:$0xff]  ;;  %v91_v37 = vld [vmem:[%s1129_s1 + $0xb8] sm:$0xff]  ;;  %v92_v39 = vld [vmem:[%s1129_s1 + $0xc0] sm:$0xff] }
   0xa   :  { %v626_v38 = vpack.c.bf16 %v91_v37, %v90_v36  ;;  %v93_v40 = vld [vmem:[%s1129_s1 + $0xc8] sm:$0xff]  ;;  %v94_v42 = vld [vmem:[%s1129_s1 + $0xd0] sm:$0xff]  ;;  %v95_v43 = vld [vmem:[%s1129_s1 + $0xd8] sm:$0xff] }
   0xb   :  { %v629_v41 = vpack.c.bf16 %v93_v40, %v92_v39  ;;  %v632_v44 = vpack.c.bf16 %v95_v43, %v94_v42  ;;  %v96_v45 = vld [vmem:[%s1129_s1 + $0xe0] sm:$0xff]  ;;  %v97_v46 = vld [vmem:[%s1129_s1 + $0xe8] sm:$0xff]  ;;  %v98_v48 = vld [vmem:[%s1129_s1 + $0xf0] sm:$0xff] }
   0xc   :  { %600 = vmatpush1.bf16.msra.mxu0 %v599_v9  ;;  %666 = vmatpush1.bf16.msra.mxu1 %v599_v9  ;;  %v635_v47 = vpack.c.bf16 %v97_v46, %v96_v45  ;;  %v99_v49 = vld [vmem:[%s1129_s1 + $0xf8] sm:$0xff]  ;;  %v100_v50 = vld [vmem:[%s1129_s1 + $0x100] sm:$0xff]  ;;  %v101_v51 = vld [vmem:[%s1129_s1 + $0x108] sm:$0xff] }
   0xd   :  { %601 = vmatprep.subr.bf16.mxu0 %v681_v0  ;;  %651 = vmatprep.subr.bf16.mxu1 %v681_v0  ;;  %v638_v52 = vpack.c.bf16 %v99_v49, %v98_v48  ;;  %v640_v53 = vpack.c.bf16 %v101_v51, %v100_v50  ;;  %v102_v54 = vld [vmem:[%s1129_s1 + $0x110] sm:$0xff]  ;;  %v103_v55 = vld [vmem:[%s1129_s1 + $0x118] sm:$0xff]  ;;  %v14_v56 = vld [vmem:[%s1130_s0] sm:$0xff] }
   0xe   :  { %v56_v57 = vld [vmem:[%s1130_s0 + $0x150] sm:$0xff]  ;;  %v18_v58 = vld [vmem:[%s1130_s0 + $0x20] sm:$0xff]  ;;  %v644_v60 = vpack.c.bf16 %v103_v55, %v102_v54  ;;  %v17_v61 = vld [vmem:[%s1130_s0 + $0x18] sm:$0xff] }
   0xf   :  { %v60_v59 = vld [vmem:[%s1130_s0 + $0x170] sm:$0xff]  ;;  %v59_v62 = vld [vmem:[%s1130_s0 + $0x168] sm:$0xff]  ;;  %v21_v63 = vld [vmem:[%s1130_s0 + $0x38] sm:$0xff] }
  0x10   :  { %603 = vmatpush1.bf16.msra.mxu0 %v602_v13  ;;  %667 = vmatpush1.bf16.msra.mxu1 %v602_v13  ;;  %v20_v1 = vld [vmem:[%s1130_s0 + $0x30] sm:$0xff]  ;;  %v62_v2 = vld [vmem:[%s1130_s0 + $0x180] sm:$0xff]  ;;  %v23_v5 = vld [vmem:[%s1130_s0 + $0x48] sm:$0xff] }
  0x11   :  { %604 = vmatprep.subr.bf16.mxu0 %v681_v0  ;;  %652 = vmatprep.subr.bf16.mxu1 %v681_v0  ;;  %v24_v3 = vld [vmem:[%s1130_s0 + $0x50] sm:$0xff]  ;;  %v66_v4 = vld [vmem:[%s1130_s0 + $0x1a0] sm:$0xff]  ;;  %v65_v6 = vld [vmem:[%s1130_s0 + $0x198] sm:$0xff] }
  0x12   :  { %v27_v7 = vld [vmem:[%s1130_s0 + $0x68] sm:$0xff]  ;;  %v16_v8 = vld [vmem:[%s1130_s0 + $0x10] sm:$0xff]  ;;  %v26_v9 = vld [vmem:[%s1130_s0 + $0x60] sm:$0xff] }
  0x13   :  { %v19_v10 = vld [vmem:[%s1130_s0 + $0x28] sm:$0xff]  ;;  %v30_v11 = vld [vmem:[%s1130_s0 + $0x80] sm:$0xff]  ;;  %v29_v13 = vld [vmem:[%s1130_s0 + $0x78] sm:$0xff] }
  0x14   :  { %606 = vmatpush1.bf16.msra.mxu0 %v605_v17  ;;  %668 = vmatpush1.bf16.msra.mxu1 %v605_v17  ;;  %v22_v12 = vld [vmem:[%s1130_s0 + $0x40] sm:$0xff]  ;;  %v25_v14 = vld [vmem:[%s1130_s0 + $0x58] sm:$0xff]  ;;  %v28_v16 = vld [vmem:[%s1130_s0 + $0x70] sm:$0xff] }
  0x15   :  { %607 = vmatprep.subr.bf16.mxu0 %v681_v0  ;;  %653 = vmatprep.subr.bf16.mxu1 %v681_v0  ;;  %v33_v15 = vld [vmem:[%s1130_s0 + $0x98] sm:$0xff]  ;;  %v32_v17 = vld [vmem:[%s1130_s0 + $0x90] sm:$0xff]  ;;  %v31_v18 = vld [vmem:[%s1130_s0 + $0x88] sm:$0xff] }
  0x16   :  { %v36_v19 = vld [vmem:[%s1130_s0 + $0xb0] sm:$0xff]  ;;  %v35_v21 = vld [vmem:[%s1130_s0 + $0xa8] sm:$0xff]  ;;  %v37_v22 = vld [vmem:[%s1130_s0 + $0xb8] sm:$0xff] }
  0x17   :  { %v40_v24 = vld [vmem:[%s1130_s0 + $0xd0] sm:$0xff]  ;;  %v38_v25 = vld [vmem:[%s1130_s0 + $0xc0] sm:$0xff]  ;;  %v49_v30 = vld [vmem:[%s1130_s0 + $0x118] sm:$0xff] }
  0x18   :  { %609 = vmatpush1.bf16.msra.mxu0 %v608_v20  ;;  %669 = vmatpush1.bf16.msra.mxu1 %v608_v20  ;;  %v34_v20 = vld [vmem:[%s1130_s0 + $0xa0] sm:$0xff]  ;;  %v45_v31 = vld [vmem:[%s1130_s0 + $0xf8] sm:$0xff]  ;;  %v44_v33 = vld [vmem:[%s1130_s0 + $0xf0] sm:$0xff] }
  0x19   :  { %610 = vmatprep.subr.bf16.mxu0 %v681_v0  ;;  %654 = vmatprep.subr.bf16.mxu1 %v681_v0  ;;  %v42_v27 = vld [vmem:[%s1130_s0 + $0xe0] sm:$0xff]  ;;  %v55_v34 = vld [vmem:[%s1130_s0 + $0x148] sm:$0xff]  ;;  %v64_v40 = vld [vmem:[%s1130_s0 + $0x190] sm:$0xff] }
  0x1a   :  { %v46_v28 = vld [vmem:[%s1130_s0 + $0x100] sm:$0xff]  ;;  %v47_v37 = vld [vmem:[%s1130_s0 + $0x108] sm:$0xff] }
  0x1b   :  { %v58_v36 = vld [vmem:[%s1130_s0 + $0x160] sm:$0xff]  ;;  %v51_v39 = vld [vmem:[%s1130_s0 + $0x128] sm:$0xff] }
  0x1c   :  { %612 = vmatpush1.bf16.msra.mxu0 %v611_v23  ;;  %670 = vmatpush1.bf16.msra.mxu1 %v611_v23  ;;  %v39_v23 = vld [vmem:[%s1130_s0 + $0xc8] sm:$0xff]  ;;  %v54_v43 = vld [vmem:[%s1130_s0 + $0x140] sm:$0xff] }
  0x1d   :  { %613 = vmatprep.subr.bf16.mxu0 %v681_v0  ;;  %655 = vmatprep.subr.bf16.mxu1 %v681_v0  ;;  %v67_v42 = vld [vmem:[%s1130_s0 + $0x1a8] sm:$0xff] }
  0x20   :  { %615 = vmatpush1.bf16.msra.mxu0 %v614_v26  ;;  %671 = vmatpush1.bf16.msra.mxu1 %v614_v26  ;;  %v43_v26 = vld [vmem:[%s1130_s0 + $0xe8] sm:$0xff] }
  0x21   :  { %616 = vmatprep.subr.bf16.mxu0 %v681_v0  ;;  %656 = vmatprep.subr.bf16.mxu1 %v681_v0 }
  0x24   :  { %618 = vmatpush1.bf16.msra.mxu0 %v617_v29  ;;  %672 = vmatpush1.bf16.msra.mxu1 %v617_v29  ;;  %v41_v29 = vld [vmem:[%s1130_s0 + $0xd8] sm:$0xff] }
  0x25   :  { %619 = vmatprep.subr.bf16.mxu0 %v681_v0  ;;  %657 = vmatprep.subr.bf16.mxu1 %v681_v0 }
  0x28   :  { %621 = vmatpush1.bf16.msra.mxu0 %v620_v32  ;;  %673 = vmatpush1.bf16.msra.mxu1 %v620_v32  ;;  %v52_v32 = vld [vmem:[%s1130_s0 + $0x130] sm:$0xff] }
  0x29   :  { %622 = vmatprep.subr.bf16.mxu0 %v681_v0  ;;  %658 = vmatprep.subr.bf16.mxu1 %v681_v0 }
  0x2c   :  { %624 = vmatpush1.bf16.msra.mxu0 %v623_v35  ;;  %674 = vmatpush1.bf16.msra.mxu1 %v623_v35  ;;  %v48_v35 = vld [vmem:[%s1130_s0 + $0x110] sm:$0xff] }
  0x2d   :  { %625 = vmatprep.subr.bf16.mxu0 %v681_v0  ;;  %659 = vmatprep.subr.bf16.mxu1 %v681_v0 }
  0x30   :  { %627 = vmatpush1.bf16.msra.mxu0 %v626_v38  ;;  %675 = vmatpush1.bf16.msra.mxu1 %v626_v38  ;;  %v61_v38 = vld [vmem:[%s1130_s0 + $0x178] sm:$0xff] }
  0x31   :  { %628 = vmatprep.subr.bf16.mxu0 %v681_v0  ;;  %660 = vmatprep.subr.bf16.mxu1 %v681_v0 }
  0x34   :  { %630 = vmatpush1.bf16.msra.mxu0 %v629_v41  ;;  %676 = vmatpush1.bf16.msra.mxu1 %v629_v41  ;;  %v50_v41 = vld [vmem:[%s1130_s0 + $0x120] sm:$0xff] }
  0x35   :  { %631 = vmatprep.subr.bf16.mxu0 %v681_v0  ;;  %661 = vmatprep.subr.bf16.mxu1 %v681_v0 }
  0x38   :  { %633 = vmatpush1.bf16.msra.mxu0 %v632_v44  ;;  %677 = vmatpush1.bf16.msra.mxu1 %v632_v44  ;;  %v53_v44 = vld [vmem:[%s1130_s0 + $0x138] sm:$0xff] }
  0x39   :  { %634 = vmatprep.subr.bf16.mxu0 %v681_v0  ;;  %662 = vmatprep.subr.bf16.mxu1 %v681_v0 }
  0x3c   :  { %636 = vmatpush1.bf16.msra.mxu0 %v635_v47  ;;  %678 = vmatpush1.bf16.msra.mxu1 %v635_v47 }
  0x3d   :  { %637 = vmatprep.subr.bf16.mxu0 %v681_v0  ;;  %663 = vmatprep.subr.bf16.mxu1 %v681_v0  ;;  %v63_v0 = vld [vmem:[%s1130_s0 + $0x188] sm:$0xff] }
  0x40   :  { %639 = vmatpush1.bf16.msra.mxu0 %v638_v52  ;;  %679 = vmatpush1.bf16.msra.mxu1 %v638_v52 }
  0x41   :  { %641 = vmatprep.subr.bf16.mxu1 %v640_v53 }
  0x43   :  { %231 = vmatmul.mubr.f32.vlgmr.msra.gmra.mrb[0].mxu0 %v14_v56  ;;  %301 = vmatmul.mubr.f32.vlgmr.msra.gmra.mrb[0].mxu1 %v56_v57 }
  0x44   :  { %235 = vmatprep.mubr.f32.mxu0 %v18_v58  ;;  %305 = vmatprep.mubr.f32.mxu1 %v60_v59  ;;  %v1033_v59 = vld [vmem:[%s1131_s2] ss:$0 sm:$0xff] }
  0x45   :  { %643 = vmatpush3.bf16.msra.mxu1 %v640_v53 }
  0x46   :  { %645 = vmatprep.subr.bf16.mxu1 %v644_v60 }
  0x47   :  { %236 = vmatmul.mubr.f32.gmra.mrb[2].mxu0 %v17_v61  ;;  %306 = vmatmul.mubr.f32.gmra.mrb[2].mxu1 %v59_v62 }
  0x48   :  { %240 = vmatprep.mubr.f32.mxu0 %v21_v63  ;;  %310 = vmatprep.mubr.f32.mxu1 %v63_v0 }
  0x49   :  { %647 = vmatpush3.bf16.msra.mxu1 %v644_v60 }
  0x4b   :  { %241 = vmatmul.mubr.f32.gmra.mrb[4].mxu0 %v20_v1  ;;  %311 = vmatmul.mubr.f32.gmra.mrb[4].mxu1 %v62_v2 }
  0x4c   :  { %245 = vmatprep.mubr.f32.mxu0 %v24_v3  ;;  %315 = vmatprep.mubr.f32.mxu1 %v66_v4 }
  0x4f   :  { %246 = vmatmul.mubr.f32.gmra.mrb[6].mxu0 %v23_v5  ;;  %316 = vmatmul.mubr.f32.gmra.mrb[6].mxu1 %v65_v6 }
  0x50   :  { %250 = vmatprep.mubr.f32.mxu0 %v27_v7  ;;  %565 = vmatprep.mubr.msk.f32.mxu1 %vm111_vm0, %v16_v8 }
  0x53   :  { %251 = vmatmul.mubr.f32.gmra.mrb[8].mxu0 %v26_v9  ;;  %566 = vmatmul.mubr.msk.f32.vlgmr.msra.gmra.mrb[8].mxu1 %vm111_vm0, %v19_v10 }
  0x54   :  { %255 = vmatprep.mubr.f32.mxu0 %v30_v11  ;;  %568 = vmatprep.mubr.msk.f32.mxu1 %vm111_vm0, %v22_v12 }
  0x57   :  { %256 = vmatmul.mubr.f32.gmra.mrb[10].mxu0 %v29_v13  ;;  %569 = vmatmul.mubr.msk.f32.gmra.mrb[10].mxu1 %vm111_vm0, %v25_v14 }
  0x58   :  { %260 = vmatprep.mubr.f32.mxu0 %v33_v15  ;;  %571 = vmatprep.mubr.msk.f32.mxu1 %vm111_vm0, %v28_v16 }
  0x5b   :  { %261 = vmatmul.mubr.f32.gmra.mrb[12].mxu0 %v32_v17  ;;  %572 = vmatmul.mubr.msk.f32.gmra.mrb[12].mxu1 %vm111_vm0, %v31_v18 }
  0x5c   :  { %265 = vmatprep.mubr.f32.mxu0 %v36_v19  ;;  %574 = vmatprep.mubr.msk.f32.mxu1 %vm111_vm0, %v34_v20 }
  0x5f   :  { %266 = vmatmul.mubr.f32.gmra.mrb[14].mxu0 %v35_v21  ;;  %575 = vmatmul.mubr.msk.f32.gmra.mrb[14].mxu1 %vm111_vm0, %v37_v22 }
  0x60   :  { %270 = vmatprep.mubr.f32.mxu0 %v39_v23  ;;  %577 = vmatprep.mubr.msk.f32.mxu1 %vm111_vm0, %v40_v24 }
  0x63   :  { %271 = vmatmul.mubr.f32.gmra.mrb[16].mxu0 %v38_v25  ;;  %578 = vmatmul.mubr.msk.f32.gmra.mrb[16].mxu1 %vm111_vm0, %v43_v26 }
  0x64   :  { %275 = vmatprep.mubr.f32.mxu0 %v42_v27  ;;  %580 = vmatprep.mubr.msk.f32.mxu1 %vm111_vm0, %v46_v28 }
  0x67   :  { %276 = vmatmul.mubr.f32.gmra.mrb[18].mxu0 %v41_v29  ;;  %581 = vmatmul.mubr.msk.f32.gmra.mrb[18].mxu1 %vm111_vm0, %v49_v30 }
  0x68   :  { %280 = vmatprep.mubr.f32.mxu0 %v45_v31  ;;  %583 = vmatprep.mubr.msk.f32.mxu1 %vm111_vm0, %v52_v32 }
  0x6b   :  { %281 = vmatmul.mubr.f32.gmra.mrb[20].mxu0 %v44_v33  ;;  %584 = vmatmul.mubr.msk.f32.gmra.mrb[20].mxu1 %vm111_vm0, %v55_v34 }
  0x6c   :  { %285 = vmatprep.mubr.f32.mxu0 %v48_v35  ;;  %586 = vmatprep.mubr.msk.f32.mxu1 %vm111_vm0, %v58_v36 }
  0x6f   :  { %286 = vmatmul.mubr.f32.gmra.mrb[22].mxu0 %v47_v37  ;;  %587 = vmatmul.mubr.msk.f32.gmra.mrb[22].mxu1 %vm111_vm0, %v61_v38 }
  0x70   :  { %290 = vmatprep.mubr.f32.mxu0 %v51_v39  ;;  %589 = vmatprep.mubr.msk.f32.mxu1 %vm111_vm0, %v64_v40 }
  0x73   :  { %291 = vmatmul.mubr.f32.gmra.mrb[24].mxu0 %v50_v41  ;;  %590 = vmatmul.mubr.msk.f32.gmra.mrb[24].mxu1 %vm111_vm0, %v67_v42 }
  0x74   :  { %295 = vmatprep.mubr.f32.mxu0 %v54_v43 }
  0x77   :  { %296 = vmatmul.mubr.f32.gmra.mrb[26].mxu0 %v53_v44 }
 0x116   :  { %v232_v45 = vpop.f32.mrb[0].mxu0  ;;  %v1022_v46 = vpop.f32.mrb[0].mxu1 }
 0x117   :  { %v234_v47 = vpop.f32.mrb[1].mxu0  ;;  %v304_v48 = vpop.f32.mrb[1].mxu1  ;;  %v233_v63 = vadd.f32 %v1033_v59, %v232_v45 }
 0x11a   :  { %v237_v49 = vpop.f32.mrb[2].mxu0  ;;  %v1024_v50 = vpop.f32.mrb[2].mxu1 }
 0x11b   :  { %v239_v51 = vpop.f32.mrb[3].mxu0  ;;  %v309_v52 = vpop.f32.mrb[3].mxu1  ;;  %v238_v62 = vadd.f32 %v1033_v59, %v237_v49 }
 0x11e   :  { %v242_v53 = vpop.f32.mrb[4].mxu0  ;;  %v1026_v54 = vpop.f32.mrb[4].mxu1 }
 0x11f   :  { %v244_v55 = vpop.f32.mrb[5].mxu0  ;;  %v314_v56 = vpop.f32.mrb[5].mxu1  ;;  %v243_v8 = vadd.f32 %v1033_v59, %v242_v53 }
 0x122   :  { %v247_v57 = vpop.f32.mrb[6].mxu0  ;;  %v1028_v58 = vpop.f32.mrb[6].mxu1 }
 0x123   :  { %v249_v60 = vpop.f32.mrb[7].mxu0  ;;  %v319_v61 = vpop.f32.mrb[7].mxu1  ;;  %v248_v6 = vadd.f32 %v1033_v59, %v247_v57 }
 0x126   :  { %v252_v0 = vpop.f32.mrb[8].mxu0  ;;  %v567_v1 = vpop.f32.mrb[8].mxu1 }
 0x127   :  { %v393_v2 = vadd.f32 %v567_v1, %v238_v62  ;;  %v254_v3 = vpop.f32.mrb[9].mxu0  ;;  %v387_v4 = vpop.f32.mrb[9].mxu1  ;;  %v253_v18 = vadd.f32 %v1033_v59, %v252_v0  ;;  %v308_v62 = vadd.f32 %v1033_v59, %v1024_v50  ;;  %v303_v0 = vadd.f32 %v1033_v59, %v1022_v46 }
 0x128   :  { %v388_v5 = vadd.f32 %v387_v4, %v233_v63  ;;  %v318_v50 = vadd.f32 %v1033_v59, %v1028_v58  ;;  %v313_v46 = vadd.f32 %v1033_v59, %v1026_v54 }
 0x129   :  { %v477_v7 = vmax.f32 %v393_v2, 0.0 }
 0x12a   :  { %v476_v9 = vmax.f32 %v388_v5, 0.0  ;;  %v257_v10 = vpop.f32.mrb[10].mxu0  ;;  %v570_v11 = vpop.f32.mrb[10].mxu1 }
 0x12b   :  { %495 = vst.msk [vmem:[%s1132_s3 + $0x8] sm:$0xff] %vm111_vm0, %v477_v7  ;;  %v403_v12 = vadd.f32 %v570_v11, %v248_v6  ;;  %v259_v13 = vpop.f32.mrb[11].mxu0  ;;  %v397_v14 = vpop.f32.mrb[11].mxu1  ;;  %v258_v16 = vadd.f32 %v1033_v59, %v257_v10 }
 0x12c   :  { %494 = vst.msk [vmem:[%s1132_s3] sm:$0xff] %vm111_vm0, %v476_v9  ;;  %v398_v15 = vadd.f32 %v397_v14, %v243_v8 }
 0x12d   :  { %v479_v17 = vmax.f32 %v403_v12, 0.0 }
 0x12e   :  { %v478_v19 = vmax.f32 %v398_v15, 0.0  ;;  %v262_v20 = vpop.f32.mrb[12].mxu0  ;;  %v573_v21 = vpop.f32.mrb[12].mxu1 }
 0x12f   :  { %497 = vst.msk [vmem:[%s1132_s3 + $0x18] sm:$0xff] %vm111_vm0, %v479_v17  ;;  %v413_v22 = vadd.f32 %v573_v21, %v258_v16  ;;  %v264_v23 = vpop.f32.mrb[13].mxu0  ;;  %v407_v24 = vpop.f32.mrb[13].mxu1  ;;  %v263_v27 = vadd.f32 %v1033_v59, %v262_v20 }
 0x130   :  { %496 = vst.msk [vmem:[%s1132_s3 + $0x10] sm:$0xff] %vm111_vm0, %v478_v19  ;;  %v408_v25 = vadd.f32 %v407_v24, %v253_v18 }
 0x131   :  { %v481_v26 = vmax.f32 %v413_v22, 0.0 }
 0x132   :  { %v480_v28 = vmax.f32 %v408_v25, 0.0  ;;  %v267_v29 = vpop.f32.mrb[14].mxu0  ;;  %v576_v30 = vpop.f32.mrb[14].mxu1 }
 0x133   :  { %499 = vst.msk [vmem:[%s1132_s3 + $0x28] sm:$0xff] %vm111_vm0, %v481_v26  ;;  %v268_v31 = vadd.f32 %v1033_v59, %v267_v29  ;;  %v269_v32 = vpop.f32.mrb[15].mxu0  ;;  %v417_v33 = vpop.f32.mrb[15].mxu1 }
 0x134   :  { %498 = vst.msk [vmem:[%s1132_s3 + $0x20] sm:$0xff] %vm111_vm0, %v480_v28  ;;  %v418_v34 = vadd.f32 %v417_v33, %v263_v27 }
 0x135   :  { %v423_v35 = vadd.f32 %v576_v30, %v268_v31 }
 0x136   :  { %v482_v36 = vmax.f32 %v418_v34, 0.0  ;;  %v272_v37 = vpop.f32.mrb[16].mxu0  ;;  %v579_v38 = vpop.f32.mrb[16].mxu1 }
 0x137   :  { %v483_v39 = vmax.f32 %v423_v35, 0.0  ;;  %v273_v40 = vadd.f32 %v1033_v59, %v272_v37  ;;  %v274_v41 = vpop.f32.mrb[17].mxu0  ;;  %v427_v42 = vpop.f32.mrb[17].mxu1 }
 0x138   :  { %500 = vst.msk [vmem:[%s1132_s3 + $0x30] sm:$0xff] %vm111_vm0, %v482_v36 }
 0x139   :  { %501 = vst.msk [vmem:[%s1132_s3 + $0x38] sm:$0xff] %vm111_vm0, %v483_v39  ;;  %v428_v43 = vadd.f32 %v427_v42, %v273_v40 }
 0x13a   :  { %v277_v44 = vpop.f32.mrb[18].mxu0  ;;  %v582_v45 = vpop.f32.mrb[18].mxu1 }
 0x13b   :  { %v484_v47 = vmax.f32 %v428_v43, 0.0  ;;  %v278_v48 = vadd.f32 %v1033_v59, %v277_v44  ;;  %v279_v49 = vpop.f32.mrb[19].mxu0  ;;  %v437_v51 = vpop.f32.mrb[19].mxu1 }
 0x13d   :  { %502 = vst.msk [vmem:[%s1132_s3 + $0x40] sm:$0xff] %vm111_vm0, %v484_v47  ;;  %v433_v52 = vadd.f32 %v579_v38, %v278_v48 }
 0x13e   :  { %v282_v53 = vpop.f32.mrb[20].mxu0  ;;  %v585_v55 = vpop.f32.mrb[20].mxu1 }
 0x13f   :  { %v485_v56 = vmax.f32 %v433_v52, 0.0  ;;  %v283_v57 = vadd.f32 %v1033_v59, %v282_v53  ;;  %v284_v60 = vpop.f32.mrb[21].mxu0  ;;  %v447_v61 = vpop.f32.mrb[21].mxu1 }
 0x141   :  { %503 = vst.msk [vmem:[%s1132_s3 + $0x48] sm:$0xff] %vm111_vm0, %v485_v56  ;;  %v438_v63 = vadd.f32 %v437_v51, %v283_v57 }
 0x142   :  { %v287_v1 = vpop.f32.mrb[22].mxu0  ;;  %v588_v2 = vpop.f32.mrb[22].mxu1 }
 0x143   :  { %v486_v3 = vmax.f32 %v438_v63, 0.0  ;;  %v288_v4 = vadd.f32 %v1033_v59, %v287_v1  ;;  %v463_v5 = vadd.f32 %v588_v2, %v308_v62  ;;  %v289_v6 = vpop.f32.mrb[23].mxu0  ;;  %v457_v7 = vpop.f32.mrb[23].mxu1 }
 0x144   :  { %v458_v8 = vadd.f32 %v457_v7, %v303_v0 }
 0x145   :  { %504 = vst.msk [vmem:[%s1132_s3 + $0x50] sm:$0xff] %vm111_vm0, %v486_v3  ;;  %v443_v9 = vadd.f32 %v582_v45, %v288_v4  ;;  %v491_v10 = vmax.f32 %v463_v5, 0.0 }
 0x146   :  { %v490_v11 = vmax.f32 %v458_v8, 0.0  ;;  %v292_v12 = vpop.f32.mrb[24].mxu0  ;;  %v591_v13 = vpop.f32.mrb[24].mxu1 }
 0x147   :  { %v487_v14 = vmax.f32 %v443_v9, 0.0  ;;  %509 = vst.msk [vmem:[%s1132_s3 + $0x78] sm:$0xff] %vm111_vm0, %v491_v10  ;;  %v293_v58 = vadd.f32 %v1033_v59, %v292_v12  ;;  %v473_v15 = vadd.f32 %v591_v13, %v318_v50  ;;  %v294_v16 = vpop.f32.mrb[25].mxu0  ;;  %v467_v17 = vpop.f32.mrb[25].mxu1 }
 0x148   :  { %508 = vst.msk [vmem:[%s1132_s3 + $0x70] sm:$0xff] %vm111_vm0, %v490_v11  ;;  %v468_v54 = vadd.f32 %v467_v17, %v313_v46 }
 0x149   :  { %505 = vst.msk [vmem:[%s1132_s3 + $0x58] sm:$0xff] %vm111_vm0, %v487_v14  ;;  %v448_v18 = vadd.f32 %v447_v61, %v293_v58  ;;  %v493_v19 = vmax.f32 %v473_v15, 0.0 }
 0x14a   :  { %v492_v20 = vmax.f32 %v468_v54, 0.0  ;;  %v297_v21 = vpop.f32.mrb[26].mxu0 }
 0x14b   :  { %v488_v22 = vmax.f32 %v448_v18, 0.0  ;;  %511 = vst.msk [vmem:[%s1132_s3 + $0x88] sm:$0xff] %vm111_vm0, %v493_v19  ;;  %v298_v23 = vadd.f32 %v1033_v59, %v297_v21  ;;  %v299_v24 = vpop.f32.mrb[27].mxu0 }
 0x14c   :  { %510 = vst.msk [vmem:[%s1132_s3 + $0x80] sm:$0xff] %vm111_vm0, %v492_v20 }
 0x14d   :  { %506 = vst.msk [vmem:[%s1132_s3 + $0x60] sm:$0xff] %vm111_vm0, %v488_v22  ;;  %v453_v25 = vadd.f32 %v585_v55, %v298_v23 }
 0x14f   :  { %v489_v26 = vmax.f32 %v453_v25, 0.0 }
 0x151   :  { %507 = vst.msk [vmem:[%s1132_s3 + $0x68] sm:$0xff] %vm111_vm0, %v489_v26 }

// kernel: _conv_stack_features.7
= control target key start
LH: loop header
LB: loop body
LE: loop exit
PB: predicated region body
PF: predicated region fallthrough
CT: control target
= control target key end

     0   :  { %v441_v3 = vmov 0.0|0.0   ;;  %vm442_vm0 = vmmov 0   ;;  %v443_v4 = vmov 0.0   ;;  %vm72_vm1 = vcmask 261120   ;;  %s654_s1 = inlined_call_operand.vmem [shape: f32[288,32], index: 1, kind: input, shape index: {}]   ;;  %s655_s0 = inlined_call_operand.vmem [shape: f32[36,288], index: 0, kind: input, shape index: {}]   ;;  %s656_s2 = inlined_call_operand.vmem [shape: f32[1,32], index: 2, kind: input, shape index: {}]   ;;  %s657_s3 = inlined_call_operand.vmem [shape: bf16[36,32], index: 3, kind: output, shape index: {}]  }
   0x1   :  { %v45_v0 = vld [vmem:[%s654_s1 + $0x80] sm:$0xff]  ;;  %v46_v1 = vld [vmem:[%s654_s1 + $0x88] sm:$0xff]  ;;  %432 = vmatprep.subr.bf16.mxu1 %v441_v3  ;;  %385 = vmatprep.mubr.msk.f32.mxu1 %vm442_vm0, %v443_v4  ;;  %v47_v7 = vld [vmem:[%s654_s1 + $0x90] sm:$0xff]  ;;  %vm294_vm2 = vcmask 257024   ;;  %vm299_vm3 = vcmask 254976  }
   0x2   :  { %v29_v2 = vld [vmem:[%s654_s1] sm:$0xff]  ;;  %v400_v5 = vpack.c.bf16 %v46_v1, %v45_v0  ;;  %v30_v6 = vld [vmem:[%s654_s1 + $0x8] sm:$0xff]  ;;  %v48_v8 = vld [vmem:[%s654_s1 + $0x98] sm:$0xff] }
   0x3   :  { %v402_v9 = vpack.c.bf16 %v30_v6, %v29_v2  ;;  %v404_v10 = vpack.c.bf16 %v48_v8, %v47_v7  ;;  %v31_v11 = vld [vmem:[%s654_s1 + $0x10] sm:$0xff]  ;;  %v32_v12 = vld [vmem:[%s654_s1 + $0x18] sm:$0xff]  ;;  %v49_v13 = vld [vmem:[%s654_s1 + $0xa0] sm:$0xff] }
   0x4   :  { %401 = vmatprep.subr.bf16.mxu0 %v400_v5  ;;  %v50_v14 = vld [vmem:[%s654_s1 + $0xa8] sm:$0xff]  ;;  %v406_v15 = vpack.c.bf16 %v32_v12, %v31_v11  ;;  %v33_v17 = vld [vmem:[%s654_s1 + $0x20] sm:$0xff]  ;;  %v51_v19 = vld [vmem:[%s654_s1 + $0xb0] sm:$0xff] }
   0x5   :  { %403 = vmatpush3.bf16.msra.mxu0 %v402_v9  ;;  %v408_v16 = vpack.c.bf16 %v50_v14, %v49_v13  ;;  %v34_v18 = vld [vmem:[%s654_s1 + $0x28] sm:$0xff]  ;;  %v52_v20 = vld [vmem:[%s654_s1 + $0xb8] sm:$0xff]  ;;  %v35_v23 = vld [vmem:[%s654_s1 + $0x30] sm:$0xff] }
   0x6   :  { %405 = vmatprep.subr.bf16.mxu0 %v404_v10  ;;  %v410_v21 = vpack.c.bf16 %v34_v18, %v33_v17  ;;  %v412_v22 = vpack.c.bf16 %v52_v20, %v51_v19  ;;  %v36_v24 = vld [vmem:[%s654_s1 + $0x38] sm:$0xff]  ;;  %v53_v25 = vld [vmem:[%s654_s1 + $0xc0] sm:$0xff]  ;;  %v54_v26 = vld [vmem:[%s654_s1 + $0xc8] sm:$0xff] }
   0x7   :  { %v61_v27 = vld [vmem:[%s654_s1 + $0x100] sm:$0xff]  ;;  %v62_v28 = vld [vmem:[%s654_s1 + $0x108] sm:$0xff]  ;;  %v414_v30 = vpack.c.bf16 %v36_v24, %v35_v23  ;;  %v63_v32 = vld [vmem:[%s654_s1 + $0x110] sm:$0xff]  ;;  %v416_v34 = vpack.c.bf16 %v54_v26, %v53_v25 }
   0x8   :  { %v15_v29 = vld [vmem:[%s655_s0 + $0x8] sm:$0xff]  ;;  %v433_v31 = vpack.c.bf16 %v62_v28, %v61_v27  ;;  %v64_v33 = vld [vmem:[%s654_s1 + $0x118] sm:$0xff]  ;;  %v37_v35 = vld [vmem:[%s654_s1 + $0x40] sm:$0xff] }
   0x9   :  { %407 = vmatpush3.bf16.msra.mxu0 %v406_v15  ;;  %152 = vmatprep.mubr.f32.mxu0 %v15_v29  ;;  %v38_v36 = vld [vmem:[%s654_s1 + $0x48] sm:$0xff]  ;;  %v55_v37 = vld [vmem:[%s654_s1 + $0xd0] sm:$0xff]  ;;  %v56_v38 = vld [vmem:[%s654_s1 + $0xd8] sm:$0xff]  ;;  %v436_v39 = vpack.c.bf16 %v64_v33, %v63_v32 }
   0xa   :  { %409 = vmatprep.subr.bf16.mxu0 %v408_v16  ;;  %434 = vmatpush3.bf16.msra.mxu1 %v433_v31  ;;  %v418_v40 = vpack.c.bf16 %v38_v36, %v37_v35  ;;  %v420_v41 = vpack.c.bf16 %v56_v38, %v55_v37  ;;  %v39_v42 = vld [vmem:[%s654_s1 + $0x50] sm:$0xff]  ;;  %v40_v43 = vld [vmem:[%s654_s1 + $0x58] sm:$0xff]  ;;  %v57_v44 = vld [vmem:[%s654_s1 + $0xe0] sm:$0xff] }
   0xb   :  { %435 = vmatprep.subr.bf16.mxu1 %v441_v3  ;;  %v58_v45 = vld [vmem:[%s654_s1 + $0xe8] sm:$0xff]  ;;  %v16_v46 = vld [vmem:[%s655_s0 + $0x10] sm:$0xff]  ;;  %v422_v47 = vpack.c.bf16 %v40_v43, %v39_v42  ;;  %v41_v49 = vld [vmem:[%s654_s1 + $0x60] sm:$0xff] }
   0xc   :  { %v424_v48 = vpack.c.bf16 %v58_v45, %v57_v44  ;;  %v42_v50 = vld [vmem:[%s654_s1 + $0x68] sm:$0xff]  ;;  %v59_v51 = vld [vmem:[%s654_s1 + $0xf0] sm:$0xff]  ;;  %v60_v52 = vld [vmem:[%s654_s1 + $0xf8] sm:$0xff] }
   0xd   :  { %411 = vmatpush3.bf16.msra.mxu0 %v410_v21  ;;  %v19_v53 = vld [vmem:[%s655_s0 + $0x28] sm:$0xff]  ;;  %v426_v54 = vpack.c.bf16 %v42_v50, %v41_v49  ;;  %v428_v55 = vpack.c.bf16 %v60_v52, %v59_v51  ;;  %v43_v56 = vld [vmem:[%s654_s1 + $0x70] sm:$0xff]  ;;  %v44_v57 = vld [vmem:[%s654_s1 + $0x78] sm:$0xff] }
   0xe   :  { %413 = vmatprep.subr.bf16.mxu0 %v412_v22  ;;  %437 = vmatpush3.bf16.msra.mxu1 %v436_v39  ;;  %v22_v58 = vld [vmem:[%s655_s0 + $0x40] sm:$0xff]  ;;  %v430_v59 = vpack.c.bf16 %v44_v57, %v43_v56  ;;  %v25_v60 = vld [vmem:[%s655_s0 + $0x58] sm:$0xff]  ;;  %v28_v63 = vld [vmem:[%s655_s0 + $0x70] sm:$0xf] }
   0xf   :  { %v14_v61 = vld [vmem:[%s655_s0] sm:$0xff]  ;;  %v17_v0 = vld [vmem:[%s655_s0 + $0x18] sm:$0xff]  ;;  %v20_v2 = vld [vmem:[%s655_s0 + $0x30] sm:$0xff] }
  0x10   :  { %v18_v62 = vld [vmem:[%s655_s0 + $0x20] sm:$0xff]  ;;  %v21_v1 = vld [vmem:[%s655_s0 + $0x38] sm:$0xff]  ;;  %v24_v3 = vld [vmem:[%s655_s0 + $0x50] sm:$0xff] }
  0x11   :  { %415 = vmatpush3.bf16.msra.mxu0 %v414_v30  ;;  %386 = vmatmul.mubr.msk.f32.vlgmr.msra.gmra.mrb[0].mxu1 %vm72_vm1, %v16_v46  ;;  %v27_v5 = vld [vmem:[%s655_s0 + $0x68] sm:$0xf]  ;;  %v26_v6 = vld [vmem:[%s655_s0 + $0x60] sm:$0xf] }
  0x12   :  { %417 = vmatprep.subr.bf16.mxu0 %v416_v34  ;;  %388 = vmatprep.mubr.msk.f32.mxu1 %vm442_vm0, %v443_v4  ;;  %v305_v17 = vld [vmem:[%s656_s2] ss:$0 sm:$0xff] }
  0x15   :  { %419 = vmatpush3.bf16.msra.mxu0 %v418_v40  ;;  %389 = vmatmul.mubr.msk.f32.gmra.mrb[2].mxu1 %vm72_vm1, %v19_v53 }
  0x16   :  { %421 = vmatprep.subr.bf16.mxu0 %v420_v41  ;;  %391 = vmatprep.mubr.msk.f32.mxu1 %vm442_vm0, %v443_v4 }
  0x19   :  { %423 = vmatpush3.bf16.msra.mxu0 %v422_v47  ;;  %392 = vmatmul.mubr.msk.f32.gmra.mrb[4].mxu1 %vm72_vm1, %v22_v58 }
  0x1a   :  { %425 = vmatprep.subr.bf16.mxu0 %v424_v48  ;;  %394 = vmatprep.mubr.msk.f32.mxu1 %vm442_vm0, %v443_v4 }
  0x1d   :  { %427 = vmatpush3.bf16.msra.mxu0 %v426_v54  ;;  %395 = vmatmul.mubr.msk.f32.gmra.mrb[6].mxu1 %vm72_vm1, %v25_v60 }
  0x1e   :  { %429 = vmatprep.subr.bf16.mxu0 %v428_v55  ;;  %397 = vmatprep.mubr.msk.f32.mxu1 %vm442_vm0, %v443_v4  ;;  %v23_v4 = vld [vmem:[%s655_s0 + $0x48] sm:$0xff] }
  0x21   :  { %431 = vmatpush3.bf16.msra.mxu0 %v430_v59  ;;  %398 = vmatmul.mubr.msk.f32.gmra.mrb[8].mxu1 %vm72_vm1, %v28_v63 }
  0x24   :  { %153 = vmatmul.mubr.f32.vlgmr.msra.gmra.mrb[0].mxu0 %v14_v61 }
  0x25   :  { %157 = vmatprep.mubr.f32.mxu0 %v18_v62 }
  0x28   :  { %158 = vmatmul.mubr.f32.gmra.mrb[2].mxu0 %v17_v0 }
  0x29   :  { %162 = vmatprep.mubr.f32.mxu0 %v21_v1 }
  0x2c   :  { %163 = vmatmul.mubr.f32.gmra.mrb[4].mxu0 %v20_v2 }
  0x2d   :  { %167 = vmatprep.mubr.f32.mxu0 %v24_v3 }
  0x30   :  { %168 = vmatmul.mubr.f32.gmra.mrb[6].mxu0 %v23_v4 }
  0x31   :  { %172 = vmatprep.mubr.f32.mxu0 %v27_v5 }
  0x34   :  { %173 = vmatmul.mubr.f32.gmra.mrb[8].mxu0 %v26_v6 }
  0xe4   :  { %v244_v7 = vpop.f32.mrb[0].mxu1 }
  0xe5   :  { %v387_v8 = vpop.f32.mrb[1].mxu1 }
  0xe8   :  { %v249_v9 = vpop.f32.mrb[2].mxu1 }
  0xe9   :  { %v390_v10 = vpop.f32.mrb[3].mxu1 }
  0xec   :  { %v254_v11 = vpop.f32.mrb[4].mxu1 }
  0xed   :  { %v393_v12 = vpop.f32.mrb[5].mxu1 }
  0xf0   :  { %v259_v13 = vpop.f32.mrb[6].mxu1 }
  0xf1   :  { %v396_v14 = vpop.f32.mrb[7].mxu1 }
  0xf4   :  { %v264_v19 = vpop.f32.mrb[8].mxu1 }
  0xf5   :  { %v399_v20 = vpop.f32.mrb[9].mxu1 }
  0xf7   :  { %v353_v15 = vpop.f32.mrb[0].mxu0 }
  0xf8   :  { %v354_v16 = vpop.f32.mrb[1].mxu0 }
  0xf9   :  { %v355_v18 = vadd.f32 %v354_v16, %v353_v15 }
  0xfb   :  { %v356_v21 = vpop.f32.mrb[2].mxu0  ;;  %v155_v22 = vadd.f32 %v355_v18, %v305_v17 }
  0xfc   :  { %v357_v23 = vpop.f32.mrb[3].mxu0 }
  0xfd   :  { %v245_v24 = vadd.f32 %v244_v7, %v155_v22  ;;  %v358_v25 = vadd.f32 %v357_v23, %v356_v21 }
  0xff   :  { %v268_v26 = vmax.f32 %v245_v24, 0.0  ;;  %v359_v27 = vpop.f32.mrb[4].mxu0  ;;  %v160_v28 = vadd.f32 %v358_v25, %v305_v17 }
 0x100   :  { %v360_v29 = vpop.f32.mrb[5].mxu0 }
 0x101   :  { %v316_v30 = vpack.c.bf16 %v268_v26, %v268_v26  ;;  %v250_v31 = vadd.f32 %v249_v9, %v160_v28  ;;  %v361_v32 = vadd.f32 %v360_v29, %v359_v27 }
 0x103   :  { %295 = vst.msk [vmem:[%s657_s3] sm:$0xf] %vm294_vm2, %v316_v30  ;;  %v269_v33 = vmax.f32 %v250_v31, 0.0  ;;  %v362_v34 = vpop.f32.mrb[6].mxu0  ;;  %v165_v35 = vadd.f32 %v361_v32, %v305_v17 }
 0x104   :  { %v363_v36 = vpop.f32.mrb[7].mxu0 }
 0x105   :  { %v317_v37 = vpack.c.bf16 %v269_v33, %v269_v33  ;;  %v255_v38 = vadd.f32 %v254_v11, %v165_v35  ;;  %v364_v39 = vadd.f32 %v363_v36, %v362_v34 }
 0x107   :  { %296 = vst.msk [vmem:[%s657_s3 + $0x4] sm:$0xf] %vm294_vm2, %v317_v37  ;;  %v270_v40 = vmax.f32 %v255_v38, 0.0  ;;  %v365_v41 = vpop.f32.mrb[8].mxu0  ;;  %v170_v42 = vadd.f32 %v364_v39, %v305_v17 }
 0x108   :  { %v366_v43 = vpop.f32.mrb[9].mxu0 }
 0x109   :  { %v318_v44 = vpack.c.bf16 %v270_v40, %v270_v40  ;;  %v260_v45 = vadd.f32 %v259_v13, %v170_v42  ;;  %v367_v46 = vadd.f32 %v366_v43, %v365_v41 }
 0x10b   :  { %297 = vst.msk [vmem:[%s657_s3 + $0x8] sm:$0xf] %vm294_vm2, %v318_v44  ;;  %v271_v47 = vmax.f32 %v260_v45, 0.0  ;;  %v175_v48 = vadd.f32 %v367_v46, %v305_v17 }
 0x10d   :  { %v319_v49 = vpack.c.bf16 %v271_v47, %v271_v47  ;;  %v265_v50 = vadd.f32 %v264_v19, %v175_v48 }
 0x10f   :  { %298 = vst.msk [vmem:[%s657_s3 + $0xc] sm:$0xf] %vm294_vm2, %v319_v49  ;;  %v272_v51 = vmax.f32 %v265_v50, 0.0 }
 0x111   :  { %v320_v52 = vpack.c.bf16 %v272_v51, %v272_v51 }
 0x113   :  { %300 = vst.msk [vmem:[%s657_s3 + $0x10] sm:$0x3] %vm299_vm3, %v320_v52 }

</bundles_post_ra>
